<compile_context>
chip_gen: v7x
topology: tpu7x:2x2x1
jax: 0.10.0
libtpu: 0.0.40
codegen_flags: <defaults>
</compile_context>

<pallas_src>
import jax
import jax.numpy as jnp
from jax.experimental import pallas as pl
from jax.experimental.pallas import tpu as pltpu

Z_PAD = 128        # latent half padded to one full 128-lane tile
SUBLANE = 8        # f32 sublane tile
D896 = 896         # 784 padded up to 7*128


def _round_up(n, m):
    return ((n + m - 1) // m) * m


# ---------------------------------------------------------------------------
# Fused Pallas kernel: encode -> reparameterize -> decode in one body
# ---------------------------------------------------------------------------
def _fc_fused_kernel(
    x_ref, eps_ref,
    w1_ref, b1_ref, w2_ref, b2_ref, w3_ref, b3_ref, w4_ref, b4_ref,   # encoder
    w5_ref, b5_ref, w6_hbm, b6_ref, w7_ref, b7_ref, w8_hbm, b8_ref,   # decoder
    recon_ref, muvar_ref,
    w6_vmem, w8_vmem, dma_sems,
):
    # Kick off the two big decoder-weight DMAs immediately so they overlap with
    # the encoder compute below instead of completing before the body starts.
    w6_cp = pltpu.make_async_copy(w6_hbm, w6_vmem, dma_sems.at[0])
    w8_cp = pltpu.make_async_copy(w8_hbm, w8_vmem, dma_sems.at[1])
    w6_cp.start()
    w8_cp.start()

    def dense(h_f32, w_bf16, b_ref, relu):
        # bf16 x bf16 MXU matmul, f32 accumulate, f32 bias add.
        y = jnp.dot(h_f32.astype(jnp.bfloat16), w_bf16,
                    preferred_element_type=jnp.float32)
        y = y + b_ref[...]
        if relu:
            y = jnp.maximum(y, 0.0)
        return y

    # ---- encode ----
    h = x_ref[...].astype(jnp.float32)
    h = dense(h, w1_ref[...], b1_ref, True)
    h = dense(h, w2_ref[...], b2_ref, True)
    h = dense(h, w3_ref[...], b3_ref, True)            # (Bp, 896), pad cols == 0
    muvar = dense(h, w4_ref[...], b4_ref, False)       # (Bp, 256) = [mu|0 || logvar|0]

    # ---- reparameterize: z = mu + exp(0.5*logvar) * eps (lane-128 aligned halves)
    mu_half = muvar[:, :Z_PAD]
    lv_half = muvar[:, Z_PAD:]
    z = mu_half + jnp.exp(0.5 * lv_half) * eps_ref[...]   # pad lanes: 0 + 1*0 = 0

    # ---- decode ----
    d = dense(z, w5_ref[...], b5_ref, True)
    w6_cp.wait()
    d = dense(d, w6_vmem[...], b6_ref, True)
    d = dense(d, w7_ref[...], b7_ref, True)
    w8_cp.wait()
    recon = dense(d, w8_vmem[...], b8_ref, False)

    recon_ref[...] = recon.astype(recon_ref.dtype)
    muvar_ref[...] = muvar.astype(muvar_ref.dtype)


# ---------------------------------------------------------------------------
# Wrapper around pallas_call
# ---------------------------------------------------------------------------
_LAYER_ORDER = ("enc1", "enc2", "enc3", "enc4", "dec1", "dec2", "dec3", "dec4")


def fc_forward(packed, x, eps):
    """Returns (recon, mu, logvar), matching FC.forward(x) with external eps."""
    B = x.shape[0]
    x_flat = x.reshape(B, -1)
    input_size = x_flat.shape[1]
    z_size = eps.shape[1]
    Bp = _round_up(B, SUBLANE)

    # Pad batch to the sublane tile and eps to a full 128-lane tile so every
    # load/store is unmasked.  Zero pads keep padded z lanes exactly zero.
    x_pad = jnp.pad(x_flat.astype(jnp.float32), ((0, Bp - B), (0, 0)))
    eps_pad = jnp.pad(eps.astype(jnp.float32), ((0, Bp - B), (0, Z_PAD - z_size)))

    flat_params = []
    for name in _LAYER_ORDER:
        w, b = packed[name]
        flat_params += [w, b]
    inputs = [x_pad, eps_pad] + flat_params

    # Whole-array, unblocked VMEM residency (no grid -> no pipeline, no double
    # buffering) for everything except the two big decoder weights, which stay
    # in HBM and are DMA'd manually inside the kernel to overlap encoder work.
    vmem = pltpu.MemorySpace.VMEM
    in_specs = [pl.BlockSpec(memory_space=vmem) for _ in inputs]
    idx_w_dec2 = 2 + 2 * _LAYER_ORDER.index("dec2")
    idx_w_dec4 = 2 + 2 * _LAYER_ORDER.index("dec4")
    in_specs[idx_w_dec2] = pl.BlockSpec(memory_space=pl.ANY)
    in_specs[idx_w_dec4] = pl.BlockSpec(memory_space=pl.ANY)

    w6_shape = packed["dec2"][0].shape
    w8_shape = packed["dec4"][0].shape

    recon_p, muvar_p = pl.pallas_call(
        _fc_fused_kernel,
        out_shape=(
            jax.ShapeDtypeStruct((Bp, input_size), jnp.float32),
            jax.ShapeDtypeStruct((Bp, 2 * Z_PAD), jnp.float32),
        ),
        in_specs=in_specs,
        out_specs=(
            pl.BlockSpec(memory_space=vmem),
            pl.BlockSpec(memory_space=vmem),
        ),
        scratch_shapes=[
            pltpu.VMEM(w6_shape, jnp.bfloat16),
            pltpu.VMEM(w8_shape, jnp.bfloat16),
            pltpu.SemaphoreType.DMA((2,)),
        ],
        compiler_params=pltpu.CompilerParams(
            vmem_limit_bytes=16 * 1024 * 1024,
        ),
    )(*inputs)

    recon = recon_p[:B]
    mu = muvar_p[:B, :z_size]
    logvar = muvar_p[:B, Z_PAD:Z_PAD + z_size]
    return recon, mu, logvar


# ---------------------------------------------------------------------------
# Parameter init (PyTorch nn.Linear-style uniform bounds), raw f32 layout
# ---------------------------------------------------------------------------
def _init_linear(key, din, dout):
    kw, kb = jax.random.split(key)
    bound = 1.0 / (din ** 0.5)
    w = jax.random.uniform(kw, (din, dout), jnp.float32, minval=-bound, maxval=bound)
    b = jax.random.uniform(kb, (1, dout), jnp.float32, minval=-bound, maxval=bound)
    return w, b


def init_fc_params(key, input_size, z_size):
    ks = jax.random.split(key, 9)
    return {
        "enc1": _init_linear(ks[0], input_size, 256),
        "enc2": _init_linear(ks[1], 256, 512),
        "enc3": _init_linear(ks[2], 512, 784),
        "enc41": _init_linear(ks[3], 784, z_size),
        "enc42": _init_linear(ks[4], 784, z_size),
        "dec1": _init_linear(ks[5], z_size, 784),
        "dec2": _init_linear(ks[6], 784, 512),
        "dec3": _init_linear(ks[7], 512, 256),
        "dec4": _init_linear(ks[8], 256, input_size),
    }


# ---------------------------------------------------------------------------
# One-time layout prep for the kernel:
#   * weights -> bf16 (halves the weight DMA that dominates runtime)
#   * 784-wide dims zero-padded to 896 (7x128) for full lane tiles
#   * enc41|enc42 fused into one (896, 256) weight: mu -> lanes [0,128),
#     logvar -> lanes [128,256)  (lane-aligned halves)
#   * dec1 input padded from z_size to 128 (padded z lanes are exactly 0)
# ---------------------------------------------------------------------------
def pack_fc_params(raw, z_size, w_dtype=jnp.bfloat16):
    assert z_size <= Z_PAD
    D784 = 784

    def pad_to(a, shape):
        return jnp.pad(a, [(0, s - d) for d, s in zip(a.shape, shape)])

    w1, b1 = raw["enc1"]
    w2, b2 = raw["enc2"]
    w3, b3 = raw["enc3"]
    w41, b41 = raw["enc41"]
    w42, b42 = raw["enc42"]
    w5, b5 = raw["dec1"]
    w6, b6 = raw["dec2"]
    w7, b7 = raw["dec3"]
    w8, b8 = raw["dec4"]

    # enc3: pad 784 output cols -> 896 (pad cols: w=0, b=0 -> relu output 0)
    w3p = pad_to(w3, (512, D896))
    b3p = pad_to(b3, (1, D896))

    # fused enc4: (896, 256); mu block at lanes [0, z), logvar at [128, 128+z)
    w4p = jnp.zeros((D896, 2 * Z_PAD), jnp.float32)
    w4p = w4p.at[:D784, :z_size].set(w41)
    w4p = w4p.at[:D784, Z_PAD:Z_PAD + z_size].set(w42)
    b4p = jnp.zeros((1, 2 * Z_PAD), jnp.float32)
    b4p = b4p.at[:, :z_size].set(b41)
    b4p = b4p.at[:, Z_PAD:Z_PAD + z_size].set(b42)

    # dec1: (128, 896); rows [z,128) are zero (they meet the zero pad lanes of z)
    w5p = jnp.zeros((Z_PAD, D896), jnp.float32)
    w5p = w5p.at[:z_size, :D784].set(w5)
    b5p = pad_to(b5, (1, D896))

    # dec2: pad 784 input rows -> 896 (activations on those rows are exactly 0)
    w6p = pad_to(w6, (D896, 512))

    return {
        "enc1": (w1.astype(w_dtype), b1),
        "enc2": (w2.astype(w_dtype), b2),
        "enc3": (w3p.astype(w_dtype), b3p),
        "enc4": (w4p.astype(w_dtype), b4p),
        "dec1": (w5p.astype(w_dtype), b5p),
        "dec2": (w6p.astype(w_dtype), b6),
        "dec3": (w7.astype(w_dtype), b7),
        "dec4": (w8.astype(w_dtype), b8),
    }


# ---------------------------------------------------------------------------
# Pure-JAX reference on the RAW (unpadded) params with matching bf16 matmuls.
# Validates both the fused/padded packing and the in-kernel math.
# ---------------------------------------------------------------------------
def _ref_forward(raw, x, eps):
    B = x.shape[0]
    h = x.reshape(B, -1).astype(jnp.float32)

    def dense(h, wb, relu):
        w, b = wb
        y = jnp.dot(h.astype(jnp.bfloat16), w.astype(jnp.bfloat16),
                    preferred_element_type=jnp.float32) + b
        return jnp.maximum(y, 0.0) if relu else y

    h = dense(h, raw["enc1"], True)
    h = dense(h, raw["enc2"], True)
    h = dense(h, raw["enc3"], True)
    mu = dense(h, raw["enc41"], False)
    logvar = dense(h, raw["enc42"], False)
    z = mu + jnp.exp(0.5 * logvar) * eps
    d = dense(z, raw["dec1"], True)
    d = dense(d, raw["dec2"], True)
    d = dense(d, raw["dec3"], True)
    recon = dense(d, raw["dec4"], False)
    return recon, mu, logvar


# ---------------------------------------------------------------------------
# Main
# ---------------------------------------------------------------------------
if __name__ == "__main__":
    key = jax.random.PRNGKey(0)
    k_params, k_x, k_eps = jax.random.split(key, 3)

    B, C, H, W = 2, 4, 16, 16
    input_size = C * H * W          # 1024
    z_size = 32

    raw_params = init_fc_params(k_params, input_size, z_size)
    packed_params = pack_fc_params(raw_params, z_size)

    x = jax.random.normal(k_x, (B, C, H, W), dtype=jnp.float32)
    eps = jax.random.normal(k_eps, (B, z_size), dtype=jnp.float32)

    recon, mu, logvar = jax.jit(fc_forward)(packed_params, x, eps)
    jax.block_until_ready((recon, mu, logvar))

    assert recon.shape == (B, input_size)
    assert mu.shape == (B, z_size)
    assert logvar.shape == (B, z_size)

    # sanity check against a pure-JAX reference using the raw (unpadded) weights
    r_ref, m_ref, lv_ref = jax.jit(_ref_forward)(raw_params, x, eps)
    assert jnp.allclose(mu, m_ref, rtol=2e-2, atol=2e-2)
    assert jnp.allclose(logvar, lv_ref, rtol=2e-2, atol=2e-2)
    assert jnp.allclose(recon, r_ref, rtol=2e-2, atol=2e-2)

    print("KERNEL_OK")
</pallas_src>

<mosaic_0001>
module attributes {stable_mosaic.version = 11 : i64} {
  func.func @_fc_fused_kernel(%arg0: memref<8x1024xf32, #tpu.memory_space<vmem>>, %arg1: memref<8x128xf32, #tpu.memory_space<vmem>>, %arg2: memref<1024x256xbf16, #tpu.memory_space<vmem>>, %arg3: memref<1x256xf32, #tpu.memory_space<vmem>>, %arg4: memref<256x512xbf16, #tpu.memory_space<vmem>>, %arg5: memref<1x512xf32, #tpu.memory_space<vmem>>, %arg6: memref<512x896xbf16, #tpu.memory_space<vmem>>, %arg7: memref<1x896xf32, #tpu.memory_space<vmem>>, %arg8: memref<896x256xbf16, #tpu.memory_space<vmem>>, %arg9: memref<1x256xf32, #tpu.memory_space<vmem>>, %arg10: memref<128x896xbf16, #tpu.memory_space<vmem>>, %arg11: memref<1x896xf32, #tpu.memory_space<vmem>>, %arg12: memref<896x512xbf16, #tpu.memory_space<any>>, %arg13: memref<1x512xf32, #tpu.memory_space<vmem>>, %arg14: memref<512x256xbf16, #tpu.memory_space<vmem>>, %arg15: memref<1x256xf32, #tpu.memory_space<vmem>>, %arg16: memref<256x1024xbf16, #tpu.memory_space<any>>, %arg17: memref<1x1024xf32, #tpu.memory_space<vmem>>, %arg18: memref<8x1024xf32, #tpu.memory_space<vmem>>, %arg19: memref<8x256xf32, #tpu.memory_space<vmem>>, %arg20: memref<896x512xbf16, #tpu.memory_space<vmem>>, %arg21: memref<256x1024xbf16, #tpu.memory_space<vmem>>, %arg22: memref<2x!tpu.dma_semaphore, #tpu.memory_space<semaphore_mem>>) attributes {dimension_semantics = [], scalar_prefetch = 0 : i64, scratch_operands = 3 : i64, tpu.core_type = #tpu.core_type<tc>} {
    %c0_i32 = arith.constant 0 : i32
    %0 = tpu.memref_slice %arg22[%c0_i32] : memref<2x!tpu.dma_semaphore, #tpu.memory_space<semaphore_mem>> -> memref<1x!tpu.dma_semaphore, #tpu.memory_space<semaphore_mem>>
    %1 = tpu.memref_squeeze %0 : memref<1x!tpu.dma_semaphore, #tpu.memory_space<semaphore_mem>> -> memref<!tpu.dma_semaphore, #tpu.memory_space<semaphore_mem>>
    tpu.enqueue_dma source(%arg12 : memref<896x512xbf16, #tpu.memory_space<any>>) target(%arg20 : memref<896x512xbf16, #tpu.memory_space<vmem>>) target_semaphore(%1 : memref<!tpu.dma_semaphore, #tpu.memory_space<semaphore_mem>>)
    %c1_i32 = arith.constant 1 : i32
    %2 = tpu.memref_slice %arg22[%c1_i32] : memref<2x!tpu.dma_semaphore, #tpu.memory_space<semaphore_mem>> -> memref<1x!tpu.dma_semaphore, #tpu.memory_space<semaphore_mem>>
    %3 = tpu.memref_squeeze %2 : memref<1x!tpu.dma_semaphore, #tpu.memory_space<semaphore_mem>> -> memref<!tpu.dma_semaphore, #tpu.memory_space<semaphore_mem>>
    tpu.enqueue_dma source(%arg16 : memref<256x1024xbf16, #tpu.memory_space<any>>) target(%arg21 : memref<256x1024xbf16, #tpu.memory_space<vmem>>) target_semaphore(%3 : memref<!tpu.dma_semaphore, #tpu.memory_space<semaphore_mem>>)
    %c0 = arith.constant 0 : index
    %c0_0 = arith.constant 0 : index
    %4 = vector.load %arg0[%c0, %c0_0] : memref<8x1024xf32, #tpu.memory_space<vmem>>, vector<8x1024xf32>
    %c0_1 = arith.constant 0 : index
    %c0_2 = arith.constant 0 : index
    %5 = vector.load %arg2[%c0_1, %c0_2] : memref<1024x256xbf16, #tpu.memory_space<vmem>>, vector<1024x256xbf16>
    %6 = arith.truncf %4 : vector<8x1024xf32> to vector<8x1024xbf16>
    %cst = arith.constant dense<0.000000e+00> : vector<8x256xf32>
    %7 = tpu.matmul %6, %5, %cst {dimension_numbers = #tpu.dot_dimension_numbers<[1], [0], [0], [1], [0, 0, 1, 1], [], []>} : vector<8x1024xbf16>, vector<1024x256xbf16>, vector<8x256xf32> -> vector<8x256xf32>
    %c0_3 = arith.constant 0 : index
    %c0_4 = arith.constant 0 : index
    %8 = vector.load %arg3[%c0_3, %c0_4] : memref<1x256xf32, #tpu.memory_space<vmem>>, vector<1x256xf32>
    %9 = vector.broadcast %8 : vector<1x256xf32> to vector<8x256xf32>
    %10 = arith.addf %7, %9 : vector<8x256xf32>
    %cst_5 = arith.constant 0.000000e+00 : f32
    %11 = vector.broadcast %cst_5 : f32 to vector<8x256xf32>
    %12 = arith.maximumf %10, %11 : vector<8x256xf32>
    %c0_6 = arith.constant 0 : index
    %c0_7 = arith.constant 0 : index
    %13 = vector.load %arg4[%c0_6, %c0_7] : memref<256x512xbf16, #tpu.memory_space<vmem>>, vector<256x512xbf16>
    %14 = arith.truncf %12 : vector<8x256xf32> to vector<8x256xbf16>
    %cst_8 = arith.constant dense<0.000000e+00> : vector<8x512xf32>
    %15 = tpu.matmul %14, %13, %cst_8 {dimension_numbers = #tpu.dot_dimension_numbers<[1], [0], [0], [1], [0, 0, 1, 1], [], []>} : vector<8x256xbf16>, vector<256x512xbf16>, vector<8x512xf32> -> vector<8x512xf32>
    %c0_9 = arith.constant 0 : index
    %c0_10 = arith.constant 0 : index
    %16 = vector.load %arg5[%c0_9, %c0_10] : memref<1x512xf32, #tpu.memory_space<vmem>>, vector<1x512xf32>
    %17 = vector.broadcast %16 : vector<1x512xf32> to vector<8x512xf32>
    %18 = arith.addf %15, %17 : vector<8x512xf32>
    %cst_11 = arith.constant 0.000000e+00 : f32
    %19 = vector.broadcast %cst_11 : f32 to vector<8x512xf32>
    %20 = arith.maximumf %18, %19 : vector<8x512xf32>
    %c0_12 = arith.constant 0 : index
    %c0_13 = arith.constant 0 : index
    %21 = vector.load %arg6[%c0_12, %c0_13] : memref<512x896xbf16, #tpu.memory_space<vmem>>, vector<512x896xbf16>
    %22 = arith.truncf %20 : vector<8x512xf32> to vector<8x512xbf16>
    %cst_14 = arith.constant dense<0.000000e+00> : vector<8x896xf32>
    %23 = tpu.matmul %22, %21, %cst_14 {dimension_numbers = #tpu.dot_dimension_numbers<[1], [0], [0], [1], [0, 0, 1, 1], [], []>} : vector<8x512xbf16>, vector<512x896xbf16>, vector<8x896xf32> -> vector<8x896xf32>
    %c0_15 = arith.constant 0 : index
    %c0_16 = arith.constant 0 : index
    %24 = vector.load %arg7[%c0_15, %c0_16] : memref<1x896xf32, #tpu.memory_space<vmem>>, vector<1x896xf32>
    %25 = vector.broadcast %24 : vector<1x896xf32> to vector<8x896xf32>
    %26 = arith.addf %23, %25 : vector<8x896xf32>
    %cst_17 = arith.constant 0.000000e+00 : f32
    %27 = vector.broadcast %cst_17 : f32 to vector<8x896xf32>
    %28 = arith.maximumf %26, %27 : vector<8x896xf32>
    %c0_18 = arith.constant 0 : index
    %c0_19 = arith.constant 0 : index
    %29 = vector.load %arg8[%c0_18, %c0_19] : memref<896x256xbf16, #tpu.memory_space<vmem>>, vector<896x256xbf16>
    %30 = arith.truncf %28 : vector<8x896xf32> to vector<8x896xbf16>
    %cst_20 = arith.constant dense<0.000000e+00> : vector<8x256xf32>
    %31 = tpu.matmul %30, %29, %cst_20 {dimension_numbers = #tpu.dot_dimension_numbers<[1], [0], [0], [1], [0, 0, 1, 1], [], []>} : vector<8x896xbf16>, vector<896x256xbf16>, vector<8x256xf32> -> vector<8x256xf32>
    %c0_21 = arith.constant 0 : index
    %c0_22 = arith.constant 0 : index
    %32 = vector.load %arg9[%c0_21, %c0_22] : memref<1x256xf32, #tpu.memory_space<vmem>>, vector<1x256xf32>
    %33 = vector.broadcast %32 : vector<1x256xf32> to vector<8x256xf32>
    %34 = arith.addf %31, %33 : vector<8x256xf32>
    %35 = vector.extract_strided_slice %34 {offsets = [0, 0], sizes = [8, 128], strides = [1, 1]} : vector<8x256xf32> to vector<8x128xf32>
    %36 = vector.extract_strided_slice %34 {offsets = [0, 128], sizes = [8, 128], strides = [1, 1]} : vector<8x256xf32> to vector<8x128xf32>
    %cst_23 = arith.constant 5.000000e-01 : f32
    %37 = vector.broadcast %cst_23 : f32 to vector<8x128xf32>
    %38 = arith.mulf %37, %36 : vector<8x128xf32>
    %39 = math.exp %38 : vector<8x128xf32>
    %c0_24 = arith.constant 0 : index
    %c0_25 = arith.constant 0 : index
    %40 = vector.load %arg1[%c0_24, %c0_25] : memref<8x128xf32, #tpu.memory_space<vmem>>, vector<8x128xf32>
    %41 = arith.mulf %39, %40 : vector<8x128xf32>
    %42 = arith.addf %35, %41 : vector<8x128xf32>
    %c0_26 = arith.constant 0 : index
    %c0_27 = arith.constant 0 : index
    %43 = vector.load %arg10[%c0_26, %c0_27] : memref<128x896xbf16, #tpu.memory_space<vmem>>, vector<128x896xbf16>
    %44 = arith.truncf %42 : vector<8x128xf32> to vector<8x128xbf16>
    %cst_28 = arith.constant dense<0.000000e+00> : vector<8x896xf32>
    %45 = tpu.matmul %44, %43, %cst_28 {dimension_numbers = #tpu.dot_dimension_numbers<[1], [0], [0], [1], [0, 0, 1, 1], [], []>} : vector<8x128xbf16>, vector<128x896xbf16>, vector<8x896xf32> -> vector<8x896xf32>
    %c0_29 = arith.constant 0 : index
    %c0_30 = arith.constant 0 : index
    %46 = vector.load %arg11[%c0_29, %c0_30] : memref<1x896xf32, #tpu.memory_space<vmem>>, vector<1x896xf32>
    %47 = vector.broadcast %46 : vector<1x896xf32> to vector<8x896xf32>
    %48 = arith.addf %45, %47 : vector<8x896xf32>
    %cst_31 = arith.constant 0.000000e+00 : f32
    %49 = vector.broadcast %cst_31 : f32 to vector<8x896xf32>
    %50 = arith.maximumf %48, %49 : vector<8x896xf32>
    %c0_i32_32 = arith.constant 0 : i32
    %51 = tpu.memref_slice %arg22[%c0_i32_32] : memref<2x!tpu.dma_semaphore, #tpu.memory_space<semaphore_mem>> -> memref<1x!tpu.dma_semaphore, #tpu.memory_space<semaphore_mem>>
    %52 = tpu.memref_squeeze %51 : memref<1x!tpu.dma_semaphore, #tpu.memory_space<semaphore_mem>> -> memref<!tpu.dma_semaphore, #tpu.memory_space<semaphore_mem>>
    tpu.wait_dma2 semaphore(%52 : memref<!tpu.dma_semaphore, #tpu.memory_space<semaphore_mem>>) src(%arg12 : memref<896x512xbf16, #tpu.memory_space<any>>) dst(%arg20 : memref<896x512xbf16, #tpu.memory_space<vmem>>)
    %c0_33 = arith.constant 0 : index
    %c0_34 = arith.constant 0 : index
    %53 = vector.load %arg20[%c0_33, %c0_34] : memref<896x512xbf16, #tpu.memory_space<vmem>>, vector<896x512xbf16>
    %54 = arith.truncf %50 : vector<8x896xf32> to vector<8x896xbf16>
    %cst_35 = arith.constant dense<0.000000e+00> : vector<8x512xf32>
    %55 = tpu.matmul %54, %53, %cst_35 {dimension_numbers = #tpu.dot_dimension_numbers<[1], [0], [0], [1], [0, 0, 1, 1], [], []>} : vector<8x896xbf16>, vector<896x512xbf16>, vector<8x512xf32> -> vector<8x512xf32>
    %c0_36 = arith.constant 0 : index
    %c0_37 = arith.constant 0 : index
    %56 = vector.load %arg13[%c0_36, %c0_37] : memref<1x512xf32, #tpu.memory_space<vmem>>, vector<1x512xf32>
    %57 = vector.broadcast %56 : vector<1x512xf32> to vector<8x512xf32>
    %58 = arith.addf %55, %57 : vector<8x512xf32>
    %cst_38 = arith.constant 0.000000e+00 : f32
    %59 = vector.broadcast %cst_38 : f32 to vector<8x512xf32>
    %60 = arith.maximumf %58, %59 : vector<8x512xf32>
    %c0_39 = arith.constant 0 : index
    %c0_40 = arith.constant 0 : index
    %61 = vector.load %arg14[%c0_39, %c0_40] : memref<512x256xbf16, #tpu.memory_space<vmem>>, vector<512x256xbf16>
    %62 = arith.truncf %60 : vector<8x512xf32> to vector<8x512xbf16>
    %cst_41 = arith.constant dense<0.000000e+00> : vector<8x256xf32>
    %63 = tpu.matmul %62, %61, %cst_41 {dimension_numbers = #tpu.dot_dimension_numbers<[1], [0], [0], [1], [0, 0, 1, 1], [], []>} : vector<8x512xbf16>, vector<512x256xbf16>, vector<8x256xf32> -> vector<8x256xf32>
    %c0_42 = arith.constant 0 : index
    %c0_43 = arith.constant 0 : index
    %64 = vector.load %arg15[%c0_42, %c0_43] : memref<1x256xf32, #tpu.memory_space<vmem>>, vector<1x256xf32>
    %65 = vector.broadcast %64 : vector<1x256xf32> to vector<8x256xf32>
    %66 = arith.addf %63, %65 : vector<8x256xf32>
    %cst_44 = arith.constant 0.000000e+00 : f32
    %67 = vector.broadcast %cst_44 : f32 to vector<8x256xf32>
    %68 = arith.maximumf %66, %67 : vector<8x256xf32>
    %c1_i32_45 = arith.constant 1 : i32
    %69 = tpu.memref_slice %arg22[%c1_i32_45] : memref<2x!tpu.dma_semaphore, #tpu.memory_space<semaphore_mem>> -> memref<1x!tpu.dma_semaphore, #tpu.memory_space<semaphore_mem>>
    %70 = tpu.memref_squeeze %69 : memref<1x!tpu.dma_semaphore, #tpu.memory_space<semaphore_mem>> -> memref<!tpu.dma_semaphore, #tpu.memory_space<semaphore_mem>>
    tpu.wait_dma2 semaphore(%70 : memref<!tpu.dma_semaphore, #tpu.memory_space<semaphore_mem>>) src(%arg16 : memref<256x1024xbf16, #tpu.memory_space<any>>) dst(%arg21 : memref<256x1024xbf16, #tpu.memory_space<vmem>>)
    %c0_46 = arith.constant 0 : index
    %c0_47 = arith.constant 0 : index
    %71 = vector.load %arg21[%c0_46, %c0_47] : memref<256x1024xbf16, #tpu.memory_space<vmem>>, vector<256x1024xbf16>
    %72 = arith.truncf %68 : vector<8x256xf32> to vector<8x256xbf16>
    %cst_48 = arith.constant dense<0.000000e+00> : vector<8x1024xf32>
    %73 = tpu.matmul %72, %71, %cst_48 {dimension_numbers = #tpu.dot_dimension_numbers<[1], [0], [0], [1], [0, 0, 1, 1], [], []>} : vector<8x256xbf16>, vector<256x1024xbf16>, vector<8x1024xf32> -> vector<8x1024xf32>
    %c0_49 = arith.constant 0 : index
    %c0_50 = arith.constant 0 : index
    %74 = vector.load %arg17[%c0_49, %c0_50] : memref<1x1024xf32, #tpu.memory_space<vmem>>, vector<1x1024xf32>
    %75 = vector.broadcast %74 : vector<1x1024xf32> to vector<8x1024xf32>
    %76 = arith.addf %73, %75 : vector<8x1024xf32>
    %c0_51 = arith.constant 0 : index
    %c0_52 = arith.constant 0 : index
    %77 = vector.load %arg18[%c0_51, %c0_52] : memref<8x1024xf32, #tpu.memory_space<vmem>>, vector<8x1024xf32>
    tpu.vector_store %arg18[%c0_51, %c0_52], %76 {strides = array<i32>} : memref<8x1024xf32, #tpu.memory_space<vmem>>, vector<8x1024xf32>,
    %c0_53 = arith.constant 0 : index
    %c0_54 = arith.constant 0 : index
    %78 = vector.load %arg19[%c0_53, %c0_54] : memref<8x256xf32, #tpu.memory_space<vmem>>, vector<8x256xf32>
    tpu.vector_store %arg19[%c0_53, %c0_54], %34 {strides = array<i32>} : memref<8x256xf32, #tpu.memory_space<vmem>>, vector<8x256xf32>,
    return
  }
}

</mosaic_0001>

<bundles_post_ra>
// kernel: fc_forward.1
= control target key start
LH: loop header
LB: loop body
LE: loop exit
PB: predicated region body
PF: predicated region fallthrough
CT: control target
= control target key end

     0   :  { %s8746_s0 = inlined_call_operand.vmem [shape: f32[8,1024], index: 0, kind: input, shape index: {}]   ;;  %s8747_s1 = inlined_call_operand.vmem [shape: f32[8,128], index: 1, kind: input, shape index: {}]   ;;  %s8748_s2 = inlined_call_operand.hbm [shape: bf16[1024,256], index: 2, kind: input, shape index: {}]   ;;  %s8749_s3 = inlined_call_operand.vmem [shape: f32[1,256], index: 3, kind: input, shape index: {}]   ;;  %s8750_s4 = inlined_call_operand.hbm [shape: bf16[256,512], index: 4, kind: input, shape index: {}]   ;;  %s8751_s5 = inlined_call_operand.vmem [shape: f32[1,512], index: 5, kind: input, shape index: {}]   ;;  %s8752_s6 = inlined_call_operand.hbm [shape: bf16[512,896], index: 6, kind: input, shape index: {}]   ;;  %s8753_s7 = inlined_call_operand.vmem [shape: f32[1,896], index: 7, kind: input, shape index: {}]   ;;  %s8754_s8 = inlined_call_operand.hbm [shape: bf16[896,256], index: 8, kind: input, shape index: {}]   ;;  %s8755_s9 = inlined_call_operand.vmem [shape: f32[1,256], index: 9, kind: input, shape index: {}]   ;;  %s8756_s10 = inlined_call_operand.hbm [shape: bf16[128,896], index: 10, kind: input, shape index: {}]   ;;  %s8757_s11 = inlined_call_operand.vmem [shape: f32[1,896], index: 11, kind: input, shape index: {}]   ;;  %s8758_s12 = inlined_call_operand.hbm [shape: bf16[896,512], index: 12, kind: input, shape index: {}]   ;;  %s8759_s13 = inlined_call_operand.vmem [shape: f32[1,512], index: 13, kind: input, shape index: {}]   ;;  %s8760_s14 = inlined_call_operand.hbm [shape: bf16[512,256], index: 14, kind: input, shape index: {}]   ;;  %s8761_s15 = inlined_call_operand.vmem [shape: f32[1,256], index: 15, kind: input, shape index: {}]   ;;  %s8762_s16 = inlined_call_operand.hbm [shape: bf16[256,1024], index: 16, kind: input, shape index: {}]   ;;  %s8763_s17 = inlined_call_operand.vmem [shape: f32[1,1024], index: 17, kind: input, shape index: {}]   ;;  %s8764_s18 = inlined_call_operand.vmem [shape: f32[8,1024], index: 18, kind: output, shape index: {0}]   ;;  %s8765_s19 = inlined_call_operand.vmem [shape: f32[8,256], index: 19, kind: output, shape index: {1}]  }
   0x1   :  { %8770 = sst [smem:[#allocation25_spill]] %s8746_s0 }
   0x2   :  { %8771 = sst [smem:[#allocation26_spill]] %s8747_s1 }
   0x3   :  { %8772 = sst [smem:[#allocation27_spill]] %s8748_s2 }
   0x4   :  { %8773 = sst [smem:[#allocation28_spill]] %s8749_s3 }
   0x5   :  { %8774 = sst [smem:[#allocation29_spill]] %s8764_s18 }
   0x6   :  { %25 = vsyncpa [#allocation6], 0 }
   0x7   :  { %26 = vsyncpa [#allocation8], 0 }
   0x8   :  { %27 = vsyncpa [#allocation11], 0 }
   0x9   :  { %28 = vsyncpa [#allocation14], 0  ;;  %s8248_s0 = smov [#allocation7]   ;;  %s8104_s1 = scalar_lea.hbm %s8750_s4, 8192 }
   0xa   :  { %s52_s30 = sshll.u32 %s8248_s0, 4  ;;  %p8105_p0 = scmp.ne.s32.totalorder %s8750_s4, %s8104_s1  ;;  %s53_s30 = int_to_ptr.vmem [resolvable:$true] %s52_s30 }
   0xb   :  { %p8108_p1 = scmp.lt.u32.totalorder %s8104_s1, %s8750_s4 }
   0xd   :  { %p8110_p2 = pnand %p8108_p1, %p8105_p0 }
   0xf   :  { %8113 = shalt.err (!%p8110_p2)
}
  0x10   :  { %s8114_s25 = scalar_lea.vmem %s53_s30, 8192  ;;  %p8119_p4 = scmp.lt.s32.totalorder %s53_s30, %s53_s30 }
  0x11   :  { %p8115_p3 = scmp.ne.s32.totalorder %s53_s30, %s8114_s25  ;;  %p8120_p5 = scmp.lt.s32.totalorder %s8114_s25, %s8114_s25 }
  0x13   :  { %p8121_p6 = por %p8120_p5, %p8119_p4 }
  0x15   :  { %p8122_p7 = pnand %p8121_p6, %p8115_p3 }
  0x17   :  { %8125 = shalt.err (!%p8122_p7)
}
  0x18   :  { %s8769_s3 = smov 256   ;;  %s8250_s26 = smov 16  }
  0x19   :  { %58 = dma.hbm_to_vmem [thread:$0]  %s8750_s4, 8192, %s53_s30, [#allocation8], %s8769_s3, %s8769_s3, %s8250_s26  }
  0x1a   :  { %s8251_s29 = smov [#allocation10]   ;;  %s8252_s20 = smov [#allocation5]  }
  0x1b   :  { %s80_s0 = sshll.u32 %s8251_s29, 4  ;;  %s38_s21 = sshll.u32 %s8252_s20, 4  ;;  %s81_s0 = int_to_ptr.vmem [resolvable:$true] %s80_s0  ;;  %s39_s21 = int_to_ptr.vmem [resolvable:$true] %s38_s21 }
  0x1c   :  { %s8126_s2 = scalar_lea.hbm %s8754_s8, 14336 }
  0x1d   :  { %p8127_p8 = scmp.ne.s32.totalorder %s8754_s8, %s8126_s2  ;;  %p8130_p9 = scmp.lt.u32.totalorder %s8126_s2, %s8754_s8 }
  0x1f   :  { %p8132_p10 = pnand %p8130_p9, %p8127_p8 }
  0x21   :  { %8135 = shalt.err (!%p8132_p10)
}
  0x22   :  { %s8136_s4 = scalar_lea.vmem %s81_s0, 14336  ;;  %p8141_p12 = scmp.lt.s32.totalorder %s81_s0, %s81_s0 }
  0x23   :  { %p8137_p11 = scmp.ne.s32.totalorder %s81_s0, %s8136_s4  ;;  %p8142_p13 = scmp.lt.s32.totalorder %s8136_s4, %s8136_s4 }
  0x25   :  { %p8143_p0 = por %p8142_p13, %p8141_p12 }
  0x27   :  { %p8144_p1 = pnand %p8143_p0, %p8137_p11 }
  0x29   :  { %8147 = shalt.err (!%p8144_p1)
}
  0x2a   :  { %s8253_s30 = smov 128   ;;  %s8254_s26 = smov 8  }
  0x2b   :  { %86 = dma.hbm_to_vmem [thread:$0]  %s8754_s8, 14336, %s81_s0, [#allocation11], %s8253_s30, %s8253_s30, %s8254_s26  }
  0x2c   :  { %s8775_s20 = sld [smem:[#allocation27_spill]] }
  0x32   :  { %s8148_s1 = scalar_lea.hbm %s8775_s20, 16384 }
  0x33   :  { %p8149_p2 = scmp.ne.s32.totalorder %s8775_s20, %s8148_s1  ;;  %p8152_p3 = scmp.lt.u32.totalorder %s8148_s1, %s8775_s20 }
  0x35   :  { %p8154_p4 = pnand %p8152_p3, %p8149_p2 }
  0x37   :  { %8157 = shalt.err (!%p8154_p4)
}
  0x38   :  { %s8158_s25 = scalar_lea.vmem %s39_s21, 16384  ;;  %p8163_p6 = scmp.lt.s32.totalorder %s39_s21, %s39_s21 }
  0x39   :  { %p8159_p5 = scmp.ne.s32.totalorder %s39_s21, %s8158_s25  ;;  %p8164_p7 = scmp.lt.s32.totalorder %s8158_s25, %s8158_s25 }
  0x3b   :  { %p8165_p8 = por %p8164_p7, %p8163_p6 }
  0x3d   :  { %p8166_p9 = pnand %p8165_p8, %p8159_p5 }
  0x3f   :  { %8169 = shalt.err (!%p8166_p9)
}
  0x40   :  { %44 = dma.hbm_to_vmem [thread:$0]  %s8775_s20, 16384, %s39_s21, [#allocation6], %s8253_s30, %s8253_s30, %s8254_s26  }
  0x41   :  { %s8255_s4 = smov [#allocation9]   ;;  %s8170_s29 = scalar_lea.hbm %s8752_s6, 28672 }
  0x42   :  { %s66_s27 = sshll.u32 %s8255_s4, 4  ;;  %p8171_p10 = scmp.ne.s32.totalorder %s8752_s6, %s8170_s29  ;;  %s67_s27 = int_to_ptr.vmem [resolvable:$true] %s66_s27 }
  0x43   :  { %p8174_p11 = scmp.lt.u32.totalorder %s8170_s29, %s8752_s6 }
  0x45   :  { %p8176_p12 = pnand %p8174_p11, %p8171_p10 }
  0x47   :  { %8179 = shalt.err (!%p8176_p12)
}
  0x48   :  { %s8180_s24 = scalar_lea.vmem %s67_s27, 28672  ;;  %p8185_p0 = scmp.lt.s32.totalorder %s67_s27, %s67_s27 }
  0x49   :  { %p8181_p13 = scmp.ne.s32.totalorder %s67_s27, %s8180_s24  ;;  %p8186_p1 = scmp.lt.s32.totalorder %s8180_s24, %s8180_s24 }
  0x4b   :  { %p8187_p2 = por %p8186_p1, %p8185_p0 }
  0x4d   :  { %p8188_p3 = pnand %p8187_p2, %p8181_p13 }
  0x4f   :  { %8191 = shalt.err (!%p8188_p3)
}
  0x50   :  { %s8256_s21 = smov 448   ;;  %s8257_s20 = smov 28  }
  0x51   :  { %72 = dma.hbm_to_vmem [thread:$0]  %s8752_s6, 28672, %s67_s27, [#allocation8], %s8256_s21, %s8256_s21, %s8257_s20  }
  0x52   :  { %s8258_s0 = smov [#allocation12]   ;;  %s8259_s28 = smov [#allocation13]  }
  0x53   :  { %s94_s4 = sshll.u32 %s8258_s0, 4  ;;  %s110_s18 = sshll.u32 %s8259_s28, 4  ;;  %s95_s4 = int_to_ptr.vmem [resolvable:$true] %s94_s4  ;;  %s8430_s18 = int_to_ptr.vmem [resolvable:$true] %s110_s18 }
  0x54   :  { %s8192_s22 = scalar_lea.hbm %s8756_s10, 7168 }
  0x55   :  { %p8193_p4 = scmp.ne.s32.totalorder %s8756_s10, %s8192_s22  ;;  %p8196_p5 = scmp.lt.u32.totalorder %s8192_s22, %s8756_s10 }
  0x57   :  { %p8198_p6 = pnand %p8196_p5, %p8193_p4 }
  0x59   :  { %8201 = shalt.err (!%p8198_p6)
}
  0x5a   :  { %s8202_s6 = scalar_lea.vmem %s95_s4, 7168  ;;  %p8207_p8 = scmp.lt.s32.totalorder %s95_s4, %s95_s4 }
  0x5b   :  { %p8203_p7 = scmp.ne.s32.totalorder %s95_s4, %s8202_s6  ;;  %p8208_p9 = scmp.lt.s32.totalorder %s8202_s6, %s8202_s6 }
  0x5d   :  { %p8209_p10 = por %p8208_p9, %p8207_p8 }
  0x5f   :  { %p8210_p11 = pnand %p8209_p10, %p8203_p7 }
  0x61   :  { %8213 = shalt.err (!%p8210_p11)
}
  0x62   :  { %100 = dma.hbm_to_vmem [thread:$0]  %s8756_s10, 7168, %s95_s4, [#allocation11], %s8256_s21, %s8256_s21, %s8257_s20  }
  0x63   :  { %s8214_s28 = scalar_lea.hbm %s8760_s14, 8192 }
  0x64   :  { %p8215_p12 = scmp.ne.s32.totalorder %s8760_s14, %s8214_s28  ;;  %p8218_p13 = scmp.lt.u32.totalorder %s8214_s28, %s8760_s14 }
  0x66   :  { %p8220_p0 = pnand %p8218_p13, %p8215_p12 }
  0x68   :  { %8223 = shalt.err (!%p8220_p0)
}
  0x69   :  { %s8224_s2 = scalar_lea.vmem %s8430_s18, 8192  ;;  %p8229_p2 = scmp.lt.s32.totalorder %s8430_s18, %s8430_s18 }
  0x6a   :  { %p8225_p1 = scmp.ne.s32.totalorder %s8430_s18, %s8224_s2  ;;  %p8230_p3 = scmp.lt.s32.totalorder %s8224_s2, %s8224_s2 }
  0x6c   :  { %p8231_p4 = por %p8230_p3, %p8229_p2 }
  0x6e   :  { %p8232_p5 = pnand %p8231_p4, %p8225_p1 }
  0x70   :  { %8235 = shalt.err (!%p8232_p5)
}
  0x71   :  { %116 = dma.hbm_to_vmem [thread:$0]  %s8760_s14, 8192, %s8430_s18, [#allocation14], %s8253_s30, %s8253_s30, %s8254_s26  }
  0x72   :  { %8236 = dma.done.wait [#allocation6], 16384  }
  0x73   :  { %8237 = vsyncadd [#allocation6], 4294950912 }
  0x74   :  { %8238 = dma.done.wait [#allocation8], 36864  }
  0x75   :  { %8239 = vsyncadd [#allocation8], 4294930432 }
  0x76   :  { %8240 = dma.done.wait [#allocation11], 21504  }
  0x77   :  { %8241 = vsyncadd [#allocation11], 4294945792 }
  0x78   :  { %8242 = dma.done.wait [#allocation14], 8192  }
  0x79   :  { %8243 = vsyncadd [#allocation14], 4294959104  ;;  %s144_s20 = sld [smem:[#allocation0]]   ;;  %164 = sst [smem:[#allocation16 + $0x4]] %s8253_s30  ;;  %vm8273_vm0 = vmmov 0  }
  0x7a   :  { %s8776_s4 = smov 256   ;;  %s8260_s23 = smov [#allocation2]  }
  0x7b   :  { %168 = sst [smem:[#allocation16 + $0x6]] %s8776_s4  ;;  %s152_s24 = sshll.u32 %s8260_s23, 4  ;;  %s153_s24 = int_to_ptr.vmem [resolvable:$true] %s152_s24 }
  0x7c   :  { %s8261_s6 = smov 512   ;;  %s8262_s14 = smov 4  }
  0x7d   :  { %156 = sst [smem:[#allocation16]] %s8261_s6  ;;  %s8263_s18 = smov 64  }
  0x7e   :  { %158 = sst [smem:[#allocation16 + $0x1]] %s8261_s6  ;;  %s8264_s25 = smov 2  }
  0x7f   :  { %160 = sst [smem:[#allocation16 + $0x2]] %s8262_s14  ;;  %s6317_s27 = sshll.u32 %s144_s20, 26 }
  0x80   :  { %162 = sst [smem:[#allocation16 + $0x3]] %s8263_s18  ;;  %s6318_s8 = sadd.s32 134217728, %s6317_s27 }
  0x81   :  { %166 = sst [smem:[#allocation16 + $0x5]] %s8264_s25  ;;  %s8265_s0 = smov [#allocation4]  }
  0x82   :  { %170 = sst [smem:[#allocation16 + $0x7]] %s8263_s18  ;;  %s8266_s28 = smov [#allocation15]  }
  0x83   :  { %172 = sst [smem:[#allocation16 + $0x8]] %s8262_s14  ;;  %s8267_s1 = smov 1024  }
  0x84   :  { %174 = dma.general %s8758_s12, 28672, %s153_s24, %s8265_s0, %s8266_s28, [#allocation16], %s6318_s8, 0  }
  0x85   :  { %191 = sst [smem:[#allocation18]] %s8267_s1  ;;  %s8268_s22 = smov [#allocation3]  }
  0x86   :  { %193 = sst [smem:[#allocation18 + $0x1]] %s8267_s1  ;;  %s187_s2 = sshll.u32 %s8268_s22, 4  ;;  %s188_s2 = int_to_ptr.vmem [resolvable:$true] %s187_s2 }
  0x87   :  { %195 = sst [smem:[#allocation18 + $0x2]] %s8254_s26  ;;  %s8269_s10 = smov [#allocation4 + $0x1]  }
  0x88   :  { %197 = sst [smem:[#allocation18 + $0x3]] %s8263_s18  ;;  %s8270_s21 = smov [#allocation17]  }
  0x89   :  { %199 = sst [smem:[#allocation18 + $0x4]] %s8253_s30 }
  0x8a   :  { %201 = sst [smem:[#allocation18 + $0x5]] %s8264_s25 }
  0x8b   :  { %203 = sst [smem:[#allocation18 + $0x6]] %s8261_s6 }
  0x8c   :  { %205 = sst [smem:[#allocation18 + $0x7]] %s8263_s18 }
  0x8d   :  { %207 = sst [smem:[#allocation18 + $0x8]] %s8262_s14 }
  0x8e   :  { %209 = dma.general %s8762_s16, 16384, %s188_s2, %s8269_s10, %s8270_s21, [#allocation18], %s6318_s8, 0  }
  0x8f   :  { %v7150_v0 = vld [vmem:[#allocation5 + $0x4] ss:$8 sps:$4 sm:$0xff]   ;;  %v7152_v1 = vld [vmem:[#allocation5] ss:$8 sps:$4 sm:$0xff]   ;;  %v7153_v2 = vld [vmem:[#allocation5 + $0x14] ss:$8 sps:$4 sm:$0xff]  }
  0x90   :  { %1006 = vmatprep.subr.bf16.mxu0 %v7150_v0  ;;  %v7155_v3 = vld [vmem:[#allocation5 + $0x10] ss:$8 sps:$4 sm:$0xff]   ;;  %v7156_v4 = vld [vmem:[#allocation5 + $0x24] ss:$8 sps:$4 sm:$0xff]   ;;  %v7158_v5 = vld [vmem:[#allocation5 + $0x20] ss:$8 sps:$4 sm:$0xff]  }
  0x91   :  { %1007 = vmatpush1.bf16.msra.mxu0 %v7152_v1  ;;  %v7159_v6 = vld [vmem:[#allocation5 + $0x34] ss:$8 sps:$4 sm:$0xff]   ;;  %v7161_v7 = vld [vmem:[#allocation5 + $0x30] ss:$8 sps:$4 sm:$0xff]   ;;  %v7162_v8 = vld [vmem:[#allocation5 + $0x44] ss:$8 sps:$4 sm:$0xff]  }
  0x92   :  { %1008 = vmatprep.subr.bf16.mxu0 %v7153_v2  ;;  %v7164_v9 = vld [vmem:[#allocation5 + $0x40] ss:$8 sps:$4 sm:$0xff]   ;;  %v7165_v10 = vld [vmem:[#allocation5 + $0x54] ss:$8 sps:$4 sm:$0xff]   ;;  %v7167_v11 = vld [vmem:[#allocation5 + $0x50] ss:$8 sps:$4 sm:$0xff]  }
  0x93   :  { %v7168_v12 = vld [vmem:[#allocation5 + $0x64] ss:$8 sps:$4 sm:$0xff]   ;;  %s8777_s30 = sld [smem:[#allocation25_spill]]  ;;  %v7170_v15 = vld [vmem:[#allocation5 + $0x60] ss:$8 sps:$4 sm:$0xff]   ;;  %s8778_s10 = sld [smem:[#allocation28_spill]] }
  0x94   :  { %v7171_v16 = vld [vmem:[#allocation5 + $0x74] ss:$8 sps:$4 sm:$0xff]   ;;  %v7173_v17 = vld [vmem:[#allocation5 + $0x70] ss:$8 sps:$4 sm:$0xff]   ;;  %v7174_v18 = vld [vmem:[#allocation5 + $0x84] ss:$8 sps:$4 sm:$0xff]  }
  0x95   :  { %1009 = vmatpush1.bf16.msra.mxu0 %v7155_v3  ;;  %v7176_v19 = vld [vmem:[#allocation5 + $0x80] ss:$8 sps:$4 sm:$0xff]   ;;  %v7177_v20 = vld [vmem:[#allocation5 + $0x94] ss:$8 sps:$4 sm:$0xff]   ;;  %v7179_v21 = vld [vmem:[#allocation5 + $0x90] ss:$8 sps:$4 sm:$0xff]  }
  0x96   :  { %1010 = vmatprep.subr.bf16.mxu0 %v7156_v4  ;;  %v7180_v22 = vld [vmem:[#allocation5 + $0xa4] ss:$8 sps:$4 sm:$0xff]   ;;  %v7182_v23 = vld [vmem:[#allocation5 + $0xa0] ss:$8 sps:$4 sm:$0xff]   ;;  %v7183_v24 = vld [vmem:[#allocation5 + $0xb4] ss:$8 sps:$4 sm:$0xff]  }
  0x97   :  { %v7185_v25 = vld [vmem:[#allocation5 + $0xb0] ss:$8 sps:$4 sm:$0xff]   ;;  %v7186_v26 = vld [vmem:[#allocation5 + $0xc4] ss:$8 sps:$4 sm:$0xff]   ;;  %v7188_v27 = vld [vmem:[#allocation5 + $0xc0] ss:$8 sps:$4 sm:$0xff]  }
  0x98   :  { %v7189_v28 = vld [vmem:[#allocation5 + $0xd4] ss:$8 sps:$4 sm:$0xff]   ;;  %v7191_v29 = vld [vmem:[#allocation5 + $0xd0] ss:$8 sps:$4 sm:$0xff]   ;;  %v7192_v30 = vld [vmem:[#allocation5 + $0xe4] ss:$8 sps:$4 sm:$0xff]  }
  0x99   :  { %1011 = vmatpush1.bf16.msra.mxu0 %v7158_v5  ;;  %v211_v13 = vld [vmem:[%s8777_s30 + $0x8] sm:$0xff]  ;;  %v7195_v32 = vld [vmem:[#allocation5 + $0xf4] ss:$8 sps:$4 sm:$0xff]   ;;  %v7197_v33 = vld [vmem:[#allocation5 + $0xf0] ss:$8 sps:$4 sm:$0xff]   ;;  %s8779_s26 = sld [smem:[#allocation26_spill]] }
  0x9a   :  { %1012 = vmatprep.subr.bf16.mxu0 %v7159_v6  ;;  %v347_v14 = vpack.c.bf16 %v211_v13, %v211_v13  ;;  %v7194_v31 = vld [vmem:[#allocation5 + $0xe0] ss:$8 sps:$4 sm:$0xff]   ;;  %v7200_v34 = vld [vmem:[#allocation5 + $0x104] ss:$8 sps:$4 sm:$0xff]   ;;  %v213_v36 = vld [vmem:[%s8777_s30 + $0x18] sm:$0xff] }
  0x9b   :  { %v210_v35 = vld [vmem:[%s8777_s30] sm:$0xff]  ;;  %v349_v39 = vpack.c.bf16 %v213_v36, %v213_v36  ;;  %v7203_v40 = vld [vmem:[#allocation5 + $0x114] ss:$8 sps:$4 sm:$0xff]   ;;  %v7201_v41 = vld [vmem:[#allocation5 + $0x110] ss:$8 sps:$4 sm:$0xff]  }
  0x9c   :  { %1038 = vmatprep.mubr.bf16.mxu0 %v347_v14  ;;  %v346_v37 = vpack.c.bf16 %v210_v35, %v210_v35  ;;  %v7198_v38 = vld [vmem:[#allocation5 + $0x100] ss:$8 sps:$4 sm:$0xff]   ;;  %v7206_v42 = vld [vmem:[#allocation5 + $0x124] ss:$8 sps:$4 sm:$0xff]   ;;  %v7209_v44 = vld [vmem:[#allocation5 + $0x134] ss:$8 sps:$4 sm:$0xff]  }
  0x9d   :  { %1013 = vmatpush1.bf16.msra.mxu0 %v7161_v7  ;;  %v7204_v43 = vld [vmem:[#allocation5 + $0x120] ss:$8 sps:$4 sm:$0xff]   ;;  %v7207_v45 = vld [vmem:[#allocation5 + $0x130] ss:$8 sps:$4 sm:$0xff]   ;;  %v7212_v46 = vld [vmem:[#allocation5 + $0x144] ss:$8 sps:$4 sm:$0xff]  }
  0x9e   :  { %1014 = vmatprep.subr.bf16.mxu0 %v7162_v8  ;;  %v7210_v47 = vld [vmem:[#allocation5 + $0x140] ss:$8 sps:$4 sm:$0xff]   ;;  %v7215_v48 = vld [vmem:[#allocation5 + $0x154] ss:$8 sps:$4 sm:$0xff]   ;;  %v7213_v49 = vld [vmem:[#allocation5 + $0x150] ss:$8 sps:$4 sm:$0xff]  }
  0x9f   :  { %v7218_v50 = vld [vmem:[#allocation5 + $0x164] ss:$8 sps:$4 sm:$0xff]   ;;  %v7216_v51 = vld [vmem:[#allocation5 + $0x160] ss:$8 sps:$4 sm:$0xff]   ;;  %v7221_v52 = vld [vmem:[#allocation5 + $0x174] ss:$8 sps:$4 sm:$0xff]  }
  0xa0   :  { %v7219_v53 = vld [vmem:[#allocation5 + $0x170] ss:$8 sps:$4 sm:$0xff]   ;;  %v7224_v54 = vld [vmem:[#allocation5 + $0x184] ss:$8 sps:$4 sm:$0xff]   ;;  %v7222_v55 = vld [vmem:[#allocation5 + $0x180] ss:$8 sps:$4 sm:$0xff]  }
  0xa1   :  { %1015 = vmatpush1.bf16.msra.mxu0 %v7164_v9  ;;  %v7227_v56 = vld [vmem:[#allocation5 + $0x194] ss:$8 sps:$4 sm:$0xff]   ;;  %v7225_v57 = vld [vmem:[#allocation5 + $0x190] ss:$8 sps:$4 sm:$0xff]   ;;  %v7230_v58 = vld [vmem:[#allocation5 + $0x1a4] ss:$8 sps:$4 sm:$0xff]  }
  0xa2   :  { %1016 = vmatprep.subr.bf16.mxu0 %v7165_v10  ;;  %v7228_v59 = vld [vmem:[#allocation5 + $0x1a0] ss:$8 sps:$4 sm:$0xff]   ;;  %v7233_v60 = vld [vmem:[#allocation5 + $0x1b4] ss:$8 sps:$4 sm:$0xff]   ;;  %v7231_v61 = vld [vmem:[#allocation5 + $0x1b0] ss:$8 sps:$4 sm:$0xff]  }
  0xa3   :  { %v7236_v62 = vld [vmem:[#allocation5 + $0x1c4] ss:$8 sps:$4 sm:$0xff]   ;;  %v7234_v63 = vld [vmem:[#allocation5 + $0x1c0] ss:$8 sps:$4 sm:$0xff]   ;;  %v7239_v0 = vld [vmem:[#allocation5 + $0x1d4] ss:$8 sps:$4 sm:$0xff]  }
  0xa4   :  { %v7237_v1 = vld [vmem:[#allocation5 + $0x1d0] ss:$8 sps:$4 sm:$0xff]   ;;  %v7242_v2 = vld [vmem:[#allocation5 + $0x1e4] ss:$8 sps:$4 sm:$0xff]   ;;  %v7240_v3 = vld [vmem:[#allocation5 + $0x1e0] ss:$8 sps:$4 sm:$0xff]  }
  0xa5   :  { %1017 = vmatpush1.bf16.msra.mxu0 %v7167_v11  ;;  %v7245_v4 = vld [vmem:[#allocation5 + $0x1f4] ss:$8 sps:$4 sm:$0xff]   ;;  %v7243_v5 = vld [vmem:[#allocation5 + $0x1f0] ss:$8 sps:$4 sm:$0xff]   ;;  %v7248_v6 = vld [vmem:[#allocation5 + $0x204] ss:$8 sps:$4 sm:$0xff]  }
  0xa6   :  { %1018 = vmatprep.subr.bf16.mxu0 %v7168_v12  ;;  %v212_v7 = vld [vmem:[%s8777_s30 + $0x10] sm:$0xff]  ;;  %v215_v8 = vld [vmem:[%s8777_s30 + $0x28] sm:$0xff] }
  0xa7   :  { %v7246_v9 = vld [vmem:[#allocation5 + $0x200] ss:$8 sps:$4 sm:$0xff]   ;;  %v348_v10 = vpack.c.bf16 %v212_v7, %v212_v7  ;;  %v7251_v11 = vld [vmem:[#allocation5 + $0x214] ss:$8 sps:$4 sm:$0xff]   ;;  %v351_v12 = vpack.c.bf16 %v215_v8, %v215_v8  ;;  %v7296_v7 = vld [vmem:[#allocation5 + $0x304] ss:$8 sps:$4 sm:$0xff]  }
  0xa8   :  { %v7342_v13 = vld [vmem:[#allocation7 + $0x4] ss:$16 sps:$4 sm:$0xff]   ;;  %v7344_v14 = vld [vmem:[#allocation7] ss:$16 sps:$4 sm:$0xff]   ;;  %v217_v8 = vld [vmem:[%s8777_s30 + $0x38] sm:$0xff] }
  0xa9   :  { %1019 = vmatpush1.bf16.msra.mxu0 %v7170_v15  ;;  %v7345_v15 = vld [vmem:[#allocation7 + $0x24] ss:$16 sps:$4 sm:$0xff]   ;;  %1580 = vmatprep.subr.bf16.mxu1 %v7342_v13  ;;  %v7264_v36 = vld [vmem:[#allocation5 + $0x260] ss:$8 sps:$4 sm:$0xff]   ;;  %v7297_v13 = vld [vmem:[#allocation5 + $0x310] ss:$8 sps:$4 sm:$0xff]  }
  0xaa   :  { %1020 = vmatprep.subr.bf16.mxu0 %v7171_v16  ;;  %v7249_v16 = vld [vmem:[#allocation5 + $0x210] ss:$8 sps:$4 sm:$0xff]   ;;  %1581 = vmatpush1.bf16.msra.mxu1 %v7344_v14  ;;  %v7360_v35 = vld [vmem:[#allocation7 + $0xc4] ss:$16 sps:$4 sm:$0xff]  }
  0xab   :  { %1582 = vmatprep.subr.bf16.mxu1 %v7345_v15  ;;  %v7302_v14 = vld [vmem:[#allocation5 + $0x324] ss:$8 sps:$4 sm:$0xff]   ;;  %v7300_v15 = vld [vmem:[#allocation5 + $0x320] ss:$8 sps:$4 sm:$0xff]  }
  0xad   :  { %1021 = vmatpush1.bf16.msra.mxu0 %v7173_v17  ;;  %v7254_v17 = vld [vmem:[#allocation5 + $0x224] ss:$8 sps:$4 sm:$0xff]  }
  0xae   :  { %1022 = vmatprep.subr.bf16.mxu0 %v7174_v18  ;;  %v7347_v18 = vld [vmem:[#allocation7 + $0x20] ss:$16 sps:$4 sm:$0xff]  }
  0xaf   :  { %1583 = vmatpush1.bf16.msra.mxu1 %v7347_v18  ;;  %v7308_v18 = vld [vmem:[#allocation5 + $0x344] ss:$8 sps:$4 sm:$0xff]  }
  0xb1   :  { %1023 = vmatpush1.bf16.msra.mxu0 %v7176_v19  ;;  %v7348_v19 = vld [vmem:[#allocation7 + $0x44] ss:$16 sps:$4 sm:$0xff]  }
  0xb2   :  { %1024 = vmatprep.subr.bf16.mxu0 %v7177_v20  ;;  %v7252_v20 = vld [vmem:[#allocation5 + $0x220] ss:$8 sps:$4 sm:$0xff]   ;;  %1584 = vmatprep.subr.bf16.mxu1 %v7348_v19 }
  0xb3   :  { %v7306_v19 = vld [vmem:[#allocation5 + $0x340] ss:$8 sps:$4 sm:$0xff]  }
  0xb5   :  { %1025 = vmatpush1.bf16.msra.mxu0 %v7179_v21  ;;  %v7257_v21 = vld [vmem:[#allocation5 + $0x234] ss:$8 sps:$4 sm:$0xff]  }
  0xb6   :  { %1026 = vmatprep.subr.bf16.mxu0 %v7180_v22  ;;  %v7350_v22 = vld [vmem:[#allocation7 + $0x40] ss:$16 sps:$4 sm:$0xff]  }
  0xb7   :  { %1585 = vmatpush1.bf16.msra.mxu1 %v7350_v22  ;;  %v7314_v22 = vld [vmem:[#allocation5 + $0x364] ss:$8 sps:$4 sm:$0xff]  }
  0xb9   :  { %1027 = vmatpush1.bf16.msra.mxu0 %v7182_v23  ;;  %v7255_v23 = vld [vmem:[#allocation5 + $0x230] ss:$8 sps:$4 sm:$0xff]  }
  0xba   :  { %1028 = vmatprep.subr.bf16.mxu0 %v7183_v24  ;;  %v7351_v24 = vld [vmem:[#allocation7 + $0x64] ss:$16 sps:$4 sm:$0xff]  }
  0xbb   :  { %1586 = vmatprep.subr.bf16.mxu1 %v7351_v24  ;;  %v7317_v24 = vld [vmem:[#allocation5 + $0x374] ss:$8 sps:$4 sm:$0xff]  }
  0xbd   :  { %1029 = vmatpush1.bf16.msra.mxu0 %v7185_v25  ;;  %v7260_v25 = vld [vmem:[#allocation5 + $0x244] ss:$8 sps:$4 sm:$0xff]  }
  0xbe   :  { %1030 = vmatprep.subr.bf16.mxu0 %v7186_v26  ;;  %v7353_v26 = vld [vmem:[#allocation7 + $0x60] ss:$16 sps:$4 sm:$0xff]  }
  0xbf   :  { %1587 = vmatpush1.bf16.msra.mxu1 %v7353_v26  ;;  %v7320_v26 = vld [vmem:[#allocation5 + $0x384] ss:$8 sps:$4 sm:$0xff]  }
  0xc1   :  { %1031 = vmatpush1.bf16.msra.mxu0 %v7188_v27  ;;  %v7354_v27 = vld [vmem:[#allocation7 + $0x84] ss:$16 sps:$4 sm:$0xff]  }
  0xc2   :  { %1032 = vmatprep.subr.bf16.mxu0 %v7189_v28  ;;  %v7258_v28 = vld [vmem:[#allocation5 + $0x240] ss:$8 sps:$4 sm:$0xff]   ;;  %1588 = vmatprep.subr.bf16.mxu1 %v7354_v27 }
  0xc3   :  { %v7318_v27 = vld [vmem:[#allocation5 + $0x380] ss:$8 sps:$4 sm:$0xff]  }
  0xc5   :  { %1033 = vmatpush1.bf16.msra.mxu0 %v7191_v29  ;;  %v7263_v29 = vld [vmem:[#allocation5 + $0x254] ss:$8 sps:$4 sm:$0xff]  }
  0xc6   :  { %1034 = vmatprep.subr.bf16.mxu0 %v7192_v30  ;;  %v7356_v30 = vld [vmem:[#allocation7 + $0x80] ss:$16 sps:$4 sm:$0xff]  }
  0xc7   :  { %1589 = vmatpush1.bf16.msra.mxu1 %v7356_v30  ;;  %v7326_v30 = vld [vmem:[#allocation5 + $0x3a4] ss:$8 sps:$4 sm:$0xff]  }
  0xc9   :  { %1035 = vmatpush1.bf16.msra.mxu0 %v7194_v31  ;;  %v7357_v31 = vld [vmem:[#allocation7 + $0xa4] ss:$16 sps:$4 sm:$0xff]  }
  0xca   :  { %1036 = vmatprep.subr.bf16.mxu0 %v7195_v32  ;;  %v7261_v32 = vld [vmem:[#allocation5 + $0x250] ss:$8 sps:$4 sm:$0xff]   ;;  %1590 = vmatprep.subr.bf16.mxu1 %v7357_v31  ;;  %v7324_v31 = vld [vmem:[#allocation5 + $0x3a0] ss:$8 sps:$4 sm:$0xff]  }
  0xcd   :  { %1037 = vmatpush1.bf16.msra.mxu0 %v7197_v33  ;;  %v7266_v33 = vld [vmem:[#allocation5 + $0x264] ss:$8 sps:$4 sm:$0xff]  }
  0xce   :  { %1047 = vmatprep.subr.bf16.mxu0 %v7200_v34  ;;  %v7359_v34 = vld [vmem:[#allocation7 + $0xa0] ss:$16 sps:$4 sm:$0xff]  }
  0xcf   :  { %1591 = vmatpush1.bf16.msra.mxu1 %v7359_v34  ;;  %v7332_v34 = vld [vmem:[#allocation5 + $0x3c4] ss:$8 sps:$4 sm:$0xff]  }
  0xd0   :  { %1039 = vmatmul.mubr.bf16.vlgmr.msra.gmra.mrb[0].mxu0 %v346_v37  ;;  %v7269_v37 = vld [vmem:[#allocation5 + $0x274] ss:$8 sps:$4 sm:$0xff]   ;;  %1592 = vmatprep.subr.bf16.mxu1 %v7360_v35  ;;  %v7330_v35 = vld [vmem:[#allocation5 + $0x3c0] ss:$8 sps:$4 sm:$0xff]  }
  0xd1   :  { %1048 = vmatpush1.bf16.msra.mxu0 %v7198_v38  ;;  %1079 = vmatprep.mubr.bf16.mxu0 %v349_v39  ;;  %v7362_v38 = vld [vmem:[#allocation7 + $0xc0] ss:$16 sps:$4 sm:$0xff]   ;;  %v7363_v39 = vld [vmem:[#allocation7 + $0xe4] ss:$16 sps:$4 sm:$0xff]  }
  0xd2   :  { %1049 = vmatprep.subr.bf16.mxu0 %v7203_v40  ;;  %v7267_v40 = vld [vmem:[#allocation5 + $0x270] ss:$8 sps:$4 sm:$0xff]  }
  0xd3   :  { %1593 = vmatpush1.bf16.msra.mxu1 %v7362_v38  ;;  %v7338_v38 = vld [vmem:[#allocation5 + $0x3e4] ss:$8 sps:$4 sm:$0xff]  }
  0xd4   :  { %1594 = vmatprep.subr.bf16.mxu1 %v7363_v39  ;;  %v7336_v39 = vld [vmem:[#allocation5 + $0x3e0] ss:$8 sps:$4 sm:$0xff]  }
  0xd5   :  { %1050 = vmatpush1.bf16.msra.mxu0 %v7201_v41  ;;  %v7272_v41 = vld [vmem:[#allocation5 + $0x284] ss:$8 sps:$4 sm:$0xff]  }
  0xd6   :  { %1051 = vmatprep.subr.bf16.mxu0 %v7206_v42  ;;  %v7365_v42 = vld [vmem:[#allocation7 + $0xe0] ss:$16 sps:$4 sm:$0xff]  }
  0xd7   :  { %1595 = vmatpush1.bf16.msra.mxu1 %v7365_v42  ;;  %v216_v42 = vld [vmem:[%s8777_s30 + $0x30] sm:$0xff] }
  0xd9   :  { %1052 = vmatpush1.bf16.msra.mxu0 %v7204_v43  ;;  %v7366_v43 = vld [vmem:[#allocation7 + $0x104] ss:$16 sps:$4 sm:$0xff]  }
  0xda   :  { %1053 = vmatprep.subr.bf16.mxu0 %v7209_v44  ;;  %v7270_v44 = vld [vmem:[#allocation5 + $0x280] ss:$8 sps:$4 sm:$0xff]   ;;  %1596 = vmatprep.subr.bf16.mxu1 %v7366_v43  ;;  %v352_v43 = vpack.c.bf16 %v216_v42, %v216_v42 }
  0xdb   :  { %v7408_v42 = vld [vmem:[#allocation7 + $0xc8] ss:$16 sps:$4 sm:$0xff]  }
  0xdd   :  { %1054 = vmatpush1.bf16.msra.mxu0 %v7207_v45  ;;  %v7275_v45 = vld [vmem:[#allocation5 + $0x294] ss:$8 sps:$4 sm:$0xff]  }
  0xde   :  { %1055 = vmatprep.subr.bf16.mxu0 %v7212_v46  ;;  %v7368_v46 = vld [vmem:[#allocation7 + $0x100] ss:$16 sps:$4 sm:$0xff]  }
  0xdf   :  { %1597 = vmatpush1.bf16.msra.mxu1 %v7368_v46  ;;  %v7387_v46 = vld [vmem:[#allocation7 + $0x1e4] ss:$16 sps:$4 sm:$0xff]  }
  0xe1   :  { %1056 = vmatpush1.bf16.msra.mxu0 %v7210_v47  ;;  %v7369_v47 = vld [vmem:[#allocation7 + $0x124] ss:$16 sps:$4 sm:$0xff]  }
  0xe2   :  { %1057 = vmatprep.subr.bf16.mxu0 %v7215_v48  ;;  %v7273_v48 = vld [vmem:[#allocation5 + $0x290] ss:$8 sps:$4 sm:$0xff]   ;;  %1598 = vmatprep.subr.bf16.mxu1 %v7369_v47 }
  0xe3   :  { %v7389_v47 = vld [vmem:[#allocation7 + $0x1e0] ss:$16 sps:$4 sm:$0xff]  }
  0xe5   :  { %1058 = vmatpush1.bf16.msra.mxu0 %v7213_v49  ;;  %v7278_v49 = vld [vmem:[#allocation5 + $0x2a4] ss:$8 sps:$4 sm:$0xff]  }
  0xe6   :  { %1059 = vmatprep.subr.bf16.mxu0 %v7218_v50  ;;  %v7371_v50 = vld [vmem:[#allocation7 + $0x120] ss:$16 sps:$4 sm:$0xff]  }
  0xe7   :  { %1599 = vmatpush1.bf16.msra.mxu1 %v7371_v50  ;;  %v7443_v50 = vld [vmem:[#allocation9 + $0xc] ss:$28 sps:$4 sm:$0xff]  }
  0xe9   :  { %1060 = vmatpush1.bf16.msra.mxu0 %v7216_v51  ;;  %v7372_v51 = vld [vmem:[#allocation7 + $0x144] ss:$16 sps:$4 sm:$0xff]  }
  0xea   :  { %1061 = vmatprep.subr.bf16.mxu0 %v7221_v52  ;;  %v7276_v52 = vld [vmem:[#allocation5 + $0x2a0] ss:$8 sps:$4 sm:$0xff]   ;;  %1600 = vmatprep.subr.bf16.mxu1 %v7372_v51 }
  0xeb   :  { %v7449_v51 = vld [vmem:[#allocation9 + $0x44] ss:$28 sps:$4 sm:$0xff]  }
  0xed   :  { %1062 = vmatpush1.bf16.msra.mxu0 %v7219_v53  ;;  %v7281_v53 = vld [vmem:[#allocation5 + $0x2b4] ss:$8 sps:$4 sm:$0xff]  }
  0xee   :  { %1063 = vmatprep.subr.bf16.mxu0 %v7224_v54  ;;  %v7374_v54 = vld [vmem:[#allocation7 + $0x140] ss:$16 sps:$4 sm:$0xff]  }
  0xef   :  { %1601 = vmatpush1.bf16.msra.mxu1 %v7374_v54  ;;  %v7453_v54 = vld [vmem:[#allocation9 + $0x78] ss:$28 sps:$4 sm:$0xff]  }
  0xf1   :  { %1064 = vmatpush1.bf16.msra.mxu0 %v7222_v55  ;;  %v7375_v55 = vld [vmem:[#allocation7 + $0x164] ss:$16 sps:$4 sm:$0xff]  }
  0xf2   :  { %1065 = vmatprep.subr.bf16.mxu0 %v7227_v56  ;;  %v7279_v56 = vld [vmem:[#allocation5 + $0x2b0] ss:$8 sps:$4 sm:$0xff]   ;;  %1602 = vmatprep.subr.bf16.mxu1 %v7375_v55 }
  0xf3   :  { %v7461_v55 = vld [vmem:[#allocation9 + $0xb4] ss:$28 sps:$4 sm:$0xff]  }
  0xf5   :  { %1066 = vmatpush1.bf16.msra.mxu0 %v7225_v57  ;;  %v7284_v57 = vld [vmem:[#allocation5 + $0x2c4] ss:$8 sps:$4 sm:$0xff]  }
  0xf6   :  { %1067 = vmatprep.subr.bf16.mxu0 %v7230_v58  ;;  %v7377_v58 = vld [vmem:[#allocation7 + $0x160] ss:$16 sps:$4 sm:$0xff]  }
  0xf7   :  { %1603 = vmatpush1.bf16.msra.mxu1 %v7377_v58  ;;  %v7465_v58 = vld [vmem:[#allocation9 + $0xe8] ss:$28 sps:$4 sm:$0xff]  }
  0xf9   :  { %1068 = vmatpush1.bf16.msra.mxu0 %v7228_v59  ;;  %v7378_v59 = vld [vmem:[#allocation7 + $0x184] ss:$16 sps:$4 sm:$0xff]  }
  0xfa   :  { %1069 = vmatprep.subr.bf16.mxu0 %v7233_v60  ;;  %v7282_v60 = vld [vmem:[#allocation5 + $0x2c0] ss:$8 sps:$4 sm:$0xff]   ;;  %1604 = vmatprep.subr.bf16.mxu1 %v7378_v59 }
  0xfb   :  { %v7473_v59 = vld [vmem:[#allocation9 + $0x124] ss:$28 sps:$4 sm:$0xff]  }
  0xfd   :  { %1070 = vmatpush1.bf16.msra.mxu0 %v7231_v61  ;;  %v7287_v61 = vld [vmem:[#allocation5 + $0x2d4] ss:$8 sps:$4 sm:$0xff]  }
  0xfe   :  { %1071 = vmatprep.subr.bf16.mxu0 %v7236_v62  ;;  %v7380_v62 = vld [vmem:[#allocation7 + $0x180] ss:$16 sps:$4 sm:$0xff]  }
  0xff   :  { %1605 = vmatpush1.bf16.msra.mxu1 %v7380_v62  ;;  %v7477_v62 = vld [vmem:[#allocation9 + $0x158] ss:$28 sps:$4 sm:$0xff]  }
 0x101   :  { %1072 = vmatpush1.bf16.msra.mxu0 %v7234_v63  ;;  %v7381_v63 = vld [vmem:[#allocation7 + $0x1a4] ss:$16 sps:$4 sm:$0xff]  }
 0x102   :  { %1073 = vmatprep.subr.bf16.mxu0 %v7239_v0  ;;  %v7285_v0 = vld [vmem:[#allocation5 + $0x2d0] ss:$8 sps:$4 sm:$0xff]   ;;  %1606 = vmatprep.subr.bf16.mxu1 %v7381_v63 }
 0x103   :  { %v7485_v63 = vld [vmem:[#allocation9 + $0x194] ss:$28 sps:$4 sm:$0xff]  }
 0x105   :  { %1074 = vmatpush1.bf16.msra.mxu0 %v7237_v1  ;;  %v7290_v1 = vld [vmem:[#allocation5 + $0x2e4] ss:$8 sps:$4 sm:$0xff]  }
 0x106   :  { %1075 = vmatprep.subr.bf16.mxu0 %v7242_v2  ;;  %v7383_v2 = vld [vmem:[#allocation7 + $0x1a0] ss:$16 sps:$4 sm:$0xff]  }
 0x107   :  { %1607 = vmatpush1.bf16.msra.mxu1 %v7383_v2  ;;  %v7489_v2 = vld [vmem:[#allocation9 + $0x1c8] ss:$28 sps:$4 sm:$0xff]  }
 0x109   :  { %1076 = vmatpush1.bf16.msra.mxu0 %v7240_v3  ;;  %v7288_v3 = vld [vmem:[#allocation5 + $0x2e0] ss:$8 sps:$4 sm:$0xff]  }
 0x10a   :  { %1077 = vmatprep.subr.bf16.mxu0 %v7245_v4  ;;  %v7293_v4 = vld [vmem:[#allocation5 + $0x2f4] ss:$8 sps:$4 sm:$0xff]  }
 0x10d   :  { %1078 = vmatpush1.bf16.msra.mxu0 %v7243_v5  ;;  %v7291_v5 = vld [vmem:[#allocation5 + $0x2f0] ss:$8 sps:$4 sm:$0xff]  }
 0x10e   :  { %1088 = vmatprep.subr.bf16.mxu0 %v7248_v6  ;;  %v214_v6 = vld [vmem:[%s8777_s30 + $0x20] sm:$0xff] }
 0x110   :  { %1080 = vmatmul.mubr.bf16.vlgmr.msra.gmra.mrb[0].mxu0 %v348_v10  ;;  %v350_v10 = vpack.c.bf16 %v214_v6, %v214_v6  ;;  %v356_v6 = vlaneseq }
 0x111   :  { %1089 = vmatpush1.bf16.msra.mxu0 %v7246_v9  ;;  %1120 = vmatprep.mubr.bf16.mxu0 %v351_v12  ;;  %v7294_v9 = vld [vmem:[#allocation5 + $0x300] ss:$8 sps:$4 sm:$0xff]   ;;  %v353_v12 = vpack.c.bf16 %v217_v8, %v217_v8  ;;  %v7509_v8 = vld [vmem:[#allocation9 + $0x274] ss:$28 sps:$4 sm:$0xff]  }
 0x112   :  { %1090 = vmatprep.subr.bf16.mxu0 %v7251_v11  ;;  %v7299_v11 = vld [vmem:[#allocation5 + $0x314] ss:$8 sps:$4 sm:$0xff]  }
 0x115   :  { %1091 = vmatpush1.bf16.msra.mxu0 %v7249_v16  ;;  %v7305_v16 = vld [vmem:[#allocation5 + $0x334] ss:$8 sps:$4 sm:$0xff]  }
 0x116   :  { %1092 = vmatprep.subr.bf16.mxu0 %v7254_v17  ;;  %v7303_v17 = vld [vmem:[#allocation5 + $0x330] ss:$8 sps:$4 sm:$0xff]  }
 0x119   :  { %1093 = vmatpush1.bf16.msra.mxu0 %v7252_v20  ;;  %v7311_v20 = vld [vmem:[#allocation5 + $0x354] ss:$8 sps:$4 sm:$0xff]  }
 0x11a   :  { %1094 = vmatprep.subr.bf16.mxu0 %v7257_v21  ;;  %v7309_v21 = vld [vmem:[#allocation5 + $0x350] ss:$8 sps:$4 sm:$0xff]  }
 0x11d   :  { %1095 = vmatpush1.bf16.msra.mxu0 %v7255_v23  ;;  %v7312_v23 = vld [vmem:[#allocation5 + $0x360] ss:$8 sps:$4 sm:$0xff]  }
 0x11e   :  { %1096 = vmatprep.subr.bf16.mxu0 %v7260_v25  ;;  %v7315_v25 = vld [vmem:[#allocation5 + $0x370] ss:$8 sps:$4 sm:$0xff]  }
 0x121   :  { %1097 = vmatpush1.bf16.msra.mxu0 %v7258_v28  ;;  %v7323_v28 = vld [vmem:[#allocation5 + $0x394] ss:$8 sps:$4 sm:$0xff]  }
 0x122   :  { %1098 = vmatprep.subr.bf16.mxu0 %v7263_v29  ;;  %v7321_v29 = vld [vmem:[#allocation5 + $0x390] ss:$8 sps:$4 sm:$0xff]  }
 0x125   :  { %1099 = vmatpush1.bf16.msra.mxu0 %v7261_v32  ;;  %v7329_v32 = vld [vmem:[#allocation5 + $0x3b4] ss:$8 sps:$4 sm:$0xff]  }
 0x126   :  { %1100 = vmatprep.subr.bf16.mxu0 %v7266_v33  ;;  %v7327_v33 = vld [vmem:[#allocation5 + $0x3b0] ss:$8 sps:$4 sm:$0xff]  }
 0x129   :  { %1101 = vmatpush1.bf16.msra.mxu0 %v7264_v36  ;;  %v7335_v36 = vld [vmem:[#allocation5 + $0x3d4] ss:$8 sps:$4 sm:$0xff]  }
 0x12a   :  { %1102 = vmatprep.subr.bf16.mxu0 %v7269_v37  ;;  %v7333_v37 = vld [vmem:[#allocation5 + $0x3d0] ss:$8 sps:$4 sm:$0xff]  }
 0x12d   :  { %1103 = vmatpush1.bf16.msra.mxu0 %v7267_v40  ;;  %v7341_v40 = vld [vmem:[#allocation5 + $0x3f4] ss:$8 sps:$4 sm:$0xff]  }
 0x12e   :  { %1104 = vmatprep.subr.bf16.mxu0 %v7272_v41  ;;  %v7339_v41 = vld [vmem:[#allocation5 + $0x3f0] ss:$8 sps:$4 sm:$0xff]  }
 0x131   :  { %1105 = vmatpush1.bf16.msra.mxu0 %v7270_v44  ;;  %v7384_v44 = vld [vmem:[#allocation7 + $0x1c4] ss:$16 sps:$4 sm:$0xff]  }
 0x132   :  { %1106 = vmatprep.subr.bf16.mxu0 %v7275_v45  ;;  %v7386_v45 = vld [vmem:[#allocation7 + $0x1c0] ss:$16 sps:$4 sm:$0xff]   ;;  %1608 = vmatprep.subr.bf16.mxu1 %v7384_v44  ;;  %v7411_v44 = vld [vmem:[#allocation7 + $0xe8] ss:$16 sps:$4 sm:$0xff]  }
 0x133   :  { %1609 = vmatpush1.bf16.msra.mxu1 %v7386_v45  ;;  %v7416_v45 = vld [vmem:[#allocation7 + $0x10c] ss:$16 sps:$4 sm:$0xff]  }
 0x134   :  { %1610 = vmatprep.subr.bf16.mxu1 %v7387_v46  ;;  %v7414_v46 = vld [vmem:[#allocation7 + $0x108] ss:$16 sps:$4 sm:$0xff]  }
 0x135   :  { %1107 = vmatpush1.bf16.msra.mxu0 %v7273_v48  ;;  %v7392_v48 = vld [vmem:[#allocation7 + $0xc] ss:$16 sps:$4 sm:$0xff]  }
 0x136   :  { %1108 = vmatprep.subr.bf16.mxu0 %v7278_v49  ;;  %v7441_v49 = vld [vmem:[#allocation9 + $0x8] ss:$28 sps:$4 sm:$0xff]  }
 0x137   :  { %1611 = vmatpush1.bf16.msra.mxu1 %v7389_v47  ;;  %v7419_v47 = vld [vmem:[#allocation7 + $0x12c] ss:$16 sps:$4 sm:$0xff]  }
 0x138   :  { %1621 = vmatprep.subr.bf16.mxu1 %v7392_v48  ;;  %v7417_v48 = vld [vmem:[#allocation7 + $0x128] ss:$16 sps:$4 sm:$0xff]  }
 0x139   :  { %1109 = vmatpush1.bf16.msra.mxu0 %v7276_v52  ;;  %v7447_v52 = vld [vmem:[#allocation9 + $0x40] ss:$28 sps:$4 sm:$0xff]  }
 0x13a   :  { %1110 = vmatprep.subr.bf16.mxu0 %v7281_v53  ;;  %v7455_v53 = vld [vmem:[#allocation9 + $0x7c] ss:$28 sps:$4 sm:$0xff]  }
 0x13d   :  { %1111 = vmatpush1.bf16.msra.mxu0 %v7279_v56  ;;  %v7459_v56 = vld [vmem:[#allocation9 + $0xb0] ss:$28 sps:$4 sm:$0xff]  }
 0x13e   :  { %1112 = vmatprep.subr.bf16.mxu0 %v7284_v57  ;;  %v7467_v57 = vld [vmem:[#allocation9 + $0xec] ss:$28 sps:$4 sm:$0xff]  }
 0x141   :  { %1113 = vmatpush1.bf16.msra.mxu0 %v7282_v60  ;;  %v7471_v60 = vld [vmem:[#allocation9 + $0x120] ss:$28 sps:$4 sm:$0xff]  }
 0x142   :  { %1114 = vmatprep.subr.bf16.mxu0 %v7287_v61  ;;  %v7479_v61 = vld [vmem:[#allocation9 + $0x15c] ss:$28 sps:$4 sm:$0xff]  }
 0x145   :  { %1115 = vmatpush1.bf16.msra.mxu0 %v7285_v0  ;;  %v7483_v0 = vld [vmem:[#allocation9 + $0x190] ss:$28 sps:$4 sm:$0xff]  }
 0x146   :  { %1116 = vmatprep.subr.bf16.mxu0 %v7290_v1  ;;  %v7491_v1 = vld [vmem:[#allocation9 + $0x1cc] ss:$28 sps:$4 sm:$0xff]  }
 0x149   :  { %1117 = vmatpush1.bf16.msra.mxu0 %v7288_v3  ;;  %v7497_v3 = vld [vmem:[#allocation9 + $0x204] ss:$28 sps:$4 sm:$0xff]  }
 0x14a   :  { %1118 = vmatprep.subr.bf16.mxu0 %v7293_v4  ;;  %v7495_v4 = vld [vmem:[#allocation9 + $0x200] ss:$28 sps:$4 sm:$0xff]  }
 0x14d   :  { %1119 = vmatpush1.bf16.msra.mxu0 %v7291_v5  ;;  %v7503_v5 = vld [vmem:[#allocation9 + $0x23c] ss:$28 sps:$4 sm:$0xff]  }
 0x14e   :  { %1129 = vmatprep.subr.bf16.mxu0 %v7296_v7  ;;  %v7501_v7 = vld [vmem:[#allocation9 + $0x238] ss:$28 sps:$4 sm:$0xff]  }
 0x150   :  { %1121 = vmatmul.mubr.bf16.vlgmr.msra.gmra.mrb[0].mxu0 %v350_v10  ;;  %v7507_v10 = vld [vmem:[#allocation9 + $0x270] ss:$28 sps:$4 sm:$0xff]  }
 0x151   :  { %1130 = vmatpush1.bf16.msra.mxu0 %v7294_v9  ;;  %1161 = vmatprep.mubr.bf16.mxu0 %v353_v12  ;;  %v8498_v9 = vshrl.u32 %v356_v6, 7  ;;  %v7462_v6 = vld [vmem:[#allocation9 + $0xe0] ss:$28 sps:$4 sm:$0xff]  }
 0x152   :  { %1131 = vmatprep.subr.bf16.mxu0 %v7299_v11  ;;  %v7515_v11 = vld [vmem:[#allocation9 + $0x2ac] ss:$28 sps:$4 sm:$0xff]  }
 0x153   :  { %v8501_v12 = vsub.s32 0, %v8498_v9 }
 0x155   :  { %1132 = vmatpush1.bf16.msra.mxu0 %v7297_v13  ;;  %v7513_v13 = vld [vmem:[#allocation9 + $0x2a8] ss:$28 sps:$4 sm:$0xff]  }
 0x156   :  { %1133 = vmatprep.subr.bf16.mxu0 %v7302_v14  ;;  %v354_v14 = vld [vmem:[%s8778_s10] sm:$0x3] }
 0x159   :  { %1134 = vmatpush1.bf16.msra.mxu0 %v7300_v15  ;;  %v8507_v15 = vsub.s32 1, %v8498_v9 }
 0x15a   :  { %1135 = vmatprep.subr.bf16.mxu0 %v7305_v16  ;;  %v7521_v16 = vld [vmem:[#allocation9 + $0x2e4] ss:$28 sps:$4 sm:$0xff]  }
 0x15d   :  { %1136 = vmatpush1.bf16.msra.mxu0 %v7303_v17  ;;  %v359_v17 = vrot.slane %v354_v14, %v8501_v12 }
 0x15e   :  { %1137 = vmatprep.subr.bf16.mxu0 %v7308_v18  ;;  %v7519_v18 = vld [vmem:[#allocation9 + $0x2e0] ss:$28 sps:$4 sm:$0xff]  }
 0x161   :  { %1138 = vmatpush1.bf16.msra.mxu0 %v7306_v19  ;;  %v363_v19 = vrot.slane %v354_v14, %v8507_v15  ;;  %v7474_v14 = vld [vmem:[#allocation9 + $0x150] ss:$28 sps:$4 sm:$0xff]  }
 0x162   :  { %1139 = vmatprep.subr.bf16.mxu0 %v7311_v20 }
 0x165   :  { %1140 = vmatpush1.bf16.msra.mxu0 %v7309_v21 }
 0x166   :  { %1141 = vmatprep.subr.bf16.mxu0 %v7314_v22 }
 0x169   :  { %1142 = vmatpush1.bf16.msra.mxu0 %v7312_v23 }
 0x16a   :  { %1143 = vmatprep.subr.bf16.mxu0 %v7317_v24 }
 0x16d   :  { %1144 = vmatpush1.bf16.msra.mxu0 %v7315_v25 }
 0x16e   :  { %1145 = vmatprep.subr.bf16.mxu0 %v7320_v26 }
 0x171   :  { %1146 = vmatpush1.bf16.msra.mxu0 %v7318_v27 }
 0x172   :  { %1147 = vmatprep.subr.bf16.mxu0 %v7323_v28 }
 0x175   :  { %1148 = vmatpush1.bf16.msra.mxu0 %v7321_v29  ;;  %v7390_v29 = vld [vmem:[#allocation7 + $0x8] ss:$16 sps:$4 sm:$0xff]  }
 0x176   :  { %1149 = vmatprep.subr.bf16.mxu0 %v7326_v30 }
 0x179   :  { %1150 = vmatpush1.bf16.msra.mxu0 %v7324_v31  ;;  %v7395_v31 = vld [vmem:[#allocation7 + $0x2c] ss:$16 sps:$4 sm:$0xff]  }
 0x17a   :  { %1151 = vmatprep.subr.bf16.mxu0 %v7329_v32  ;;  %v7393_v32 = vld [vmem:[#allocation7 + $0x28] ss:$16 sps:$4 sm:$0xff]  }
 0x17d   :  { %1152 = vmatpush1.bf16.msra.mxu0 %v7327_v33  ;;  %v7398_v33 = vld [vmem:[#allocation7 + $0x4c] ss:$16 sps:$4 sm:$0xff]  }
 0x17e   :  { %1153 = vmatprep.subr.bf16.mxu0 %v7332_v34  ;;  %v7396_v34 = vld [vmem:[#allocation7 + $0x48] ss:$16 sps:$4 sm:$0xff]  }
 0x181   :  { %1154 = vmatpush1.bf16.msra.mxu0 %v7330_v35  ;;  %v7401_v35 = vld [vmem:[#allocation7 + $0x6c] ss:$16 sps:$4 sm:$0xff]  }
 0x182   :  { %1155 = vmatprep.subr.bf16.mxu0 %v7335_v36  ;;  %v7399_v36 = vld [vmem:[#allocation7 + $0x68] ss:$16 sps:$4 sm:$0xff]  }
 0x185   :  { %1156 = vmatpush1.bf16.msra.mxu0 %v7333_v37  ;;  %v7404_v37 = vld [vmem:[#allocation7 + $0x8c] ss:$16 sps:$4 sm:$0xff]  }
 0x186   :  { %1157 = vmatprep.subr.bf16.mxu0 %v7338_v38  ;;  %v7402_v38 = vld [vmem:[#allocation7 + $0x88] ss:$16 sps:$4 sm:$0xff]  }
 0x189   :  { %1158 = vmatpush1.bf16.msra.mxu0 %v7336_v39  ;;  %v7407_v39 = vld [vmem:[#allocation7 + $0xac] ss:$16 sps:$4 sm:$0xff]  }
 0x18a   :  { %1159 = vmatprep.subr.bf16.mxu0 %v7341_v40  ;;  %v7405_v40 = vld [vmem:[#allocation7 + $0xa8] ss:$16 sps:$4 sm:$0xff]  }
 0x18d   :  { %1160 = vmatpush1.bf16.msra.mxu0 %v7339_v41  ;;  %v7410_v41 = vld [vmem:[#allocation7 + $0xcc] ss:$16 sps:$4 sm:$0xff]  }
 0x18e   :  { %3197 = vmatprep.subr.bf16.mxu0 %v7443_v50  ;;  %v7420_v50 = vld [vmem:[#allocation7 + $0x148] ss:$16 sps:$4 sm:$0xff]  }
 0x190   :  { %1162 = vmatmul.mubr.bf16.vlgmr.msra.gmra.mrb[0].mxu0 %v352_v43  ;;  %v7413_v43 = vld [vmem:[#allocation7 + $0xec] ss:$16 sps:$4 sm:$0xff]  }
 0x191   :  { %3198 = vmatpush1.bf16.msra.mxu0 %v7441_v49  ;;  %v7422_v49 = vld [vmem:[#allocation7 + $0x14c] ss:$16 sps:$4 sm:$0xff]  }
 0x192   :  { %3199 = vmatprep.subr.bf16.mxu0 %v7449_v51  ;;  %v7425_v51 = vld [vmem:[#allocation7 + $0x16c] ss:$16 sps:$4 sm:$0xff]  }
 0x195   :  { %3200 = vmatpush1.bf16.msra.mxu0 %v7447_v52  ;;  %v7423_v52 = vld [vmem:[#allocation7 + $0x168] ss:$16 sps:$4 sm:$0xff]  }
 0x196   :  { %3201 = vmatprep.subr.bf16.mxu0 %v7455_v53  ;;  %v7428_v53 = vld [vmem:[#allocation7 + $0x18c] ss:$16 sps:$4 sm:$0xff]  }
 0x199   :  { %3202 = vmatpush1.bf16.msra.mxu0 %v7453_v54  ;;  %v7426_v54 = vld [vmem:[#allocation7 + $0x188] ss:$16 sps:$4 sm:$0xff]  }
 0x19a   :  { %3203 = vmatprep.subr.bf16.mxu0 %v7461_v55  ;;  %v7431_v55 = vld [vmem:[#allocation7 + $0x1ac] ss:$16 sps:$4 sm:$0xff]  }
 0x19d   :  { %3204 = vmatpush1.bf16.msra.mxu0 %v7459_v56  ;;  %v7429_v56 = vld [vmem:[#allocation7 + $0x1a8] ss:$16 sps:$4 sm:$0xff]  }
 0x19e   :  { %3205 = vmatprep.subr.bf16.mxu0 %v7467_v57  ;;  %v7434_v57 = vld [vmem:[#allocation7 + $0x1cc] ss:$16 sps:$4 sm:$0xff]  }
 0x1a1   :  { %3206 = vmatpush1.bf16.msra.mxu0 %v7465_v58  ;;  %v7432_v58 = vld [vmem:[#allocation7 + $0x1c8] ss:$16 sps:$4 sm:$0xff]  }
 0x1a2   :  { %3207 = vmatprep.subr.bf16.mxu0 %v7473_v59  ;;  %v7437_v59 = vld [vmem:[#allocation7 + $0x1ec] ss:$16 sps:$4 sm:$0xff]  }
 0x1a5   :  { %3208 = vmatpush1.bf16.msra.mxu0 %v7471_v60  ;;  %v7435_v60 = vld [vmem:[#allocation7 + $0x1e8] ss:$16 sps:$4 sm:$0xff]  }
 0x1a6   :  { %3209 = vmatprep.subr.bf16.mxu0 %v7479_v61  ;;  %v7440_v61 = vld [vmem:[#allocation9 + $0x4] ss:$28 sps:$4 sm:$0xff]  }
 0x1a9   :  { %3210 = vmatpush1.bf16.msra.mxu0 %v7477_v62  ;;  %v7438_v62 = vld [vmem:[#allocation9] ss:$28 sps:$4 sm:$0xff]  }
 0x1aa   :  { %3211 = vmatprep.subr.bf16.mxu0 %v7485_v63  ;;  %v7446_v63 = vld [vmem:[#allocation9 + $0x3c] ss:$28 sps:$4 sm:$0xff]  }
 0x1ad   :  { %3212 = vmatpush1.bf16.msra.mxu0 %v7483_v0  ;;  %v7444_v0 = vld [vmem:[#allocation9 + $0x38] ss:$28 sps:$4 sm:$0xff]  }
 0x1ae   :  { %3213 = vmatprep.subr.bf16.mxu0 %v7491_v1  ;;  %v7452_v1 = vld [vmem:[#allocation9 + $0x74] ss:$28 sps:$4 sm:$0xff]  }
 0x1b1   :  { %3214 = vmatpush1.bf16.msra.mxu0 %v7489_v2  ;;  %v7450_v2 = vld [vmem:[#allocation9 + $0x70] ss:$28 sps:$4 sm:$0xff]  }
 0x1b2   :  { %3215 = vmatprep.subr.bf16.mxu0 %v7497_v3  ;;  %v7458_v3 = vld [vmem:[#allocation9 + $0xac] ss:$28 sps:$4 sm:$0xff]  }
 0x1b5   :  { %3216 = vmatpush1.bf16.msra.mxu0 %v7495_v4  ;;  %v7456_v4 = vld [vmem:[#allocation9 + $0xa8] ss:$28 sps:$4 sm:$0xff]  }
 0x1b6   :  { %3217 = vmatprep.subr.bf16.mxu0 %v7503_v5  ;;  %v7464_v5 = vld [vmem:[#allocation9 + $0xe4] ss:$28 sps:$4 sm:$0xff]  }
 0x1b9   :  { %3218 = vmatpush1.bf16.msra.mxu0 %v7501_v7  ;;  %v7470_v7 = vld [vmem:[#allocation9 + $0x11c] ss:$28 sps:$4 sm:$0xff]  }
 0x1ba   :  { %3219 = vmatprep.subr.bf16.mxu0 %v7509_v8  ;;  %v7468_v8 = vld [vmem:[#allocation9 + $0x118] ss:$28 sps:$4 sm:$0xff]  }
 0x1bd   :  { %3220 = vmatpush1.bf16.msra.mxu0 %v7507_v10  ;;  %v7476_v10 = vld [vmem:[#allocation9 + $0x154] ss:$28 sps:$4 sm:$0xff]  }
 0x1be   :  { %3221 = vmatprep.subr.bf16.mxu0 %v7515_v11  ;;  %v7527_v11 = vld [vmem:[#allocation9 + $0x31c] ss:$28 sps:$4 sm:$0xff]  }
 0x1c1   :  { %3222 = vmatpush1.bf16.msra.mxu0 %v7513_v13  ;;  %v7525_v13 = vld [vmem:[#allocation9 + $0x318] ss:$28 sps:$4 sm:$0xff]  }
 0x1c2   :  { %3223 = vmatprep.subr.bf16.mxu0 %v7521_v16  ;;  %v7482_v16 = vld [vmem:[#allocation9 + $0x18c] ss:$28 sps:$4 sm:$0xff]  }
 0x1c5   :  { %3224 = vmatpush1.bf16.msra.mxu0 %v7519_v18  ;;  %v7531_v18 = vld [vmem:[#allocation9 + $0x350] ss:$28 sps:$4 sm:$0xff]  }
 0x1c6   :  { %3225 = vmatprep.subr.bf16.mxu0 %v7527_v11  ;;  %v7575_v11 = vld [vmem:[#allocation9 + $0x4dc] ss:$28 sps:$4 sm:$0xff]  }
 0x1c9   :  { %3226 = vmatpush1.bf16.msra.mxu0 %v7525_v13  ;;  %v7570_v13 = vld [vmem:[#allocation9 + $0x4d0] ss:$28 sps:$4 sm:$0xff]  }
 0x263   :  { %v1163_v20 = vpop.f32.mrb[0].mxu0 }
 0x264   :  { %v7044_v21 = vadd.f32 %v1163_v20, %v359_v17  ;;  %v1165_v22 = vpop.f32.mrb[1].mxu0  ;;  %v7533_v17 = vld [vmem:[#allocation9 + $0x354] ss:$28 sps:$4 sm:$0xff]   ;;  %v7488_v20 = vld [vmem:[#allocation9 + $0x1c4] ss:$28 sps:$4 sm:$0xff]  }
 0x265   :  { %v7045_v23 = vadd.f32 %v1165_v22, %v363_v19  ;;  %v1167_v24 = vpop.f32.mrb[2].mxu0  ;;  %3227 = vmatprep.subr.bf16.mxu0 %v7533_v17  ;;  %v7480_v19 = vld [vmem:[#allocation9 + $0x188] ss:$28 sps:$4 sm:$0xff]   ;;  %v7486_v22 = vld [vmem:[#allocation9 + $0x1c0] ss:$28 sps:$4 sm:$0xff]  }
 0x266   :  { %v1170_v25 = vmax.f32 %v7044_v21, 0.0  ;;  %v1168_v26 = vpop.f32.mrb[3].mxu0  ;;  %3228 = vmatpush1.bf16.msra.mxu0 %v7531_v18  ;;  %v7539_v21 = vld [vmem:[#allocation9 + $0x38c] ss:$28 sps:$4 sm:$0xff]   ;;  %v7492_v24 = vld [vmem:[#allocation9 + $0x1f8] ss:$28 sps:$4 sm:$0xff]  }
 0x267   :  { %v1171_v27 = vmax.f32 %v7045_v23, 0.0  ;;  %3238 = vmatprep.subr.bf16.mxu0 %v7539_v21  ;;  %v7494_v23 = vld [vmem:[#allocation9 + $0x1fc] ss:$28 sps:$4 sm:$0xff]   ;;  %v7498_v26 = vld [vmem:[#allocation9 + $0x230] ss:$28 sps:$4 sm:$0xff]  }
 0x268   :  { %v8511_v30 = vpack.c.bf16 %v1170_v25, %v1170_v25  ;;  %v7500_v25 = vld [vmem:[#allocation9 + $0x234] ss:$28 sps:$4 sm:$0xff]   ;;  %v7576_v18 = vld [vmem:[#allocation9 + $0x508] ss:$28 sps:$4 sm:$0xff]  }
 0x269   :  { %v1237_v28 = vpack.c.bf16 %v1171_v27, %v1171_v27  ;;  %v7506_v27 = vld [vmem:[#allocation9 + $0x26c] ss:$28 sps:$4 sm:$0xff]   ;;  %v7581_v17 = vld [vmem:[#allocation9 + $0x514] ss:$28 sps:$4 sm:$0xff]  }
 0x26a   :  { %v7587_v21 = vld [vmem:[#allocation9 + $0x54c] ss:$28 sps:$4 sm:$0xff]  }
 0x26b   :  { %1612 = vmatprep.mubr.bf16.mxu1 %v1237_v28 }
 0x26c   :  { %1613 = vmatmul.mubr.bf16.vlgmr.msra.gmra.mrb[0].mxu1 %v8511_v30 }
 0x26d   :  { %1622 = vmatpush1.bf16.msra.mxu1 %v7390_v29  ;;  %1653 = vmatprep.mubr.bf16.mxu1 %v1237_v28  ;;  %v7504_v28 = vld [vmem:[#allocation9 + $0x268] ss:$28 sps:$4 sm:$0xff]  }
 0x26e   :  { %1623 = vmatprep.subr.bf16.mxu1 %v7395_v31  ;;  %v7512_v29 = vld [vmem:[#allocation9 + $0x2a4] ss:$28 sps:$4 sm:$0xff]   ;;  %v7518_v31 = vld [vmem:[#allocation9 + $0x2dc] ss:$28 sps:$4 sm:$0xff]  }
 0x271   :  { %1624 = vmatpush1.bf16.msra.mxu1 %v7393_v32  ;;  %v7516_v32 = vld [vmem:[#allocation9 + $0x2d8] ss:$28 sps:$4 sm:$0xff]  }
 0x272   :  { %1625 = vmatprep.subr.bf16.mxu1 %v7398_v33  ;;  %v7524_v33 = vld [vmem:[#allocation9 + $0x314] ss:$28 sps:$4 sm:$0xff]  }
 0x275   :  { %1626 = vmatpush1.bf16.msra.mxu1 %v7396_v34  ;;  %v7522_v34 = vld [vmem:[#allocation9 + $0x310] ss:$28 sps:$4 sm:$0xff]  }
 0x276   :  { %1627 = vmatprep.subr.bf16.mxu1 %v7401_v35  ;;  %v7530_v35 = vld [vmem:[#allocation9 + $0x34c] ss:$28 sps:$4 sm:$0xff]  }
 0x279   :  { %1628 = vmatpush1.bf16.msra.mxu1 %v7399_v36  ;;  %v7528_v36 = vld [vmem:[#allocation9 + $0x348] ss:$28 sps:$4 sm:$0xff]  }
 0x27a   :  { %1629 = vmatprep.subr.bf16.mxu1 %v7404_v37  ;;  %v7536_v37 = vld [vmem:[#allocation9 + $0x384] ss:$28 sps:$4 sm:$0xff]  }
 0x27d   :  { %1630 = vmatpush1.bf16.msra.mxu1 %v7402_v38  ;;  %v8518_v38 = vld [vmem:[%s8751_s5] sm:$0xf] }
 0x27e   :  { %1631 = vmatprep.subr.bf16.mxu1 %v7407_v39  ;;  %v1243_v39 = vrot.slane %v8518_v38, %v8501_v12 }
 0x281   :  { %1632 = vmatpush1.bf16.msra.mxu1 %v7405_v40  ;;  %v1247_v40 = vrot.slane %v8518_v38, %v8507_v15 }
 0x282   :  { %1633 = vmatprep.subr.bf16.mxu1 %v7410_v41 }
 0x285   :  { %1634 = vmatpush1.bf16.msra.mxu1 %v7408_v42 }
 0x286   :  { %1635 = vmatprep.subr.bf16.mxu1 %v7413_v43 }
 0x289   :  { %1636 = vmatpush1.bf16.msra.mxu1 %v7411_v44 }
 0x28a   :  { %1637 = vmatprep.subr.bf16.mxu1 %v7416_v45 }
 0x28d   :  { %1638 = vmatpush1.bf16.msra.mxu1 %v7414_v46 }
 0x28e   :  { %1639 = vmatprep.subr.bf16.mxu1 %v7419_v47 }
 0x291   :  { %1640 = vmatpush1.bf16.msra.mxu1 %v7417_v48 }
 0x292   :  { %1641 = vmatprep.subr.bf16.mxu1 %v7422_v49 }
 0x295   :  { %1642 = vmatpush1.bf16.msra.mxu1 %v7420_v50  ;;  %v7534_v50 = vld [vmem:[#allocation9 + $0x380] ss:$28 sps:$4 sm:$0xff]  }
 0x296   :  { %1643 = vmatprep.subr.bf16.mxu1 %v7425_v51  ;;  %v7537_v51 = vld [vmem:[#allocation9 + $0x388] ss:$28 sps:$4 sm:$0xff]  }
 0x299   :  { %1644 = vmatpush1.bf16.msra.mxu1 %v7423_v52 }
 0x29a   :  { %1645 = vmatprep.subr.bf16.mxu1 %v7428_v53  ;;  %v7542_v53 = vld [vmem:[#allocation9 + $0x3bc] ss:$28 sps:$4 sm:$0xff]  }
 0x29d   :  { %1646 = vmatpush1.bf16.msra.mxu1 %v7426_v54  ;;  %v7545_v54 = vld [vmem:[#allocation9 + $0x3c4] ss:$28 sps:$4 sm:$0xff]  }
 0x29e   :  { %1647 = vmatprep.subr.bf16.mxu1 %v7431_v55  ;;  %v7540_v55 = vld [vmem:[#allocation9 + $0x3b8] ss:$28 sps:$4 sm:$0xff]  }
 0x2a1   :  { %1648 = vmatpush1.bf16.msra.mxu1 %v7429_v56  ;;  %v7543_v56 = vld [vmem:[#allocation9 + $0x3c0] ss:$28 sps:$4 sm:$0xff]  }
 0x2a2   :  { %1649 = vmatprep.subr.bf16.mxu1 %v7434_v57  ;;  %v7548_v57 = vld [vmem:[#allocation9 + $0x3f4] ss:$28 sps:$4 sm:$0xff]  }
 0x2a5   :  { %1650 = vmatpush1.bf16.msra.mxu1 %v7432_v58  ;;  %v7551_v58 = vld [vmem:[#allocation9 + $0x3fc] ss:$28 sps:$4 sm:$0xff]  }
 0x2a6   :  { %1651 = vmatprep.subr.bf16.mxu1 %v7437_v59  ;;  %v7546_v59 = vld [vmem:[#allocation9 + $0x3f0] ss:$28 sps:$4 sm:$0xff]  }
 0x2a9   :  { %1652 = vmatpush1.bf16.msra.mxu1 %v7435_v60  ;;  %v7549_v60 = vld [vmem:[#allocation9 + $0x3f8] ss:$28 sps:$4 sm:$0xff]  }
 0x2aa   :  { %3115 = vmatprep.subr.bf16.mxu1 %v7440_v61  ;;  %v7554_v61 = vld [vmem:[#allocation9 + $0x42c] ss:$28 sps:$4 sm:$0xff]  }
 0x2ac   :  { %1654 = vmatmul.mubr.bf16.vlgmr.msra.gmra.mrb[4].mxu1 %v8511_v30  ;;  %v7510_v30 = vld [vmem:[#allocation9 + $0x2a0] ss:$28 sps:$4 sm:$0xff]  }
 0x2ad   :  { %3116 = vmatpush1.bf16.msra.mxu1 %v7438_v62  ;;  %v7557_v62 = vld [vmem:[#allocation9 + $0x434] ss:$28 sps:$4 sm:$0xff]  }
 0x2ae   :  { %3117 = vmatprep.subr.bf16.mxu1 %v7446_v63  ;;  %v7552_v63 = vld [vmem:[#allocation9 + $0x428] ss:$28 sps:$4 sm:$0xff]  }
 0x2b1   :  { %3118 = vmatpush1.bf16.msra.mxu1 %v7444_v0  ;;  %v7555_v0 = vld [vmem:[#allocation9 + $0x430] ss:$28 sps:$4 sm:$0xff]  }
 0x2b2   :  { %3119 = vmatprep.subr.bf16.mxu1 %v7452_v1  ;;  %v7560_v1 = vld [vmem:[#allocation9 + $0x464] ss:$28 sps:$4 sm:$0xff]  }
 0x2b5   :  { %3120 = vmatpush1.bf16.msra.mxu1 %v7450_v2  ;;  %v7563_v2 = vld [vmem:[#allocation9 + $0x46c] ss:$28 sps:$4 sm:$0xff]  }
 0x2b6   :  { %3121 = vmatprep.subr.bf16.mxu1 %v7458_v3  ;;  %v7558_v3 = vld [vmem:[#allocation9 + $0x460] ss:$28 sps:$4 sm:$0xff]  }
 0x2b9   :  { %3122 = vmatpush1.bf16.msra.mxu1 %v7456_v4  ;;  %v7561_v4 = vld [vmem:[#allocation9 + $0x468] ss:$28 sps:$4 sm:$0xff]  }
 0x2ba   :  { %3123 = vmatprep.subr.bf16.mxu1 %v7464_v5  ;;  %v7566_v5 = vld [vmem:[#allocation9 + $0x49c] ss:$28 sps:$4 sm:$0xff]  }
 0x2bd   :  { %3124 = vmatpush1.bf16.msra.mxu1 %v7462_v6  ;;  %v7569_v6 = vld [vmem:[#allocation9 + $0x4a4] ss:$28 sps:$4 sm:$0xff]  }
 0x2be   :  { %3125 = vmatprep.subr.bf16.mxu1 %v7470_v7  ;;  %v7564_v7 = vld [vmem:[#allocation9 + $0x498] ss:$28 sps:$4 sm:$0xff]  }
 0x2c1   :  { %3126 = vmatpush1.bf16.msra.mxu1 %v7468_v8  ;;  %v7567_v8 = vld [vmem:[#allocation9 + $0x4a0] ss:$28 sps:$4 sm:$0xff]  }
 0x2c2   :  { %3127 = vmatprep.subr.bf16.mxu1 %v7476_v10  ;;  %v7572_v10 = vld [vmem:[#allocation9 + $0x4d4] ss:$28 sps:$4 sm:$0xff]  }
 0x2c5   :  { %3128 = vmatpush1.bf16.msra.mxu1 %v7474_v14  ;;  %v7573_v14 = vld [vmem:[#allocation9 + $0x4d8] ss:$28 sps:$4 sm:$0xff]  }
 0x2c6   :  { %3129 = vmatprep.subr.bf16.mxu1 %v7482_v16  ;;  %v7578_v16 = vld [vmem:[#allocation9 + $0x50c] ss:$28 sps:$4 sm:$0xff]  }
 0x2c9   :  { %3130 = vmatpush1.bf16.msra.mxu1 %v7480_v19  ;;  %v7579_v19 = vld [vmem:[#allocation9 + $0x510] ss:$28 sps:$4 sm:$0xff]  }
 0x2ca   :  { %3131 = vmatprep.subr.bf16.mxu1 %v7488_v20  ;;  %v7584_v20 = vld [vmem:[#allocation9 + $0x544] ss:$28 sps:$4 sm:$0xff]  }
 0x2cd   :  { %3132 = vmatpush1.bf16.msra.mxu1 %v7486_v22  ;;  %v7582_v22 = vld [vmem:[#allocation9 + $0x540] ss:$28 sps:$4 sm:$0xff]  }
 0x2ce   :  { %3133 = vmatprep.subr.bf16.mxu1 %v7494_v23  ;;  %v7585_v23 = vld [vmem:[#allocation9 + $0x548] ss:$28 sps:$4 sm:$0xff]  }
 0x2d1   :  { %3134 = vmatpush1.bf16.msra.mxu1 %v7492_v24  ;;  %v7590_v24 = vld [vmem:[#allocation9 + $0x57c] ss:$28 sps:$4 sm:$0xff]  }
 0x2d2   :  { %3135 = vmatprep.subr.bf16.mxu1 %v7500_v25  ;;  %v7593_v25 = vld [vmem:[#allocation9 + $0x584] ss:$28 sps:$4 sm:$0xff]  }
 0x2d5   :  { %3136 = vmatpush1.bf16.msra.mxu1 %v7498_v26  ;;  %v7588_v26 = vld [vmem:[#allocation9 + $0x578] ss:$28 sps:$4 sm:$0xff]  }
 0x2d6   :  { %3137 = vmatprep.subr.bf16.mxu1 %v7506_v27  ;;  %v7591_v27 = vld [vmem:[#allocation9 + $0x580] ss:$28 sps:$4 sm:$0xff]  }
 0x2d9   :  { %3138 = vmatpush1.bf16.msra.mxu1 %v7504_v28  ;;  %v7596_v28 = vld [vmem:[#allocation9 + $0x5b4] ss:$28 sps:$4 sm:$0xff]  }
 0x2da   :  { %3139 = vmatprep.subr.bf16.mxu1 %v7512_v29  ;;  %v7599_v29 = vld [vmem:[#allocation9 + $0x5bc] ss:$28 sps:$4 sm:$0xff]  }
 0x2dd   :  { %3140 = vmatpush1.bf16.msra.mxu1 %v7510_v30  ;;  %v7594_v30 = vld [vmem:[#allocation9 + $0x5b0] ss:$28 sps:$4 sm:$0xff]  }
 0x2de   :  { %3141 = vmatprep.subr.bf16.mxu1 %v7518_v31  ;;  %v7597_v31 = vld [vmem:[#allocation9 + $0x5b8] ss:$28 sps:$4 sm:$0xff]  }
 0x2e1   :  { %3142 = vmatpush1.bf16.msra.mxu1 %v7516_v32  ;;  %v7602_v32 = vld [vmem:[#allocation9 + $0x5ec] ss:$28 sps:$4 sm:$0xff]  }
 0x2e2   :  { %3143 = vmatprep.subr.bf16.mxu1 %v7524_v33  ;;  %v7605_v33 = vld [vmem:[#allocation9 + $0x5f4] ss:$28 sps:$4 sm:$0xff]  }
 0x2e5   :  { %3144 = vmatpush1.bf16.msra.mxu1 %v7522_v34  ;;  %v7600_v34 = vld [vmem:[#allocation9 + $0x5e8] ss:$28 sps:$4 sm:$0xff]  }
 0x2e6   :  { %3145 = vmatprep.subr.bf16.mxu1 %v7530_v35  ;;  %v7603_v35 = vld [vmem:[#allocation9 + $0x5f0] ss:$28 sps:$4 sm:$0xff]  }
 0x2e9   :  { %3146 = vmatpush1.bf16.msra.mxu1 %v7528_v36  ;;  %v7608_v36 = vld [vmem:[#allocation9 + $0x624] ss:$28 sps:$4 sm:$0xff]  }
 0x2ea   :  { %3156 = vmatprep.subr.bf16.mxu1 %v7536_v37  ;;  %v7611_v37 = vld [vmem:[#allocation9 + $0x62c] ss:$28 sps:$4 sm:$0xff]  }
 0x33f   :  { %v1614_v41 = vpop.f32.mrb[0].mxu1 }
 0x340   :  { %v1615_v42 = vadd.f32 %v1614_v41, %v1243_v39  ;;  %v1616_v43 = vpop.f32.mrb[1].mxu1  ;;  %v7606_v39 = vld [vmem:[#allocation9 + $0x620] ss:$28 sps:$4 sm:$0xff]  }
 0x341   :  { %v1617_v44 = vadd.f32 %v1616_v43, %v1247_v40  ;;  %v1618_v45 = vpop.f32.mrb[2].mxu1  ;;  %v7609_v40 = vld [vmem:[#allocation9 + $0x628] ss:$28 sps:$4 sm:$0xff]   ;;  %v7614_v41 = vld [vmem:[#allocation9 + $0x65c] ss:$28 sps:$4 sm:$0xff]   ;;  %v8533_v43 = vsub.s32 2, %v8498_v9 }
 0x342   :  { %v1662_v46 = vmax.f32 %v1615_v42, 0.0  ;;  %v1619_v47 = vpop.f32.mrb[3].mxu1  ;;  %v7617_v42 = vld [vmem:[#allocation9 + $0x664] ss:$28 sps:$4 sm:$0xff]  }
 0x343   :  { %v1663_v48 = vmax.f32 %v1617_v44, 0.0  ;;  %v7612_v44 = vld [vmem:[#allocation9 + $0x658] ss:$28 sps:$4 sm:$0xff]   ;;  %v7615_v45 = vld [vmem:[#allocation9 + $0x660] ss:$28 sps:$4 sm:$0xff]  }
 0x344   :  { %v8526_v52 = vpack.c.bf16 %v1662_v46, %v1662_v46  ;;  %v8536_v46 = vsub.s32 3, %v8498_v9  ;;  %v7620_v47 = vld [vmem:[#allocation9 + $0x694] ss:$28 sps:$4 sm:$0xff]  }
 0x345   :  { %v8524_v49 = vpack.c.bf16 %v1663_v48, %v1663_v48  ;;  %v7623_v48 = vld [vmem:[#allocation9 + $0x69c] ss:$28 sps:$4 sm:$0xff]  }
 0x347   :  { %3147 = vmatprep.mubr.bf16.mxu1 %v8524_v49  ;;  %3229 = vmatprep.mubr.bf16.mxu0 %v8524_v49 }
 0x348   :  { %3148 = vmatmul.mubr.bf16.vlgmr.msra.gmra.mrb[8].mxu1 %v8526_v52  ;;  %3230 = vmatmul.mubr.bf16.vlgmr.msra.gmra.mrb[4].mxu0 %v8526_v52 }
 0x349   :  { %3157 = vmatpush1.bf16.msra.mxu1 %v7534_v50  ;;  %3239 = vmatpush1.bf16.msra.mxu0 %v7537_v51  ;;  %v1251_v50 = vrot.slane %v8518_v38, %v8533_v43  ;;  %v1255_v51 = vrot.slane %v8518_v38, %v8536_v46  ;;  %v7632_v38 = vld [vmem:[#allocation9 + $0x14] ss:$28 sps:$4 sm:$0xff]  }
 0x34a   :  { %3158 = vmatprep.subr.bf16.mxu1 %v7542_v53  ;;  %3240 = vmatprep.subr.bf16.mxu0 %v7545_v54  ;;  %v7618_v53 = vld [vmem:[#allocation9 + $0x690] ss:$28 sps:$4 sm:$0xff]   ;;  %v7621_v54 = vld [vmem:[#allocation9 + $0x698] ss:$28 sps:$4 sm:$0xff]  }
 0x34d   :  { %3159 = vmatpush1.bf16.msra.mxu1 %v7540_v55  ;;  %3241 = vmatpush1.bf16.msra.mxu0 %v7543_v56  ;;  %v7626_v55 = vld [vmem:[#allocation9 + $0x6cc] ss:$28 sps:$4 sm:$0xff]   ;;  %v7629_v56 = vld [vmem:[#allocation9 + $0x6d4] ss:$28 sps:$4 sm:$0xff]  }
 0x34e   :  { %3160 = vmatprep.subr.bf16.mxu1 %v7548_v57  ;;  %3242 = vmatprep.subr.bf16.mxu0 %v7551_v58 }
 0x351   :  { %3161 = vmatpush1.bf16.msra.mxu1 %v7546_v59  ;;  %3243 = vmatpush1.bf16.msra.mxu0 %v7549_v60 }
 0x352   :  { %3162 = vmatprep.subr.bf16.mxu1 %v7554_v61  ;;  %3244 = vmatprep.subr.bf16.mxu0 %v7557_v62  ;;  %v7624_v62 = vld [vmem:[#allocation9 + $0x6c8] ss:$28 sps:$4 sm:$0xff]  }
 0x355   :  { %3163 = vmatpush1.bf16.msra.mxu1 %v7552_v63  ;;  %3245 = vmatpush1.bf16.msra.mxu0 %v7555_v0  ;;  %v7627_v63 = vld [vmem:[#allocation9 + $0x6d0] ss:$28 sps:$4 sm:$0xff]  }
 0x356   :  { %3164 = vmatprep.subr.bf16.mxu1 %v7560_v1  ;;  %3246 = vmatprep.subr.bf16.mxu0 %v7563_v2  ;;  %v7633_v2 = vld [vmem:[#allocation9 + $0x1d8] ss:$28 sps:$4 sm:$0xff]  }
 0x359   :  { %3165 = vmatpush1.bf16.msra.mxu1 %v7558_v3  ;;  %3247 = vmatpush1.bf16.msra.mxu0 %v7561_v4 }
 0x35a   :  { %3166 = vmatprep.subr.bf16.mxu1 %v7566_v5  ;;  %3248 = vmatprep.subr.bf16.mxu0 %v7569_v6  ;;  %v7630_v5 = vld [vmem:[#allocation9 + $0x10] ss:$28 sps:$4 sm:$0xff]  }
 0x35d   :  { %3167 = vmatpush1.bf16.msra.mxu1 %v7564_v7  ;;  %3249 = vmatpush1.bf16.msra.mxu0 %v7567_v8  ;;  %v7634_v7 = vld [vmem:[#allocation9 + $0x18] ss:$28 sps:$4 sm:$0xff]   ;;  %v7637_v8 = vld [vmem:[#allocation9 + $0x4c] ss:$28 sps:$4 sm:$0xff]  }
 0x35e   :  { %3168 = vmatprep.subr.bf16.mxu1 %v7572_v10  ;;  %3250 = vmatprep.subr.bf16.mxu0 %v7575_v11  ;;  %v7638_v10 = vld [vmem:[#allocation9 + $0x210] ss:$28 sps:$4 sm:$0xff]   ;;  %v7635_v11 = vld [vmem:[#allocation9 + $0x48] ss:$28 sps:$4 sm:$0xff]  }
 0x361   :  { %3169 = vmatpush1.bf16.msra.mxu1 %v7570_v13  ;;  %3251 = vmatpush1.bf16.msra.mxu0 %v7573_v14  ;;  %v7639_v13 = vld [vmem:[#allocation9 + $0x50] ss:$28 sps:$4 sm:$0xff]   ;;  %v7642_v14 = vld [vmem:[#allocation9 + $0x84] ss:$28 sps:$4 sm:$0xff]  }
 0x362   :  { %3170 = vmatprep.subr.bf16.mxu1 %v7578_v16  ;;  %3252 = vmatprep.subr.bf16.mxu0 %v7581_v17  ;;  %v7643_v16 = vld [vmem:[#allocation9 + $0x248] ss:$28 sps:$4 sm:$0xff]   ;;  %v7640_v17 = vld [vmem:[#allocation9 + $0x80] ss:$28 sps:$4 sm:$0xff]  }
 0x365   :  { %3171 = vmatpush1.bf16.msra.mxu1 %v7576_v18  ;;  %3253 = vmatpush1.bf16.msra.mxu0 %v7579_v19  ;;  %v7644_v18 = vld [vmem:[#allocation9 + $0x88] ss:$28 sps:$4 sm:$0xff]   ;;  %v7647_v19 = vld [vmem:[#allocation9 + $0xbc] ss:$28 sps:$4 sm:$0xff]  }
 0x366   :  { %3172 = vmatprep.subr.bf16.mxu1 %v7584_v20  ;;  %3254 = vmatprep.subr.bf16.mxu0 %v7587_v21  ;;  %v7648_v20 = vld [vmem:[#allocation9 + $0x280] ss:$28 sps:$4 sm:$0xff]   ;;  %v7645_v21 = vld [vmem:[#allocation9 + $0xb8] ss:$28 sps:$4 sm:$0xff]  }
 0x369   :  { %3173 = vmatpush1.bf16.msra.mxu1 %v7582_v22  ;;  %3255 = vmatpush1.bf16.msra.mxu0 %v7585_v23  ;;  %v7649_v22 = vld [vmem:[#allocation9 + $0xc0] ss:$28 sps:$4 sm:$0xff]   ;;  %v7652_v23 = vld [vmem:[#allocation9 + $0xf4] ss:$28 sps:$4 sm:$0xff]  }
 0x36a   :  { %3174 = vmatprep.subr.bf16.mxu1 %v7590_v24  ;;  %3256 = vmatprep.subr.bf16.mxu0 %v7593_v25  ;;  %v7650_v24 = vld [vmem:[#allocation9 + $0xf0] ss:$28 sps:$4 sm:$0xff]   ;;  %v7654_v25 = vld [vmem:[#allocation9 + $0xf8] ss:$28 sps:$4 sm:$0xff]  }
 0x36d   :  { %3175 = vmatpush1.bf16.msra.mxu1 %v7588_v26  ;;  %3257 = vmatpush1.bf16.msra.mxu0 %v7591_v27  ;;  %v7657_v26 = vld [vmem:[#allocation9 + $0x12c] ss:$28 sps:$4 sm:$0xff]  }
 0x36e   :  { %3176 = vmatprep.subr.bf16.mxu1 %v7596_v28  ;;  %3258 = vmatprep.subr.bf16.mxu0 %v7599_v29  ;;  %v7658_v27 = vld [vmem:[#allocation9 + $0x2f0] ss:$28 sps:$4 sm:$0xff]   ;;  %v7655_v28 = vld [vmem:[#allocation9 + $0x128] ss:$28 sps:$4 sm:$0xff]  }
 0x36f   :  { %v7659_v29 = vld [vmem:[#allocation9 + $0x130] ss:$28 sps:$4 sm:$0xff]  }
 0x371   :  { %3177 = vmatpush1.bf16.msra.mxu1 %v7594_v30  ;;  %3259 = vmatpush1.bf16.msra.mxu0 %v7597_v31  ;;  %v7662_v30 = vld [vmem:[#allocation9 + $0x164] ss:$28 sps:$4 sm:$0xff]  }
 0x372   :  { %3178 = vmatprep.subr.bf16.mxu1 %v7602_v32  ;;  %3260 = vmatprep.subr.bf16.mxu0 %v7605_v33  ;;  %v7663_v31 = vld [vmem:[#allocation9 + $0x328] ss:$28 sps:$4 sm:$0xff]   ;;  %v7660_v32 = vld [vmem:[#allocation9 + $0x160] ss:$28 sps:$4 sm:$0xff]  }
 0x373   :  { %v7664_v33 = vld [vmem:[#allocation9 + $0x168] ss:$28 sps:$4 sm:$0xff]  }
 0x375   :  { %3179 = vmatpush1.bf16.msra.mxu1 %v7600_v34  ;;  %3261 = vmatpush1.bf16.msra.mxu0 %v7603_v35  ;;  %v7667_v34 = vld [vmem:[#allocation9 + $0x19c] ss:$28 sps:$4 sm:$0xff]  }
 0x376   :  { %3180 = vmatprep.subr.bf16.mxu1 %v7608_v36  ;;  %3262 = vmatprep.subr.bf16.mxu0 %v7611_v37  ;;  %v7668_v35 = vld [vmem:[#allocation9 + $0x360] ss:$28 sps:$4 sm:$0xff]   ;;  %v7665_v36 = vld [vmem:[#allocation9 + $0x198] ss:$28 sps:$4 sm:$0xff]  }
 0x377   :  { %v7669_v37 = vld [vmem:[#allocation9 + $0x1a0] ss:$28 sps:$4 sm:$0xff]  }
 0x379   :  { %3181 = vmatpush1.bf16.msra.mxu1 %v7606_v39  ;;  %3263 = vmatpush1.bf16.msra.mxu0 %v7609_v40  ;;  %v7672_v39 = vld [vmem:[#allocation9 + $0x1d4] ss:$28 sps:$4 sm:$0xff]   ;;  %v7758_v40 = vld [vmem:[#allocation10 + $0x4] ss:$8 sps:$4 sm:$0xff]  }
 0x37a   :  { %3182 = vmatprep.subr.bf16.mxu1 %v7614_v41  ;;  %3264 = vmatprep.subr.bf16.mxu0 %v7617_v42  ;;  %v7670_v41 = vld [vmem:[#allocation9 + $0x1d0] ss:$28 sps:$4 sm:$0xff]  }
 0x37b   :  { %v7675_v42 = vld [vmem:[#allocation9 + $0x20c] ss:$28 sps:$4 sm:$0xff]  }
 0x37d   :  { %3183 = vmatpush1.bf16.msra.mxu1 %v7612_v44  ;;  %3265 = vmatpush1.bf16.msra.mxu0 %v7615_v45  ;;  %v7756_v44 = vld [vmem:[#allocation10] ss:$8 sps:$4 sm:$0xff]   ;;  %v7763_v45 = vld [vmem:[#allocation10 + $0x14] ss:$8 sps:$4 sm:$0xff]  }
 0x37e   :  { %3184 = vmatprep.subr.bf16.mxu1 %v7620_v47  ;;  %3266 = vmatprep.subr.bf16.mxu0 %v7623_v48  ;;  %v7673_v47 = vld [vmem:[#allocation9 + $0x208] ss:$28 sps:$4 sm:$0xff]  }
 0x37f   :  { %v1655_v57 = vpop.f32.mrb[4].mxu1  ;;  %v7678_v48 = vld [vmem:[#allocation9 + $0x244] ss:$28 sps:$4 sm:$0xff]  }
 0x380   :  { %v1656_v58 = vadd.f32 %v1655_v57, %v1251_v50  ;;  %v1657_v59 = vpop.f32.mrb[5].mxu1  ;;  %v7761_v50 = vld [vmem:[#allocation10 + $0x10] ss:$8 sps:$4 sm:$0xff]  }
 0x381   :  { %v1658_v60 = vadd.f32 %v1657_v59, %v1255_v51  ;;  %v1659_v61 = vpop.f32.mrb[6].mxu1  ;;  %3185 = vmatpush1.bf16.msra.mxu1 %v7618_v53  ;;  %3267 = vmatpush1.bf16.msra.mxu0 %v7621_v54  ;;  %v7766_v51 = vld [vmem:[#allocation10 + $0x24] ss:$8 sps:$4 sm:$0xff]   ;;  %v7676_v53 = vld [vmem:[#allocation9 + $0x240] ss:$28 sps:$4 sm:$0xff]  }
 0x382   :  { %v1664_v0 = vmax.f32 %v1656_v58, 0.0  ;;  %v1660_v1 = vpop.f32.mrb[7].mxu1  ;;  %3186 = vmatprep.subr.bf16.mxu1 %v7626_v55  ;;  %3268 = vmatprep.subr.bf16.mxu0 %v7629_v56  ;;  %v7681_v54 = vld [vmem:[#allocation9 + $0x27c] ss:$28 sps:$4 sm:$0xff]   ;;  %v7764_v55 = vld [vmem:[#allocation10 + $0x20] ss:$8 sps:$4 sm:$0xff]  }
 0x383   :  { %v1665_v3 = vmax.f32 %v1658_v60, 0.0  ;;  %v7769_v56 = vld [vmem:[#allocation10 + $0x34] ss:$8 sps:$4 sm:$0xff]   ;;  %v7767_v59 = vld [vmem:[#allocation10 + $0x30] ss:$8 sps:$4 sm:$0xff]  }
 0x384   :  { %v8544_v6 = vpack.c.bf16 %v1664_v0, %v1664_v0  ;;  %v7679_v57 = vld [vmem:[#allocation9 + $0x278] ss:$28 sps:$4 sm:$0xff]   ;;  %v7772_v60 = vld [vmem:[#allocation10 + $0x44] ss:$8 sps:$4 sm:$0xff]  }
 0x385   :  { %v8542_v4 = vpack.c.bf16 %v1665_v3, %v1665_v3  ;;  %3187 = vmatpush1.bf16.msra.mxu1 %v7624_v62  ;;  %3269 = vmatpush1.bf16.msra.mxu0 %v7627_v63  ;;  %v7684_v58 = vld [vmem:[#allocation9 + $0x2b4] ss:$28 sps:$4 sm:$0xff]   ;;  %v7687_v62 = vld [vmem:[#allocation9 + $0x2ec] ss:$28 sps:$4 sm:$0xff]  }
 0x386   :  { %3279 = vmatprep.subr.bf16.mxu1 %v7632_v38  ;;  %6971 = vmatprep.subr.bf16.mxu0 %v7633_v2  ;;  %v7682_v61 = vld [vmem:[#allocation9 + $0x2b0] ss:$28 sps:$4 sm:$0xff]   ;;  %v7770_v63 = vld [vmem:[#allocation10 + $0x40] ss:$8 sps:$4 sm:$0xff]   ;;  %v7775_v0 = vld [vmem:[#allocation10 + $0x54] ss:$8 sps:$4 sm:$0xff]  }
 0x387   :  { %3188 = vmatprep.mubr.bf16.mxu1 %v8542_v4  ;;  %3270 = vmatprep.mubr.bf16.mxu0 %v8542_v4  ;;  %v7685_v1 = vld [vmem:[#allocation9 + $0x2e8] ss:$28 sps:$4 sm:$0xff]   ;;  %v7773_v2 = vld [vmem:[#allocation10 + $0x50] ss:$8 sps:$4 sm:$0xff]  }
 0x388   :  { %3189 = vmatmul.mubr.bf16.vlgmr.msra.gmra.mrb[8].mxu1 %v8544_v6  ;;  %3271 = vmatmul.mubr.bf16.vlgmr.msra.gmra.mrb[4].mxu0 %v8544_v6  ;;  %v7690_v38 = vld [vmem:[#allocation9 + $0x324] ss:$28 sps:$4 sm:$0xff]  }
 0x389   :  { %3280 = vmatpush1.bf16.msra.mxu1 %v7630_v5  ;;  %3311 = vmatprep.mubr.bf16.mxu1 %v8524_v49  ;;  %v7778_v3 = vld [vmem:[#allocation10 + $0x64] ss:$8 sps:$4 sm:$0xff]   ;;  %v7688_v5 = vld [vmem:[#allocation9 + $0x320] ss:$28 sps:$4 sm:$0xff]  }
 0x38a   :  { %6972 = vmatpush3.bf16.msra.mxu0 %v7634_v7  ;;  %3393 = vmatprep.mubr.bf16.mxu0 %v8524_v49  ;;  %v7653_v49 = vld [vmem:[#allocation9 + $0x2b8] ss:$28 sps:$4 sm:$0xff]  }
 0x38b   :  { %3281 = vmatprep.subr.bf16.mxu1 %v7637_v8  ;;  %6973 = vmatprep.subr.bf16.mxu0 %v7638_v10  ;;  %v7693_v7 = vld [vmem:[#allocation9 + $0x35c] ss:$28 sps:$4 sm:$0xff]   ;;  %v7776_v8 = vld [vmem:[#allocation10 + $0x60] ss:$8 sps:$4 sm:$0xff]  }
 0x38c   :  { %v7781_v10 = vld [vmem:[#allocation10 + $0x74] ss:$8 sps:$4 sm:$0xff]  }
 0x38d   :  { %3282 = vmatpush1.bf16.msra.mxu1 %v7635_v11  ;;  %v7691_v11 = vld [vmem:[#allocation9 + $0x358] ss:$28 sps:$4 sm:$0xff]  }
 0x38e   :  { %6974 = vmatpush3.bf16.msra.mxu0 %v7639_v13  ;;  %3283 = vmatprep.subr.bf16.mxu1 %v7642_v14  ;;  %v7696_v13 = vld [vmem:[#allocation9 + $0x394] ss:$28 sps:$4 sm:$0xff]  }
 0x38f   :  { %6975 = vmatprep.subr.bf16.mxu0 %v7643_v16  ;;  %v7779_v14 = vld [vmem:[#allocation10 + $0x70] ss:$8 sps:$4 sm:$0xff]   ;;  %v7784_v16 = vld [vmem:[#allocation10 + $0x84] ss:$8 sps:$4 sm:$0xff]  }
 0x391   :  { %3284 = vmatpush1.bf16.msra.mxu1 %v7640_v17  ;;  %v7694_v17 = vld [vmem:[#allocation9 + $0x390] ss:$28 sps:$4 sm:$0xff]  }
 0x392   :  { %6976 = vmatpush3.bf16.msra.mxu0 %v7644_v18  ;;  %3285 = vmatprep.subr.bf16.mxu1 %v7647_v19  ;;  %v7699_v18 = vld [vmem:[#allocation9 + $0x3cc] ss:$28 sps:$4 sm:$0xff]  }
 0x393   :  { %6977 = vmatprep.subr.bf16.mxu0 %v7648_v20  ;;  %v7782_v19 = vld [vmem:[#allocation10 + $0x80] ss:$8 sps:$4 sm:$0xff]   ;;  %v7787_v20 = vld [vmem:[#allocation10 + $0x94] ss:$8 sps:$4 sm:$0xff]  }
 0x395   :  { %3286 = vmatpush1.bf16.msra.mxu1 %v7645_v21  ;;  %v7697_v21 = vld [vmem:[#allocation9 + $0x3c8] ss:$28 sps:$4 sm:$0xff]  }
 0x396   :  { %6978 = vmatpush3.bf16.msra.mxu0 %v7649_v22  ;;  %3287 = vmatprep.subr.bf16.mxu1 %v7652_v23  ;;  %v7702_v22 = vld [vmem:[#allocation9 + $0x404] ss:$28 sps:$4 sm:$0xff]   ;;  %v7785_v23 = vld [vmem:[#allocation10 + $0x90] ss:$8 sps:$4 sm:$0xff]  }
 0x397   :  { %6979 = vmatprep.subr.bf16.mxu0 %v7653_v49  ;;  %v7790_v49 = vld [vmem:[#allocation10 + $0xa4] ss:$8 sps:$4 sm:$0xff]  }
 0x399   :  { %3288 = vmatpush1.bf16.msra.mxu1 %v7650_v24  ;;  %v7700_v24 = vld [vmem:[#allocation9 + $0x400] ss:$28 sps:$4 sm:$0xff]  }
 0x39a   :  { %6980 = vmatpush3.bf16.msra.mxu0 %v7654_v25  ;;  %3289 = vmatprep.subr.bf16.mxu1 %v7657_v26  ;;  %v7705_v25 = vld [vmem:[#allocation9 + $0x43c] ss:$28 sps:$4 sm:$0xff]   ;;  %v7788_v26 = vld [vmem:[#allocation10 + $0xa0] ss:$8 sps:$4 sm:$0xff]  }
 0x39b   :  { %6981 = vmatprep.subr.bf16.mxu0 %v7658_v27  ;;  %v7793_v27 = vld [vmem:[#allocation10 + $0xb4] ss:$8 sps:$4 sm:$0xff]  }
 0x39d   :  { %3290 = vmatpush1.bf16.msra.mxu1 %v7655_v28  ;;  %v7708_v28 = vld [vmem:[#allocation9 + $0x474] ss:$28 sps:$4 sm:$0xff]  }
 0x39e   :  { %6982 = vmatpush3.bf16.msra.mxu0 %v7659_v29  ;;  %3291 = vmatprep.subr.bf16.mxu1 %v7662_v30  ;;  %v7791_v29 = vld [vmem:[#allocation10 + $0xb0] ss:$8 sps:$4 sm:$0xff]   ;;  %v7796_v30 = vld [vmem:[#allocation10 + $0xc4] ss:$8 sps:$4 sm:$0xff]  }
 0x39f   :  { %6983 = vmatprep.subr.bf16.mxu0 %v7663_v31  ;;  %v7706_v31 = vld [vmem:[#allocation9 + $0x470] ss:$28 sps:$4 sm:$0xff]  }
 0x3a1   :  { %3292 = vmatpush1.bf16.msra.mxu1 %v7660_v32  ;;  %v7711_v32 = vld [vmem:[#allocation9 + $0x4ac] ss:$28 sps:$4 sm:$0xff]  }
 0x3a2   :  { %6984 = vmatpush3.bf16.msra.mxu0 %v7664_v33  ;;  %3293 = vmatprep.subr.bf16.mxu1 %v7667_v34  ;;  %v7794_v33 = vld [vmem:[#allocation10 + $0xc0] ss:$8 sps:$4 sm:$0xff]   ;;  %v7799_v34 = vld [vmem:[#allocation10 + $0xd4] ss:$8 sps:$4 sm:$0xff]  }
 0x3a3   :  { %6985 = vmatprep.subr.bf16.mxu0 %v7668_v35  ;;  %v7709_v35 = vld [vmem:[#allocation9 + $0x4a8] ss:$28 sps:$4 sm:$0xff]  }
 0x3a5   :  { %3294 = vmatpush1.bf16.msra.mxu1 %v7665_v36  ;;  %v7714_v36 = vld [vmem:[#allocation9 + $0x4e4] ss:$28 sps:$4 sm:$0xff]  }
 0x3a6   :  { %6986 = vmatpush3.bf16.msra.mxu0 %v7669_v37  ;;  %3295 = vmatprep.subr.bf16.mxu1 %v7672_v39  ;;  %v7797_v37 = vld [vmem:[#allocation10 + $0xd0] ss:$8 sps:$4 sm:$0xff]   ;;  %v7802_v39 = vld [vmem:[#allocation10 + $0xe4] ss:$8 sps:$4 sm:$0xff]  }
 0x3a7   :  { %4139 = vmatprep.subr.bf16.mxu0 %v7758_v40  ;;  %v7712_v40 = vld [vmem:[#allocation9 + $0x4e0] ss:$28 sps:$4 sm:$0xff]  }
 0x3a9   :  { %3394 = vmatmul.mubr.bf16.vlgmr.msra.gmra.mrb[8].mxu0 %v8526_v52  ;;  %3296 = vmatpush1.bf16.msra.mxu1 %v7670_v41  ;;  %v7717_v41 = vld [vmem:[#allocation9 + $0x51c] ss:$28 sps:$4 sm:$0xff]  }
 0x3aa   :  { %3297 = vmatprep.subr.bf16.mxu1 %v7675_v42  ;;  %4140 = vmatpush1.bf16.msra.mxu0 %v7756_v44  ;;  %v7800_v42 = vld [vmem:[#allocation10 + $0xe0] ss:$8 sps:$4 sm:$0xff]   ;;  %v7805_v44 = vld [vmem:[#allocation10 + $0xf4] ss:$8 sps:$4 sm:$0xff]  }
 0x3ab   :  { %4141 = vmatprep.subr.bf16.mxu0 %v7763_v45  ;;  %v7715_v45 = vld [vmem:[#allocation9 + $0x518] ss:$28 sps:$4 sm:$0xff]  }
 0x3ad   :  { %3298 = vmatpush1.bf16.msra.mxu1 %v7673_v47  ;;  %v7720_v47 = vld [vmem:[#allocation9 + $0x554] ss:$28 sps:$4 sm:$0xff]  }
 0x3ae   :  { %3299 = vmatprep.subr.bf16.mxu1 %v7678_v48  ;;  %4142 = vmatpush1.bf16.msra.mxu0 %v7761_v50  ;;  %v7803_v48 = vld [vmem:[#allocation10 + $0xf0] ss:$8 sps:$4 sm:$0xff]   ;;  %v7808_v50 = vld [vmem:[#allocation10 + $0x104] ss:$8 sps:$4 sm:$0xff]  }
 0x3af   :  { %4143 = vmatprep.subr.bf16.mxu0 %v7766_v51  ;;  %v7718_v51 = vld [vmem:[#allocation9 + $0x550] ss:$28 sps:$4 sm:$0xff]  }
 0x3b1   :  { %3300 = vmatpush1.bf16.msra.mxu1 %v7676_v53  ;;  %v7723_v53 = vld [vmem:[#allocation9 + $0x58c] ss:$28 sps:$4 sm:$0xff]  }
 0x3b2   :  { %3301 = vmatprep.subr.bf16.mxu1 %v7681_v54  ;;  %4144 = vmatpush1.bf16.msra.mxu0 %v7764_v55  ;;  %v7721_v54 = vld [vmem:[#allocation9 + $0x588] ss:$28 sps:$4 sm:$0xff]  }
 0x3b3   :  { %4145 = vmatprep.subr.bf16.mxu0 %v7769_v56  ;;  %v7726_v55 = vld [vmem:[#allocation9 + $0x5c4] ss:$28 sps:$4 sm:$0xff]  }
 0x3b4   :  { %v7724_v56 = vld [vmem:[#allocation9 + $0x5c0] ss:$28 sps:$4 sm:$0xff]  }
 0x3b5   :  { %3302 = vmatpush1.bf16.msra.mxu1 %v7679_v57  ;;  %v7729_v57 = vld [vmem:[#allocation9 + $0x5fc] ss:$28 sps:$4 sm:$0xff]  }
 0x3b6   :  { %3303 = vmatprep.subr.bf16.mxu1 %v7684_v58  ;;  %4146 = vmatpush1.bf16.msra.mxu0 %v7767_v59  ;;  %v7727_v58 = vld [vmem:[#allocation9 + $0x5f8] ss:$28 sps:$4 sm:$0xff]  }
 0x3b7   :  { %4147 = vmatprep.subr.bf16.mxu0 %v7772_v60  ;;  %v7732_v59 = vld [vmem:[#allocation9 + $0x634] ss:$28 sps:$4 sm:$0xff]  }
 0x3b8   :  { %v7730_v60 = vld [vmem:[#allocation9 + $0x630] ss:$28 sps:$4 sm:$0xff]  }
 0x3b9   :  { %3304 = vmatpush1.bf16.msra.mxu1 %v7682_v61  ;;  %v7735_v61 = vld [vmem:[#allocation9 + $0x66c] ss:$28 sps:$4 sm:$0xff]  }
 0x3ba   :  { %3305 = vmatprep.subr.bf16.mxu1 %v7687_v62  ;;  %4148 = vmatpush1.bf16.msra.mxu0 %v7770_v63  ;;  %v7733_v62 = vld [vmem:[#allocation9 + $0x668] ss:$28 sps:$4 sm:$0xff]  }
 0x3bb   :  { %4149 = vmatprep.subr.bf16.mxu0 %v7775_v0  ;;  %v7738_v63 = vld [vmem:[#allocation9 + $0x6a4] ss:$28 sps:$4 sm:$0xff]  }
 0x3bc   :  { %v7736_v0 = vld [vmem:[#allocation9 + $0x6a0] ss:$28 sps:$4 sm:$0xff]  }
 0x3bd   :  { %3306 = vmatpush1.bf16.msra.mxu1 %v7685_v1  ;;  %v7741_v1 = vld [vmem:[#allocation9 + $0x6dc] ss:$28 sps:$4 sm:$0xff]  }
 0x3be   :  { %3307 = vmatprep.subr.bf16.mxu1 %v7690_v38  ;;  %4150 = vmatpush1.bf16.msra.mxu0 %v7773_v2  ;;  %v7739_v38 = vld [vmem:[#allocation9 + $0x6d8] ss:$28 sps:$4 sm:$0xff]  }
 0x3bf   :  { %4151 = vmatprep.subr.bf16.mxu0 %v7778_v3  ;;  %v7742_v2 = vld [vmem:[#allocation9 + $0x558] ss:$28 sps:$4 sm:$0xff]  }
 0x3c0   :  { %v7743_v3 = vld [vmem:[#allocation9 + $0x398] ss:$28 sps:$4 sm:$0xff]  }
 0x3c1   :  { %3308 = vmatpush1.bf16.msra.mxu1 %v7688_v5  ;;  %v7744_v5 = vld [vmem:[#allocation9 + $0x590] ss:$28 sps:$4 sm:$0xff]  }
 0x3c2   :  { %3309 = vmatprep.subr.bf16.mxu1 %v7693_v7  ;;  %4152 = vmatpush1.bf16.msra.mxu0 %v7776_v8  ;;  %v7745_v7 = vld [vmem:[#allocation9 + $0x3d0] ss:$28 sps:$4 sm:$0xff]   ;;  %v7746_v8 = vld [vmem:[#allocation9 + $0x5c8] ss:$28 sps:$4 sm:$0xff]  }
 0x3c3   :  { %4153 = vmatprep.subr.bf16.mxu0 %v7781_v10  ;;  %v7747_v10 = vld [vmem:[#allocation9 + $0x408] ss:$28 sps:$4 sm:$0xff]  }
 0x3c5   :  { %3310 = vmatpush1.bf16.msra.mxu1 %v7691_v11  ;;  %v7748_v11 = vld [vmem:[#allocation9 + $0x600] ss:$28 sps:$4 sm:$0xff]  }
 0x3c6   :  { %3320 = vmatprep.subr.bf16.mxu1 %v7696_v13  ;;  %4154 = vmatpush1.bf16.msra.mxu0 %v7779_v14  ;;  %v7749_v13 = vld [vmem:[#allocation9 + $0x440] ss:$28 sps:$4 sm:$0xff]   ;;  %v7750_v14 = vld [vmem:[#allocation9 + $0x638] ss:$28 sps:$4 sm:$0xff]  }
 0x3c7   :  { %4155 = vmatprep.subr.bf16.mxu0 %v7784_v16  ;;  %v7751_v16 = vld [vmem:[#allocation9 + $0x478] ss:$28 sps:$4 sm:$0xff]  }
 0x3c8   :  { %3312 = vmatmul.mubr.bf16.vlgmr.msra.gmra.mrb[12].mxu1 %v8526_v52  ;;  %v7703_v52 = vld [vmem:[#allocation9 + $0x438] ss:$28 sps:$4 sm:$0xff]  }
 0x3c9   :  { %3321 = vmatpush1.bf16.msra.mxu1 %v7694_v17  ;;  %3352 = vmatprep.mubr.bf16.mxu1 %v8542_v4  ;;  %v7752_v17 = vld [vmem:[#allocation9 + $0x670] ss:$28 sps:$4 sm:$0xff]  }
 0x3ca   :  { %3322 = vmatprep.subr.bf16.mxu1 %v7699_v18  ;;  %4156 = vmatpush1.bf16.msra.mxu0 %v7782_v19  ;;  %v7753_v18 = vld [vmem:[#allocation9 + $0x4b0] ss:$28 sps:$4 sm:$0xff]   ;;  %v7754_v19 = vld [vmem:[#allocation9 + $0x6a8] ss:$28 sps:$4 sm:$0xff]  }
 0x3cb   :  { %4157 = vmatprep.subr.bf16.mxu0 %v7787_v20  ;;  %v7759_v20 = vld [vmem:[#allocation9 + $0x6e0] ss:$28 sps:$4 sm:$0xff]  }
 0x3cd   :  { %3323 = vmatpush1.bf16.msra.mxu1 %v7697_v21  ;;  %v7760_v21 = vld [vmem:[#allocation9 + $0x520] ss:$28 sps:$4 sm:$0xff]  }
 0x3ce   :  { %3324 = vmatprep.subr.bf16.mxu1 %v7702_v22  ;;  %4158 = vmatpush1.bf16.msra.mxu0 %v7785_v23  ;;  %v8561_v22 = vld [vmem:[%s8753_s7] sm:$0xff] }
 0x3cf   :  { %4159 = vmatprep.subr.bf16.mxu0 %v7790_v49  ;;  %v1931_v23 = vrot.slane %v8561_v22, %v8501_v12  ;;  %v1935_v49 = vrot.slane %v8561_v22, %v8507_v15 }
 0x3d1   :  { %3325 = vmatpush1.bf16.msra.mxu1 %v7700_v24  ;;  %v1943_v24 = vrot.slane %v8561_v22, %v8536_v46 }
 0x3d2   :  { %3326 = vmatprep.subr.bf16.mxu1 %v7705_v25  ;;  %4160 = vmatpush1.bf16.msra.mxu0 %v7788_v26 }
 0x3d3   :  { %4161 = vmatprep.subr.bf16.mxu0 %v7793_v27 }
 0x3d5   :  { %3327 = vmatpush1.bf16.msra.mxu1 %v7703_v52 }
 0x3d6   :  { %3328 = vmatprep.subr.bf16.mxu1 %v7708_v28  ;;  %4162 = vmatpush1.bf16.msra.mxu0 %v7791_v29 }
 0x3d7   :  { %4163 = vmatprep.subr.bf16.mxu0 %v7796_v30 }
 0x3d9   :  { %3329 = vmatpush1.bf16.msra.mxu1 %v7706_v31 }
 0x3da   :  { %3330 = vmatprep.subr.bf16.mxu1 %v7711_v32  ;;  %4164 = vmatpush1.bf16.msra.mxu0 %v7794_v33 }
 0x3db   :  { %4165 = vmatprep.subr.bf16.mxu0 %v7799_v34 }
 0x3dd   :  { %3331 = vmatpush1.bf16.msra.mxu1 %v7709_v35 }
 0x3de   :  { %3332 = vmatprep.subr.bf16.mxu1 %v7714_v36  ;;  %4166 = vmatpush1.bf16.msra.mxu0 %v7797_v37 }
 0x3df   :  { %4167 = vmatprep.subr.bf16.mxu0 %v7802_v39  ;;  %v7806_v39 = vld [vmem:[#allocation10 + $0x100] ss:$8 sps:$4 sm:$0xff]  }
 0x3e1   :  { %3333 = vmatpush1.bf16.msra.mxu1 %v7712_v40 }
 0x3e2   :  { %3334 = vmatprep.subr.bf16.mxu1 %v7717_v41  ;;  %4168 = vmatpush1.bf16.msra.mxu0 %v7800_v42  ;;  %v7811_v41 = vld [vmem:[#allocation10 + $0x114] ss:$8 sps:$4 sm:$0xff]  }
 0x3e3   :  { %4169 = vmatprep.subr.bf16.mxu0 %v7805_v44  ;;  %v7809_v44 = vld [vmem:[#allocation10 + $0x110] ss:$8 sps:$4 sm:$0xff]  }
 0x3e5   :  { %3335 = vmatpush1.bf16.msra.mxu1 %v7715_v45  ;;  %v7814_v45 = vld [vmem:[#allocation10 + $0x124] ss:$8 sps:$4 sm:$0xff]  }
 0x3e6   :  { %3336 = vmatprep.subr.bf16.mxu1 %v7720_v47  ;;  %4170 = vmatpush1.bf16.msra.mxu0 %v7803_v48  ;;  %v7812_v47 = vld [vmem:[#allocation10 + $0x120] ss:$8 sps:$4 sm:$0xff]   ;;  %v7817_v48 = vld [vmem:[#allocation10 + $0x134] ss:$8 sps:$4 sm:$0xff]  }
 0x3e7   :  { %4180 = vmatprep.subr.bf16.mxu0 %v7808_v50  ;;  %v7815_v50 = vld [vmem:[#allocation10 + $0x130] ss:$8 sps:$4 sm:$0xff]  }
 0x3e9   :  { %3337 = vmatpush1.bf16.msra.mxu1 %v7718_v51  ;;  %v7820_v51 = vld [vmem:[#allocation10 + $0x144] ss:$8 sps:$4 sm:$0xff]  }
 0x3ea   :  { %3338 = vmatprep.subr.bf16.mxu1 %v7723_v53  ;;  %v7818_v53 = vld [vmem:[#allocation10 + $0x140] ss:$8 sps:$4 sm:$0xff]  }
 0x3ed   :  { %3339 = vmatpush1.bf16.msra.mxu1 %v7721_v54  ;;  %v7823_v54 = vld [vmem:[#allocation10 + $0x154] ss:$8 sps:$4 sm:$0xff]  }
 0x3ee   :  { %3340 = vmatprep.subr.bf16.mxu1 %v7726_v55  ;;  %v7821_v55 = vld [vmem:[#allocation10 + $0x150] ss:$8 sps:$4 sm:$0xff]  }
 0x3f1   :  { %3341 = vmatpush1.bf16.msra.mxu1 %v7724_v56  ;;  %v7826_v56 = vld [vmem:[#allocation10 + $0x164] ss:$8 sps:$4 sm:$0xff]  }
 0x3f2   :  { %3342 = vmatprep.subr.bf16.mxu1 %v7729_v57  ;;  %v7824_v57 = vld [vmem:[#allocation10 + $0x160] ss:$8 sps:$4 sm:$0xff]  }
 0x3f5   :  { %3343 = vmatpush1.bf16.msra.mxu1 %v7727_v58  ;;  %v7829_v58 = vld [vmem:[#allocation10 + $0x174] ss:$8 sps:$4 sm:$0xff]  }
 0x3f6   :  { %3344 = vmatprep.subr.bf16.mxu1 %v7732_v59 }
 0x3f9   :  { %3345 = vmatpush1.bf16.msra.mxu1 %v7730_v60 }
 0x3fa   :  { %3346 = vmatprep.subr.bf16.mxu1 %v7735_v61  ;;  %v7827_v61 = vld [vmem:[#allocation10 + $0x170] ss:$8 sps:$4 sm:$0xff]  }
 0x3fd   :  { %3347 = vmatpush1.bf16.msra.mxu1 %v7733_v62 }
 0x3fe   :  { %3348 = vmatprep.subr.bf16.mxu1 %v7738_v63 }
 0x401   :  { %3349 = vmatpush1.bf16.msra.mxu1 %v7736_v0  ;;  %v7832_v0 = vld [vmem:[#allocation10 + $0x184] ss:$8 sps:$4 sm:$0xff]  }
 0x402   :  { %3350 = vmatprep.subr.bf16.mxu1 %v7741_v1 }
 0x405   :  { %3351 = vmatpush1.bf16.msra.mxu1 %v7739_v38  ;;  %v7830_v38 = vld [vmem:[#allocation10 + $0x180] ss:$8 sps:$4 sm:$0xff]  }
 0x406   :  { %6993 = vmatprep.subr.bf16.mxu1 %v7742_v2  ;;  %v7835_v2 = vld [vmem:[#allocation10 + $0x194] ss:$8 sps:$4 sm:$0xff]  }
 0x408   :  { %3353 = vmatmul.mubr.bf16.vlgmr.msra.gmra.mrb[12].mxu1 %v8544_v6 }
 0x409   :  { %6994 = vmatpush3.bf16.msra.mxu1 %v7743_v3  ;;  %3433 = vmatprep.mubr.bf16.mxu1 %v8542_v4  ;;  %v7755_v4 = vld [vmem:[#allocation9 + $0x4e8] ss:$28 sps:$4 sm:$0xff]   ;;  %v8271_v3 = vmov 0  }
 0x40a   :  { %6995 = vmatprep.subr.bf16.mxu1 %v7744_v5  ;;  %v7833_v5 = vld [vmem:[#allocation10 + $0x190] ss:$8 sps:$4 sm:$0xff]  }
 0x40d   :  { %6996 = vmatpush3.bf16.msra.mxu1 %v7745_v7  ;;  %v7926_v7 = vld [vmem:[#allocation12] ss:$28 sps:$4 sm:$0xff]  }
 0x40e   :  { %6997 = vmatprep.subr.bf16.mxu1 %v7746_v8  ;;  %v7928_v8 = vld [vmem:[#allocation12 + $0x4] ss:$28 sps:$4 sm:$0xff]  }
 0x411   :  { %6998 = vmatpush3.bf16.msra.mxu1 %v7747_v10  ;;  %v7838_v10 = vld [vmem:[#allocation10 + $0x1a4] ss:$8 sps:$4 sm:$0xff]  }
 0x412   :  { %6999 = vmatprep.subr.bf16.mxu1 %v7748_v11  ;;  %v7931_v11 = vld [vmem:[#allocation12 + $0x3c] ss:$28 sps:$4 sm:$0xff]  }
 0x415   :  { %7000 = vmatpush3.bf16.msra.mxu1 %v7749_v13  ;;  %v7929_v13 = vld [vmem:[#allocation12 + $0x38] ss:$28 sps:$4 sm:$0xff]  }
 0x416   :  { %7001 = vmatprep.subr.bf16.mxu1 %v7750_v14  ;;  %v7836_v14 = vld [vmem:[#allocation10 + $0x1a0] ss:$8 sps:$4 sm:$0xff]  }
 0x419   :  { %7002 = vmatpush3.bf16.msra.mxu1 %v7751_v16  ;;  %v7841_v16 = vld [vmem:[#allocation10 + $0x1b4] ss:$8 sps:$4 sm:$0xff]  }
 0x41a   :  { %7003 = vmatprep.subr.bf16.mxu1 %v7752_v17  ;;  %v7839_v17 = vld [vmem:[#allocation10 + $0x1b0] ss:$8 sps:$4 sm:$0xff]  }
 0x41d   :  { %7004 = vmatpush3.bf16.msra.mxu1 %v7753_v18  ;;  %v7844_v18 = vld [vmem:[#allocation10 + $0x1c4] ss:$8 sps:$4 sm:$0xff]  }
 0x41e   :  { %7005 = vmatprep.subr.bf16.mxu1 %v7754_v19  ;;  %v7842_v19 = vld [vmem:[#allocation10 + $0x1c0] ss:$8 sps:$4 sm:$0xff]  }
 0x421   :  { %7006 = vmatpush3.bf16.msra.mxu1 %v7755_v4  ;;  %v7847_v4 = vld [vmem:[#allocation10 + $0x1d4] ss:$8 sps:$4 sm:$0xff]  }
 0x422   :  { %7007 = vmatprep.subr.bf16.mxu1 %v7759_v20  ;;  %v7845_v20 = vld [vmem:[#allocation10 + $0x1d0] ss:$8 sps:$4 sm:$0xff]  }
 0x425   :  { %7008 = vmatpush3.bf16.msra.mxu1 %v7760_v21  ;;  %v1939_v21 = vrot.slane %v8561_v22, %v8533_v43 }
 0x426   :  { %4699 = vmatprep.subr.bf16.mxu1 %v7928_v8 }
 0x428   :  { %3434 = vmatmul.mubr.bf16.vlgmr.msra.gmra.mrb[16].mxu1 %v8544_v6 }
 0x429   :  { %4731 = vmatprep.mubr.bf16.mxu1 %v8271_v3  ;;  %4700 = vmatpush1.bf16.msra.mxu1 %v7926_v7 }
 0x42a   :  { %4701 = vmatprep.subr.bf16.mxu1 %v7931_v11 }
 0x42d   :  { %4702 = vmatpush1.bf16.msra.mxu1 %v7929_v13  ;;  %v7899_v13 = vld [vmem:[#allocation10 + $0x2f0] ss:$8 sps:$4 sm:$0xff]  }
 0x45b   :  { %v3190_v25 = vpop.f32.mrb[8].mxu1  ;;  %v8569_v26 = vpop.f32.mrb[4].mxu0 }
 0x45c   :  { %v7046_v27 = vadd.f32 %v3190_v25, %v1931_v23  ;;  %v3192_v52 = vpop.f32.mrb[9].mxu1  ;;  %v3274_v6 = vpop.f32.mrb[5].mxu0  ;;  %v7850_v23 = vld [vmem:[#allocation10 + $0x1e4] ss:$8 sps:$4 sm:$0xff]   ;;  %v7853_v25 = vld [vmem:[#allocation10 + $0x1f4] ss:$8 sps:$4 sm:$0xff]  }
 0x45d   :  { %v7047_v28 = vadd.f32 %v3192_v52, %v1935_v49  ;;  %v7049_v29 = vadd.f32 %v3274_v6, %v1943_v24  ;;  %v3194_v30 = vpop.f32.mrb[10].mxu1  ;;  %v3276_v31 = vpop.f32.mrb[6].mxu0  ;;  %v7848_v49 = vld [vmem:[#allocation10 + $0x1e0] ss:$8 sps:$4 sm:$0xff]   ;;  %v7048_v24 = vadd.f32 %v8569_v26, %v1939_v21  ;;  %v7856_v6 = vld [vmem:[#allocation10 + $0x204] ss:$8 sps:$4 sm:$0xff]  }
 0x45e   :  { %v3441_v32 = vmax.f32 %v7046_v27, 0.0  ;;  %v3195_v33 = vpop.f32.mrb[11].mxu1  ;;  %v3277_v34 = vpop.f32.mrb[7].mxu0  ;;  %v7851_v27 = vld [vmem:[#allocation10 + $0x1f0] ss:$8 sps:$4 sm:$0xff]  }
 0x45f   :  { %v3442_v35 = vmax.f32 %v7047_v28, 0.0  ;;  %v3444_v36 = vmax.f32 %v7049_v29, 0.0  ;;  %v3443_v52 = vmax.f32 %v7048_v24, 0.0  ;;  %v7854_v28 = vld [vmem:[#allocation10 + $0x200] ss:$8 sps:$4 sm:$0xff]  }
 0x460   :  { %v3560_v40 = vpack.c.bf16 %v3441_v32, %v3441_v32  ;;  %v7859_v30 = vld [vmem:[#allocation10 + $0x214] ss:$8 sps:$4 sm:$0xff]   ;;  %v7857_v31 = vld [vmem:[#allocation10 + $0x210] ss:$8 sps:$4 sm:$0xff]   ;;  %v7862_v32 = vld [vmem:[#allocation10 + $0x224] ss:$8 sps:$4 sm:$0xff]  }
 0x461   :  { %v3561_v37 = vpack.c.bf16 %v3442_v35, %v3442_v35  ;;  %v3563_v42 = vpack.c.bf16 %v3444_v36, %v3444_v36  ;;  %v3562_v29 = vpack.c.bf16 %v3443_v52, %v3443_v52  ;;  %v7860_v33 = vld [vmem:[#allocation10 + $0x220] ss:$8 sps:$4 sm:$0xff]   ;;  %v7865_v26 = vld [vmem:[#allocation10 + $0x234] ss:$8 sps:$4 sm:$0xff]   ;;  %v7863_v34 = vld [vmem:[#allocation10 + $0x230] ss:$8 sps:$4 sm:$0xff]  }
 0x462   :  { %v7868_v35 = vld [vmem:[#allocation10 + $0x244] ss:$8 sps:$4 sm:$0xff]   ;;  %v7866_v36 = vld [vmem:[#allocation10 + $0x240] ss:$8 sps:$4 sm:$0xff]   ;;  %v7907_v21 = vld [vmem:[#allocation10 + $0x314] ss:$8 sps:$4 sm:$0xff]  }
 0x463   :  { %4171 = vmatprep.mubr.bf16.mxu0 %v3561_v37  ;;  %v7871_v37 = vld [vmem:[#allocation10 + $0x254] ss:$8 sps:$4 sm:$0xff]   ;;  %v7908_v24 = vld [vmem:[#allocation10 + $0x320] ss:$8 sps:$4 sm:$0xff]   ;;  %v7916_v52 = vld [vmem:[#allocation10 + $0x344] ss:$8 sps:$4 sm:$0xff]  }
 0x464   :  { %4172 = vmatmul.mubr.bf16.vlgmr.msra.gmra.mrb[12].mxu0 %v3560_v40  ;;  %v7874_v40 = vld [vmem:[#allocation10 + $0x264] ss:$8 sps:$4 sm:$0xff]  }
 0x465   :  { %4181 = vmatpush1.bf16.msra.mxu0 %v7806_v39  ;;  %4212 = vmatprep.mubr.bf16.mxu0 %v3563_v42  ;;  %v7869_v39 = vld [vmem:[#allocation10 + $0x250] ss:$8 sps:$4 sm:$0xff]   ;;  %v7877_v42 = vld [vmem:[#allocation10 + $0x274] ss:$8 sps:$4 sm:$0xff]  }
 0x466   :  { %4182 = vmatprep.subr.bf16.mxu0 %v7811_v41  ;;  %v7872_v41 = vld [vmem:[#allocation10 + $0x260] ss:$8 sps:$4 sm:$0xff]  }
 0x469   :  { %4183 = vmatpush1.bf16.msra.mxu0 %v7809_v44  ;;  %v7875_v44 = vld [vmem:[#allocation10 + $0x270] ss:$8 sps:$4 sm:$0xff]  }
 0x46a   :  { %4184 = vmatprep.subr.bf16.mxu0 %v7814_v45  ;;  %v7880_v45 = vld [vmem:[#allocation10 + $0x284] ss:$8 sps:$4 sm:$0xff]  }
 0x46d   :  { %4185 = vmatpush1.bf16.msra.mxu0 %v7812_v47  ;;  %v7878_v47 = vld [vmem:[#allocation10 + $0x280] ss:$8 sps:$4 sm:$0xff]  }
 0x46e   :  { %4186 = vmatprep.subr.bf16.mxu0 %v7817_v48  ;;  %v7883_v48 = vld [vmem:[#allocation10 + $0x294] ss:$8 sps:$4 sm:$0xff]  }
 0x471   :  { %4187 = vmatpush1.bf16.msra.mxu0 %v7815_v50  ;;  %v7881_v50 = vld [vmem:[#allocation10 + $0x290] ss:$8 sps:$4 sm:$0xff]  }
 0x472   :  { %4188 = vmatprep.subr.bf16.mxu0 %v7820_v51  ;;  %v7886_v51 = vld [vmem:[#allocation10 + $0x2a4] ss:$8 sps:$4 sm:$0xff]  }
 0x475   :  { %4189 = vmatpush1.bf16.msra.mxu0 %v7818_v53  ;;  %v7884_v53 = vld [vmem:[#allocation10 + $0x2a0] ss:$8 sps:$4 sm:$0xff]  }
 0x476   :  { %4190 = vmatprep.subr.bf16.mxu0 %v7823_v54  ;;  %v7889_v54 = vld [vmem:[#allocation10 + $0x2b4] ss:$8 sps:$4 sm:$0xff]  }
 0x479   :  { %4191 = vmatpush1.bf16.msra.mxu0 %v7821_v55  ;;  %v7887_v55 = vld [vmem:[#allocation10 + $0x2b0] ss:$8 sps:$4 sm:$0xff]  }
 0x47a   :  { %4192 = vmatprep.subr.bf16.mxu0 %v7826_v56  ;;  %v7892_v56 = vld [vmem:[#allocation10 + $0x2c4] ss:$8 sps:$4 sm:$0xff]  }
 0x47c   :  { %v6987_v59 = vpop.f32.mrb[8].mxu0 }
 0x47d   :  { %v6988_v60 = vpop.f32.mrb[9].mxu0  ;;  %4193 = vmatpush1.bf16.msra.mxu0 %v7824_v57  ;;  %v7890_v57 = vld [vmem:[#allocation10 + $0x2c0] ss:$8 sps:$4 sm:$0xff]  }
 0x47e   :  { %v8571_v62 = vadd.f32 %v6988_v60, %v6987_v59  ;;  %v6990_v63 = vpop.f32.mrb[10].mxu0  ;;  %4194 = vmatprep.subr.bf16.mxu0 %v7829_v58  ;;  %v7895_v58 = vld [vmem:[#allocation10 + $0x2d4] ss:$8 sps:$4 sm:$0xff]   ;;  %v8578_v59 = vsub.s32 4, %v8498_v9  ;;  %v7893_v60 = vld [vmem:[#allocation10 + $0x2d0] ss:$8 sps:$4 sm:$0xff]  }
 0x47f   :  { %v6991_v1 = vpop.f32.mrb[11].mxu0  ;;  %v7898_v63 = vld [vmem:[#allocation10 + $0x2e4] ss:$8 sps:$4 sm:$0xff]  }
 0x481   :  { %4195 = vmatpush1.bf16.msra.mxu0 %v7827_v61  ;;  %v8581_v61 = vsub.s32 5, %v8498_v9 }
 0x482   :  { %4196 = vmatprep.subr.bf16.mxu0 %v7832_v0  ;;  %v1947_v0 = vrot.slane %v8561_v22, %v8578_v59 }
 0x483   :  { %v1951_v1 = vrot.slane %v8561_v22, %v8581_v61 }
 0x485   :  { %4197 = vmatpush1.bf16.msra.mxu0 %v7830_v38  ;;  %v7896_v38 = vld [vmem:[#allocation10 + $0x2e0] ss:$8 sps:$4 sm:$0xff]  }
 0x486   :  { %4198 = vmatprep.subr.bf16.mxu0 %v7835_v2  ;;  %v7901_v2 = vld [vmem:[#allocation10 + $0x2f4] ss:$8 sps:$4 sm:$0xff]  }
 0x489   :  { %4199 = vmatpush1.bf16.msra.mxu0 %v7833_v5 }
 0x48a   :  { %4200 = vmatprep.subr.bf16.mxu0 %v7838_v10 }
 0x48d   :  { %4201 = vmatpush1.bf16.msra.mxu0 %v7836_v14 }
 0x48e   :  { %4202 = vmatprep.subr.bf16.mxu0 %v7841_v16 }
 0x491   :  { %4203 = vmatpush1.bf16.msra.mxu0 %v7839_v17  ;;  %v7904_v17 = vld [vmem:[#allocation10 + $0x304] ss:$8 sps:$4 sm:$0xff]  }
 0x492   :  { %4204 = vmatprep.subr.bf16.mxu0 %v7844_v18 }
 0x495   :  { %4205 = vmatpush1.bf16.msra.mxu0 %v7842_v19 }
 0x496   :  { %4206 = vmatprep.subr.bf16.mxu0 %v7847_v4  ;;  %v7902_v4 = vld [vmem:[#allocation10 + $0x300] ss:$8 sps:$4 sm:$0xff]  }
 0x499   :  { %4207 = vmatpush1.bf16.msra.mxu0 %v7845_v20 }
 0x49a   :  { %4208 = vmatprep.subr.bf16.mxu0 %v7850_v23  ;;  %v7905_v23 = vld [vmem:[#allocation10 + $0x310] ss:$8 sps:$4 sm:$0xff]  }
 0x49d   :  { %4209 = vmatpush1.bf16.msra.mxu0 %v7848_v49  ;;  %v7910_v49 = vld [vmem:[#allocation10 + $0x324] ss:$8 sps:$4 sm:$0xff]  }
 0x49e   :  { %4210 = vmatprep.subr.bf16.mxu0 %v7853_v25  ;;  %v7913_v25 = vld [vmem:[#allocation10 + $0x334] ss:$8 sps:$4 sm:$0xff]  }
 0x4a1   :  { %4211 = vmatpush1.bf16.msra.mxu0 %v7851_v27  ;;  %v7911_v27 = vld [vmem:[#allocation10 + $0x330] ss:$8 sps:$4 sm:$0xff]  }
 0x4a2   :  { %4221 = vmatprep.subr.bf16.mxu0 %v7856_v6  ;;  %v7914_v6 = vld [vmem:[#allocation10 + $0x340] ss:$8 sps:$4 sm:$0xff]  }
 0x4a4   :  { %4213 = vmatmul.mubr.bf16.vlgmr.msra.gmra.mrb[12].mxu0 %v3562_v29  ;;  %v8589_v29 = vsub.s32 6, %v8498_v9 }
 0x4a5   :  { %4222 = vmatpush1.bf16.msra.mxu0 %v7854_v28  ;;  %v7919_v28 = vld [vmem:[#allocation10 + $0x354] ss:$8 sps:$4 sm:$0xff]  }
 0x4a6   :  { %4223 = vmatprep.subr.bf16.mxu0 %v7859_v30  ;;  %v7917_v30 = vld [vmem:[#allocation10 + $0x350] ss:$8 sps:$4 sm:$0xff]  }
 0x4a9   :  { %4224 = vmatpush1.bf16.msra.mxu0 %v7857_v31  ;;  %v7922_v31 = vld [vmem:[#allocation10 + $0x364] ss:$8 sps:$4 sm:$0xff]  }
 0x4aa   :  { %4225 = vmatprep.subr.bf16.mxu0 %v7862_v32  ;;  %v1955_v32 = vrot.slane %v8561_v22, %v8589_v29  ;;  %v7934_v22 = vld [vmem:[#allocation12 + $0x74] ss:$28 sps:$4 sm:$0xff]  }
 0x4ab   :  { %4703 = vmatprep.subr.bf16.mxu1 %v7934_v22  ;;  %v7989_v22 = vld [vmem:[#allocation12 + $0x128] ss:$28 sps:$4 sm:$0xff]  }
 0x4ad   :  { %4226 = vmatpush1.bf16.msra.mxu0 %v7860_v33  ;;  %v7920_v33 = vld [vmem:[#allocation10 + $0x360] ss:$8 sps:$4 sm:$0xff]  }
 0x4ae   :  { %4227 = vmatprep.subr.bf16.mxu0 %v7865_v26  ;;  %v7925_v26 = vld [vmem:[#allocation10 + $0x374] ss:$8 sps:$4 sm:$0xff]  }
 0x4b1   :  { %4228 = vmatpush1.bf16.msra.mxu0 %v7863_v34 }
 0x4b2   :  { %4229 = vmatprep.subr.bf16.mxu0 %v7868_v35 }
 0x4b5   :  { %4230 = vmatpush1.bf16.msra.mxu0 %v7866_v36  ;;  %v3396_v36 = vadd.f32 %v8571_v62, %v1955_v32  ;;  %v7940_v62 = vld [vmem:[#allocation12 + $0xe4] ss:$28 sps:$4 sm:$0xff]   ;;  %v7973_v32 = vld [vmem:[#allocation12 + $0x194] ss:$28 sps:$4 sm:$0xff]  }
 0x4b6   :  { %4231 = vmatprep.subr.bf16.mxu0 %v7871_v37 }
 0x4b9   :  { %4232 = vmatpush1.bf16.msra.mxu0 %v7869_v39 }
 0x4ba   :  { %4233 = vmatprep.subr.bf16.mxu0 %v7874_v40  ;;  %v7923_v40 = vld [vmem:[#allocation10 + $0x370] ss:$8 sps:$4 sm:$0xff]  }
 0x4bd   :  { %4234 = vmatpush1.bf16.msra.mxu0 %v7872_v41 }
 0x4be   :  { %4235 = vmatprep.subr.bf16.mxu0 %v7877_v42 }
 0x4c1   :  { %4236 = vmatpush1.bf16.msra.mxu0 %v7875_v44 }
 0x4c2   :  { %4237 = vmatprep.subr.bf16.mxu0 %v7880_v45 }
 0x4c5   :  { %4238 = vmatpush1.bf16.msra.mxu0 %v7878_v47  ;;  %v7932_v47 = vld [vmem:[#allocation12 + $0x70] ss:$28 sps:$4 sm:$0xff]  }
 0x4c6   :  { %4239 = vmatprep.subr.bf16.mxu0 %v7883_v48  ;;  %4704 = vmatpush1.bf16.msra.mxu1 %v7932_v47  ;;  %v7937_v48 = vld [vmem:[#allocation12 + $0xac] ss:$28 sps:$4 sm:$0xff]   ;;  %v7994_v47 = vld [vmem:[#allocation12 + $0x164] ss:$28 sps:$4 sm:$0xff]  }
 0x4c7   :  { %4705 = vmatprep.subr.bf16.mxu1 %v7937_v48  ;;  %v7992_v48 = vld [vmem:[#allocation12 + $0x160] ss:$28 sps:$4 sm:$0xff]  }
 0x4c9   :  { %4240 = vmatpush1.bf16.msra.mxu0 %v7881_v50  ;;  %v7935_v50 = vld [vmem:[#allocation12 + $0xa8] ss:$28 sps:$4 sm:$0xff]  }
 0x4ca   :  { %4241 = vmatprep.subr.bf16.mxu0 %v7886_v51  ;;  %4706 = vmatpush1.bf16.msra.mxu1 %v7935_v50  ;;  %v7938_v51 = vld [vmem:[#allocation12 + $0xe0] ss:$28 sps:$4 sm:$0xff]  }
 0x4cb   :  { %4707 = vmatprep.subr.bf16.mxu1 %v7940_v62  ;;  %v7997_v50 = vld [vmem:[#allocation12 + $0x19c] ss:$28 sps:$4 sm:$0xff]  }
 0x4cc   :  { %v7995_v62 = vld [vmem:[#allocation12 + $0x198] ss:$28 sps:$4 sm:$0xff]  }
 0x4cd   :  { %4242 = vmatpush1.bf16.msra.mxu0 %v7884_v53  ;;  %v7943_v53 = vld [vmem:[#allocation12 + $0x11c] ss:$28 sps:$4 sm:$0xff]  }
 0x4ce   :  { %4243 = vmatprep.subr.bf16.mxu0 %v7889_v54  ;;  %4708 = vmatpush1.bf16.msra.mxu1 %v7938_v51  ;;  %v7941_v54 = vld [vmem:[#allocation12 + $0x118] ss:$28 sps:$4 sm:$0xff]  }
 0x4cf   :  { %4709 = vmatprep.subr.bf16.mxu1 %v7943_v53  ;;  %v7998_v51 = vld [vmem:[#allocation12 + $0x18] ss:$28 sps:$4 sm:$0xff]   ;;  %v8272_v53 = vmov 0.0  }
 0x4d1   :  { %4244 = vmatpush1.bf16.msra.mxu0 %v7887_v55  ;;  %v7946_v55 = vld [vmem:[#allocation12 + $0x154] ss:$28 sps:$4 sm:$0xff]  }
 0x4d2   :  { %4245 = vmatprep.subr.bf16.mxu0 %v7892_v56  ;;  %4710 = vmatpush1.bf16.msra.mxu1 %v7941_v54  ;;  %v7944_v56 = vld [vmem:[#allocation12 + $0x150] ss:$28 sps:$4 sm:$0xff]  }
 0x4d3   :  { %4711 = vmatprep.subr.bf16.mxu1 %v7946_v55  ;;  %v7999_v54 = vld [vmem:[#allocation12 + $0x50] ss:$28 sps:$4 sm:$0xff]   ;;  %v8000_v55 = vld [vmem:[#allocation12 + $0x88] ss:$28 sps:$4 sm:$0xff]  }
 0x4d5   :  { %4246 = vmatpush1.bf16.msra.mxu0 %v7890_v57  ;;  %v7949_v57 = vld [vmem:[#allocation12 + $0x18c] ss:$28 sps:$4 sm:$0xff]  }
 0x4d6   :  { %4247 = vmatprep.subr.bf16.mxu0 %v7895_v58  ;;  %4712 = vmatpush1.bf16.msra.mxu1 %v7944_v56  ;;  %v7947_v58 = vld [vmem:[#allocation12 + $0x188] ss:$28 sps:$4 sm:$0xff]   ;;  %v8001_v56 = vld [vmem:[#allocation12 + $0xc0] ss:$28 sps:$4 sm:$0xff]  }
 0x4d7   :  { %4713 = vmatprep.subr.bf16.mxu1 %v7949_v57  ;;  %v8002_v57 = vld [vmem:[#allocation12 + $0xf8] ss:$28 sps:$4 sm:$0xff]  }
 0x4d9   :  { %4248 = vmatpush1.bf16.msra.mxu0 %v7893_v60  ;;  %v7952_v60 = vld [vmem:[#allocation12 + $0xc] ss:$28 sps:$4 sm:$0xff]  }
 0x4da   :  { %4249 = vmatprep.subr.bf16.mxu0 %v7898_v63  ;;  %4714 = vmatpush1.bf16.msra.mxu1 %v7947_v58  ;;  %v3567_v63 = vld [vmem:[%s8755_s9] sm:$0x3]  ;;  %v8003_v58 = vld [vmem:[#allocation12 + $0x130] ss:$28 sps:$4 sm:$0xff]  }
 0x4db   :  { %v3354_v5 = vpop.f32.mrb[12].mxu1  ;;  %4740 = vmatprep.subr.bf16.mxu1 %v7952_v60  ;;  %v8004_v60 = vld [vmem:[#allocation12 + $0x168] ss:$28 sps:$4 sm:$0xff]  }
 0x4dc   :  { %v7050_v7 = vadd.f32 %v3354_v5, %v1947_v0  ;;  %v3356_v8 = vpop.f32.mrb[13].mxu1  ;;  %v3576_v0 = vrot.slane %v3567_v63, %v8507_v15 }
 0x4dd   :  { %v7051_v10 = vadd.f32 %v3356_v8, %v1951_v1  ;;  %v3358_v11 = vpop.f32.mrb[14].mxu1  ;;  %4250 = vmatpush1.bf16.msra.mxu0 %v7896_v38 }
 0x4de   :  { %v3445_v14 = vmax.f32 %v7050_v7, 0.0  ;;  %v3359_v16 = vpop.f32.mrb[15].mxu1  ;;  %4251 = vmatprep.subr.bf16.mxu0 %v7901_v2  ;;  %v3572_v11 = vrot.slane %v3567_v63, %v8501_v12  ;;  %v8005_v63 = vld [vmem:[#allocation12 + $0x1a0] ss:$28 sps:$4 sm:$0xff]  }
 0x4df   :  { %v3446_v18 = vmax.f32 %v7051_v10, 0.0 }
 0x4e0   :  { %v3564_v20 = vpack.c.bf16 %v3445_v14, %v3445_v14 }
 0x4e1   :  { %v3565_v19 = vpack.c.bf16 %v3446_v18, %v3446_v18  ;;  %4252 = vmatpush1.bf16.msra.mxu0 %v7899_v13  ;;  %v4306_v13 = vld [vmem:[%s8779_s26] sm:$0xff] }
 0x4e2   :  { %4262 = vmatprep.subr.bf16.mxu0 %v7904_v17 }
 0x4e3   :  { %4253 = vmatprep.mubr.bf16.mxu0 %v3565_v19  ;;  %v7950_v19 = vld [vmem:[#allocation12 + $0x8] ss:$28 sps:$4 sm:$0xff]  }
 0x4e4   :  { %4254 = vmatmul.mubr.bf16.vlgmr.msra.gmra.mrb[12].mxu0 %v3564_v20  ;;  %v7955_v20 = vld [vmem:[#allocation12 + $0x44] ss:$28 sps:$4 sm:$0xff]  }
 0x4e5   :  { %4263 = vmatpush1.bf16.msra.mxu0 %v7902_v4  ;;  %4294 = vmatprep.mubr.bf16.mxu0 %v8271_v3 }
 0x4e6   :  { %4264 = vmatprep.subr.bf16.mxu0 %v7907_v21  ;;  %v7953_v21 = vld [vmem:[#allocation12 + $0x40] ss:$28 sps:$4 sm:$0xff]  }
 0x4e9   :  { %4265 = vmatpush1.bf16.msra.mxu0 %v7905_v23  ;;  %v7958_v23 = vld [vmem:[#allocation12 + $0x7c] ss:$28 sps:$4 sm:$0xff]  }
 0x4ea   :  { %4266 = vmatprep.subr.bf16.mxu0 %v7910_v49  ;;  %v7956_v49 = vld [vmem:[#allocation12 + $0x78] ss:$28 sps:$4 sm:$0xff]  }
 0x4ed   :  { %4267 = vmatpush1.bf16.msra.mxu0 %v7908_v24  ;;  %v7961_v24 = vld [vmem:[#allocation12 + $0xb4] ss:$28 sps:$4 sm:$0xff]  }
 0x4ee   :  { %4268 = vmatprep.subr.bf16.mxu0 %v7913_v25  ;;  %v7959_v25 = vld [vmem:[#allocation12 + $0xb0] ss:$28 sps:$4 sm:$0xff]  }
 0x4f1   :  { %4269 = vmatpush1.bf16.msra.mxu0 %v7911_v27  ;;  %v7964_v27 = vld [vmem:[#allocation12 + $0xec] ss:$28 sps:$4 sm:$0xff]  }
 0x4f2   :  { %4270 = vmatprep.subr.bf16.mxu0 %v7916_v52  ;;  %v7962_v52 = vld [vmem:[#allocation12 + $0xe8] ss:$28 sps:$4 sm:$0xff]  }
 0x4f5   :  { %4271 = vmatpush1.bf16.msra.mxu0 %v7914_v6  ;;  %v7967_v6 = vld [vmem:[#allocation12 + $0x124] ss:$28 sps:$4 sm:$0xff]  }
 0x4f6   :  { %4272 = vmatprep.subr.bf16.mxu0 %v7919_v28  ;;  %v7965_v28 = vld [vmem:[#allocation12 + $0x120] ss:$28 sps:$4 sm:$0xff]  }
 0x4f9   :  { %4273 = vmatpush1.bf16.msra.mxu0 %v7917_v30  ;;  %v7970_v30 = vld [vmem:[#allocation12 + $0x15c] ss:$28 sps:$4 sm:$0xff]  }
 0x4fa   :  { %4274 = vmatprep.subr.bf16.mxu0 %v7922_v31  ;;  %v7968_v31 = vld [vmem:[#allocation12 + $0x158] ss:$28 sps:$4 sm:$0xff]  }
 0x4fb   :  { %v7009_v34 = vpop.f32.mrb[16].mxu1 }
 0x4fc   :  { %v7010_v35 = vpop.f32.mrb[17].mxu1 }
 0x4fd   :  { %v7011_v37 = vadd.f32 %v7010_v35, %v7009_v34  ;;  %v7012_v39 = vpop.f32.mrb[18].mxu1  ;;  %4275 = vmatpush1.bf16.msra.mxu0 %v7920_v33  ;;  %v7971_v33 = vld [vmem:[#allocation12 + $0x190] ss:$28 sps:$4 sm:$0xff]  }
 0x4fe   :  { %v7013_v41 = vpop.f32.mrb[19].mxu1  ;;  %4276 = vmatprep.subr.bf16.mxu0 %v7925_v26  ;;  %v7976_v26 = vld [vmem:[#allocation12 + $0x14] ss:$28 sps:$4 sm:$0xff]   ;;  %v7979_v35 = vld [vmem:[#allocation12 + $0x4c] ss:$28 sps:$4 sm:$0xff]  }
 0x4ff   :  { %v3436_v42 = vadd.f32 %v7011_v37, %v3396_v36  ;;  %v7974_v34 = vld [vmem:[#allocation12 + $0x10] ss:$28 sps:$4 sm:$0xff]   ;;  %v7977_v36 = vld [vmem:[#allocation12 + $0x48] ss:$28 sps:$4 sm:$0xff]   ;;  %v7980_v39 = vld [vmem:[#allocation12 + $0x80] ss:$28 sps:$4 sm:$0xff]  }
 0x500   :  { %v7982_v37 = vld [vmem:[#allocation12 + $0x84] ss:$28 sps:$4 sm:$0xff]   ;;  %v7983_v41 = vld [vmem:[#allocation12 + $0xb8] ss:$28 sps:$4 sm:$0xff]  }
 0x501   :  { %v3447_v44 = vmax.f32 %v3436_v42, 0.0  ;;  %4277 = vmatpush1.bf16.msra.mxu0 %v7923_v40  ;;  %v7985_v40 = vld [vmem:[#allocation12 + $0xbc] ss:$28 sps:$4 sm:$0xff]   ;;  %v7988_v42 = vld [vmem:[#allocation12 + $0xf4] ss:$28 sps:$4 sm:$0xff]  }
 0x503   :  { %v3566_v45 = vpack.c.bf16 %v3447_v44, %v3447_v44  ;;  %v7986_v44 = vld [vmem:[#allocation12 + $0xf0] ss:$28 sps:$4 sm:$0xff]  }
 0x505   :  { %4295 = vmatmul.mubr.bf16.vlgmr.msra.gmra.mrb[12].mxu0 %v3566_v45  ;;  %v7991_v45 = vld [vmem:[#allocation12 + $0x12c] ss:$28 sps:$4 sm:$0xff]  }
 0x5d8   :  { %v4296_v1 = vpop.f32.mrb[12].mxu0 }
 0x5d9   :  { %v4298_v38 = vpop.f32.mrb[13].mxu0  ;;  %v8605_v16 = vadd.f32 %v4296_v1, %v3572_v11 }
 0x5da   :  { %v8598_v2 = vadd.f32 %v4298_v38, %v3576_v0  ;;  %v4300_v5 = vpop.f32.mrb[14].mxu0  ;;  %v4374_v0 = vld [vmem:[%s8757_s11] sm:$0xff] }
 0x5db   :  { %v4301_v7 = vpop.f32.mrb[15].mxu0  ;;  %v4379_v1 = vrot.slane %v4374_v0, %v8501_v12  ;;  %v4383_v38 = vrot.slane %v4374_v0, %v8507_v15 }
 0x5dc   :  { %v4303_v8 = vmul.f32 0.5, %v8598_v2 }
 0x5de   :  { %v4304_v10 = vmul.f32 1.442695, %v4303_v8 }
 0x5e0   :  { %8006 = vpow2.f32 %v4304_v10 }
 0x5ea   :  { %v8007_v14 = vpop.eup %8006 }
 0x5eb   :  { %v4307_v17 = vmul.f32 %v8007_v14, %v4306_v13 }
 0x5ed   :  { %v4308_v18 = vadd.f32 %v8605_v16, %v4307_v17 }
 0x5ef   :  { %v8608_v4 = vpack.c.bf16 %v4308_v18, %v4308_v18  ;;  %v4387_v18 = vrot.slane %v4374_v0, %v8533_v43 }
 0x5f1   :  { %4732 = vmatmul.mubr.bf16.vlgmr.msra.gmra.mrb[20].mxu1 %v8608_v4 }
 0x5f2   :  { %4741 = vmatpush1.bf16.msra.mxu1 %v7950_v19  ;;  %4772 = vmatprep.mubr.bf16.mxu1 %v8271_v3  ;;  %v4391_v19 = vrot.slane %v4374_v0, %v8536_v46 }
 0x5f3   :  { %4742 = vmatprep.subr.bf16.mxu1 %v7955_v20 }
 0x5f6   :  { %4743 = vmatpush1.bf16.msra.mxu1 %v7953_v21 }
 0x5f7   :  { %4744 = vmatprep.subr.bf16.mxu1 %v7958_v23 }
 0x5fa   :  { %4745 = vmatpush1.bf16.msra.mxu1 %v7956_v49 }
 0x5fb   :  { %4746 = vmatprep.subr.bf16.mxu1 %v7961_v24 }
 0x5fe   :  { %4747 = vmatpush1.bf16.msra.mxu1 %v7959_v25 }
 0x5ff   :  { %4748 = vmatprep.subr.bf16.mxu1 %v7964_v27 }
 0x602   :  { %4749 = vmatpush1.bf16.msra.mxu1 %v7962_v52  ;;  %v4395_v52 = vrot.slane %v4374_v0, %v8578_v59 }
 0x603   :  { %4750 = vmatprep.subr.bf16.mxu1 %v7967_v6  ;;  %v4399_v6 = vrot.slane %v4374_v0, %v8581_v61 }
 0x606   :  { %4751 = vmatpush1.bf16.msra.mxu1 %v7965_v28 }
 0x607   :  { %4752 = vmatprep.subr.bf16.mxu1 %v7970_v30 }
 0x60a   :  { %4753 = vmatpush1.bf16.msra.mxu1 %v7968_v31 }
 0x60b   :  { %4754 = vmatprep.subr.bf16.mxu1 %v7973_v32 }
 0x60e   :  { %4755 = vmatpush1.bf16.msra.mxu1 %v7971_v33 }
 0x60f   :  { %4781 = vmatprep.subr.bf16.mxu1 %v7976_v26 }
 0x611   :  { %4773 = vmatmul.mubr.bf16.vlgmr.msra.gmra.mrb[24].mxu1 %v8608_v4 }
 0x612   :  { %4782 = vmatpush1.bf16.msra.mxu1 %v7974_v34  ;;  %4813 = vmatprep.mubr.bf16.mxu1 %v8271_v3 }
 0x613   :  { %4783 = vmatprep.subr.bf16.mxu1 %v7979_v35 }
 0x616   :  { %4784 = vmatpush1.bf16.msra.mxu1 %v7977_v36  ;;  %v4403_v36 = vrot.slane %v4374_v0, %v8589_v29 }
 0x617   :  { %4785 = vmatprep.subr.bf16.mxu1 %v7982_v37 }
 0x61a   :  { %4786 = vmatpush1.bf16.msra.mxu1 %v7980_v39 }
 0x61b   :  { %4787 = vmatprep.subr.bf16.mxu1 %v7985_v40 }
 0x61e   :  { %4788 = vmatpush1.bf16.msra.mxu1 %v7983_v41 }
 0x61f   :  { %4789 = vmatprep.subr.bf16.mxu1 %v7988_v42 }
 0x622   :  { %4790 = vmatpush1.bf16.msra.mxu1 %v7986_v44 }
 0x623   :  { %4791 = vmatprep.subr.bf16.mxu1 %v7991_v45 }
 0x626   :  { %4792 = vmatpush1.bf16.msra.mxu1 %v7989_v22 }
 0x627   :  { %4793 = vmatprep.subr.bf16.mxu1 %v7994_v47 }
 0x62a   :  { %4794 = vmatpush1.bf16.msra.mxu1 %v7992_v48 }
 0x62b   :  { %4795 = vmatprep.subr.bf16.mxu1 %v7997_v50 }
 0x62e   :  { %4796 = vmatpush1.bf16.msra.mxu1 %v7995_v62 }
 0x62f   :  { %7024 = vmatprep.subr.bf16.mxu1 %v8272_v53 }
 0x631   :  { %4814 = vmatmul.mubr.bf16.vlgmr.msra.gmra.mrb[28].mxu1 %v8608_v4 }
 0x632   :  { %7025 = vmatpush3.bf16.msra.mxu1 %v7998_v51  ;;  %7040 = vmatprep.mubr.msk.bf16.mxu1 %vm8273_vm0, %v8272_v53 }
 0x633   :  { %7026 = vmatprep.subr.bf16.mxu1 %v8272_v53 }
 0x636   :  { %7027 = vmatpush3.bf16.msra.mxu1 %v7999_v54 }
 0x637   :  { %7028 = vmatprep.subr.bf16.mxu1 %v8272_v53 }
 0x63a   :  { %7029 = vmatpush3.bf16.msra.mxu1 %v8000_v55 }
 0x63b   :  { %7030 = vmatprep.subr.bf16.mxu1 %v8272_v53 }
 0x63e   :  { %7031 = vmatpush3.bf16.msra.mxu1 %v8001_v56 }
 0x63f   :  { %7032 = vmatprep.subr.bf16.mxu1 %v8272_v53 }
 0x642   :  { %7033 = vmatpush3.bf16.msra.mxu1 %v8002_v57 }
 0x643   :  { %7034 = vmatprep.subr.bf16.mxu1 %v8272_v53 }
 0x646   :  { %7035 = vmatpush3.bf16.msra.mxu1 %v8003_v58 }
 0x647   :  { %7036 = vmatprep.subr.bf16.mxu1 %v8272_v53 }
 0x64a   :  { %7037 = vmatpush3.bf16.msra.mxu1 %v8004_v60 }
 0x64b   :  { %7038 = vmatprep.subr.bf16.mxu1 %v8272_v53 }
 0x64e   :  { %7039 = vmatpush3.bf16.msra.mxu1 %v8005_v63 }
 0x651   :  { %7041 = vmatmul.mubr.bf16.vlgmr.msra.gmra.mrb[32].mxu1 %v8608_v4 }
 0x6c4   :  { %v4733_v5 = vpop.f32.mrb[20].mxu1 }
 0x6c5   :  { %v8621_v7 = vadd.f32 %v4733_v5, %v4379_v1  ;;  %v4735_v8 = vpop.f32.mrb[21].mxu1 }
 0x6c6   :  { %v4736_v10 = vadd.f32 %v4735_v8, %v4383_v38  ;;  %v4737_v11 = vpop.f32.mrb[22].mxu1 }
 0x6c7   :  { %v4862_v13 = vmax.f32 %v8621_v7, 0.0  ;;  %v4738_v14 = vpop.f32.mrb[23].mxu1 }
 0x6c8   :  { %v4863_v17 = vmax.f32 %v4736_v10, 0.0 }
 0x6e4   :  { %v4774_v4 = vpop.f32.mrb[24].mxu1 }
 0x6e5   :  { %v8626_v20 = vadd.f32 %v4774_v4, %v4387_v18  ;;  %v4776_v21 = vpop.f32.mrb[25].mxu1 }
 0x6e6   :  { %v8628_v23 = vadd.f32 %v4776_v21, %v4391_v19  ;;  %v4778_v49 = vpop.f32.mrb[26].mxu1 }
 0x6e7   :  { %v4864_v24 = vmax.f32 %v8626_v20, 0.0  ;;  %v4779_v25 = vpop.f32.mrb[27].mxu1 }
 0x6e8   :  { %v4865_v27 = vmax.f32 %v8628_v23, 0.0 }
 0x704   :  { %v4815_v28 = vpop.f32.mrb[28].mxu1 }
 0x705   :  { %v8634_v30 = vadd.f32 %v4815_v28, %v4395_v52  ;;  %v4817_v31 = vpop.f32.mrb[29].mxu1 }
 0x706   :  { %v8636_v32 = vadd.f32 %v4817_v31, %v4399_v6  ;;  %v4819_v33 = vpop.f32.mrb[30].mxu1 }
 0x707   :  { %v4866_v26 = vmax.f32 %v8634_v30, 0.0  ;;  %v4820_v34 = vpop.f32.mrb[31].mxu1 }
 0x708   :  { %v4867_v35 = vmax.f32 %v8636_v32, 0.0 }
 0x724   :  { %v4856_v37 = vpop.f32.mrb[32].mxu1 }
 0x725   :  { %v8641_v39 = vadd.f32 %v4856_v37, %v4403_v36  ;;  %v7042_v40 = vpop.f32.mrb[33].mxu1 }
 0x726   :  { %v4859_v41 = vpop.f32.mrb[34].mxu1 }
 0x727   :  { %v4868_v42 = vmax.f32 %v8641_v39, 0.0  ;;  %v7043_v44 = vpop.f32.mrb[35].mxu1 }
 0x728   :  { %8244 = dma.done.wait [#allocation4], 28672 }
 0x729   :  { %8245 = vsyncadd [#allocation4], 4294938624  ;;  %v5098_v45 = vpack.c.bf16 %v4863_v17, %v4863_v17  ;;  %v4874_v22 = vld [vmem:[#allocation2 + $0x8] sm:$0xff]  ;;  %v4876_v47 = vld [vmem:[#allocation2 + $0x18] sm:$0xff] }
 0x72a   :  { %v4873_v48 = vld [vmem:[#allocation2] sm:$0xff]  ;;  %5126 = vmatprep.subr.bf16.mxu1 %v4874_v22  ;;  %5290 = vmatprep.subr.bf16.mxu0 %v4876_v47  ;;  %v4875_v50 = vld [vmem:[#allocation2 + $0x10] sm:$0xff]  ;;  %v4878_v62 = vld [vmem:[#allocation2 + $0x28] sm:$0xff] }
 0x72b   :  { %5158 = vmatprep.mubr.bf16.mxu1 %v5098_v45  ;;  %5322 = vmatprep.mubr.bf16.mxu0 %v5098_v45  ;;  %v4880_v51 = vld [vmem:[#allocation2 + $0x38] sm:$0xff]  ;;  %v4877_v53 = vld [vmem:[#allocation2 + $0x20] sm:$0xff]  ;;  %v4879_v54 = vld [vmem:[#allocation2 + $0x30] sm:$0xff] }
 0x72c   :  { %5127 = vmatpush1.bf16.msra.mxu1 %v4873_v48  ;;  %5291 = vmatpush1.bf16.msra.mxu0 %v4875_v50  ;;  %v4882_v55 = vld [vmem:[#allocation2 + $0x48] sm:$0xff]  ;;  %v4884_v56 = vld [vmem:[#allocation2 + $0x58] sm:$0xff]  ;;  %v4881_v57 = vld [vmem:[#allocation2 + $0x40] sm:$0xff] }
 0x72d   :  { %5128 = vmatprep.subr.bf16.mxu1 %v4878_v62  ;;  %5292 = vmatprep.subr.bf16.mxu0 %v4880_v51  ;;  %v4883_v58 = vld [vmem:[#allocation2 + $0x50] sm:$0xff]  ;;  %v4886_v60 = vld [vmem:[#allocation2 + $0x68] sm:$0xff]  ;;  %v4888_v63 = vld [vmem:[#allocation2 + $0x78] sm:$0xff] }
 0x72e   :  { %v4885_v0 = vld [vmem:[#allocation2 + $0x60] sm:$0xff]  ;;  %v4887_v1 = vld [vmem:[#allocation2 + $0x70] sm:$0xff]  ;;  %v4890_v38 = vld [vmem:[#allocation2 + $0x88] sm:$0xff] }
 0x72f   :  { %v4892_v5 = vld [vmem:[#allocation2 + $0x98] sm:$0xff]  ;;  %v4889_v8 = vld [vmem:[#allocation2 + $0x80] sm:$0xff]  ;;  %v4891_v10 = vld [vmem:[#allocation2 + $0x90] sm:$0xff] }
 0x730   :  { %5129 = vmatpush1.bf16.msra.mxu1 %v4877_v53  ;;  %5293 = vmatpush1.bf16.msra.mxu0 %v4879_v54  ;;  %v4894_v11 = vld [vmem:[#allocation2 + $0xa8] sm:$0xff]  ;;  %v4896_v14 = vld [vmem:[#allocation2 + $0xb8] sm:$0xff]  ;;  %v4893_v17 = vld [vmem:[#allocation2 + $0xa0] sm:$0xff] }
 0x731   :  { %5130 = vmatprep.subr.bf16.mxu1 %v4882_v55  ;;  %5294 = vmatprep.subr.bf16.mxu0 %v4884_v56  ;;  %v4895_v18 = vld [vmem:[#allocation2 + $0xb0] sm:$0xff]  ;;  %v4898_v19 = vld [vmem:[#allocation2 + $0xc8] sm:$0xff]  ;;  %v4900_v4 = vld [vmem:[#allocation2 + $0xd8] sm:$0xff] }
 0x732   :  { %v4897_v21 = vld [vmem:[#allocation2 + $0xc0] sm:$0xff]  ;;  %v4899_v49 = vld [vmem:[#allocation2 + $0xd0] sm:$0xff]  ;;  %v4902_v25 = vld [vmem:[#allocation2 + $0xe8] sm:$0xff] }
 0x733   :  { %v4904_v52 = vld [vmem:[#allocation2 + $0xf8] sm:$0xff]  ;;  %v4901_v6 = vld [vmem:[#allocation2 + $0xe0] sm:$0xff]  ;;  %v4903_v28 = vld [vmem:[#allocation2 + $0xf0] sm:$0xff] }
 0x734   :  { %5131 = vmatpush1.bf16.msra.mxu1 %v4881_v57  ;;  %5295 = vmatpush1.bf16.msra.mxu0 %v4883_v58  ;;  %v4906_v31 = vld [vmem:[#allocation2 + $0x108] sm:$0xff]  ;;  %v4908_v33 = vld [vmem:[#allocation2 + $0x118] sm:$0xff]  ;;  %v4905_v34 = vld [vmem:[#allocation2 + $0x100] sm:$0xff] }
 0x735   :  { %5132 = vmatprep.subr.bf16.mxu1 %v4886_v60  ;;  %5296 = vmatprep.subr.bf16.mxu0 %v4888_v63  ;;  %v4907_v36 = vld [vmem:[#allocation2 + $0x110] sm:$0xff]  ;;  %v4910_v37 = vld [vmem:[#allocation2 + $0x128] sm:$0xff]  ;;  %v4912_v40 = vld [vmem:[#allocation2 + $0x138] sm:$0xff] }
 0x736   :  { %v4909_v41 = vld [vmem:[#allocation2 + $0x120] sm:$0xff]  ;;  %v4911_v44 = vld [vmem:[#allocation2 + $0x130] sm:$0xff]  ;;  %v4914_v45 = vld [vmem:[#allocation2 + $0x148] sm:$0xff] }
 0x737   :  { %v4916_v22 = vld [vmem:[#allocation2 + $0x158] sm:$0xff]  ;;  %v4913_v47 = vld [vmem:[#allocation2 + $0x140] sm:$0xff]  ;;  %v4915_v48 = vld [vmem:[#allocation2 + $0x150] sm:$0xff] }
 0x738   :  { %5133 = vmatpush1.bf16.msra.mxu1 %v4885_v0  ;;  %5297 = vmatpush1.bf16.msra.mxu0 %v4887_v1  ;;  %v4918_v50 = vld [vmem:[#allocation2 + $0x168] sm:$0xff]  ;;  %v4920_v62 = vld [vmem:[#allocation2 + $0x178] sm:$0xff]  ;;  %v4917_v51 = vld [vmem:[#allocation2 + $0x160] sm:$0xff] }
 0x739   :  { %5134 = vmatprep.subr.bf16.mxu1 %v4890_v38  ;;  %5298 = vmatprep.subr.bf16.mxu0 %v4892_v5  ;;  %v4919_v53 = vld [vmem:[#allocation2 + $0x170] sm:$0xff]  ;;  %v4922_v54 = vld [vmem:[#allocation2 + $0x188] sm:$0xff]  ;;  %v4924_v55 = vld [vmem:[#allocation2 + $0x198] sm:$0xff] }
 0x73a   :  { %v4921_v56 = vld [vmem:[#allocation2 + $0x180] sm:$0xff]  ;;  %v4923_v57 = vld [vmem:[#allocation2 + $0x190] sm:$0xff]  ;;  %v4926_v58 = vld [vmem:[#allocation2 + $0x1a8] sm:$0xff] }
 0x73b   :  { %v4928_v60 = vld [vmem:[#allocation2 + $0x1b8] sm:$0xff]  ;;  %v4925_v63 = vld [vmem:[#allocation2 + $0x1a0] sm:$0xff]  ;;  %v4927_v0 = vld [vmem:[#allocation2 + $0x1b0] sm:$0xff] }
 0x73c   :  { %5135 = vmatpush1.bf16.msra.mxu1 %v4889_v8  ;;  %5299 = vmatpush1.bf16.msra.mxu0 %v4891_v10  ;;  %v4930_v1 = vld [vmem:[#allocation2 + $0x1c8] sm:$0xff]  ;;  %v4932_v38 = vld [vmem:[#allocation2 + $0x1d8] sm:$0xff]  ;;  %v4929_v5 = vld [vmem:[#allocation2 + $0x1c0] sm:$0xff] }
 0x73d   :  { %5136 = vmatprep.subr.bf16.mxu1 %v4894_v11  ;;  %5300 = vmatprep.subr.bf16.mxu0 %v4896_v14  ;;  %v4931_v8 = vld [vmem:[#allocation2 + $0x1d0] sm:$0xff]  ;;  %v4934_v10 = vld [vmem:[#allocation2 + $0x1e8] sm:$0xff]  ;;  %v4936_v11 = vld [vmem:[#allocation2 + $0x1f8] sm:$0xff] }
 0x73e   :  { %v4933_v14 = vld [vmem:[#allocation2 + $0x1e0] sm:$0xff]  ;;  %v4943_v7 = vld [vmem:[#allocation2 + $0x230] sm:$0xff]  ;;  %v4950_v23 = vld [vmem:[#allocation2 + $0x268] sm:$0xff] }
 0x73f   :  { %v5005_v20 = vld [vmem:[#allocation2 + $0x420] sm:$0xff]  ;;  %v5011_v32 = vld [vmem:[#allocation2 + $0x450] sm:$0xff]  ;;  %v5076_v30 = vld [vmem:[#allocation2 + $0x658] sm:$0xff] }
 0x740   :  { %5137 = vmatpush1.bf16.msra.mxu1 %v4893_v17  ;;  %5301 = vmatpush1.bf16.msra.mxu0 %v4895_v18  ;;  %v4935_v17 = vld [vmem:[#allocation2 + $0x1f0] sm:$0xff]  ;;  %v4938_v18 = vld [vmem:[#allocation2 + $0x208] sm:$0xff] }
 0x741   :  { %5138 = vmatprep.subr.bf16.mxu1 %v4898_v19  ;;  %5302 = vmatprep.subr.bf16.mxu0 %v4900_v4  ;;  %v4940_v19 = vld [vmem:[#allocation2 + $0x218] sm:$0xff]  ;;  %v5097_v4 = vpack.c.bf16 %v4862_v13, %v4862_v13  ;;  %v4946_v13 = vld [vmem:[#allocation2 + $0x248] sm:$0xff] }
 0x742   :  { %v8022_v39 = vld [vmem:[#allocation13 + $0x44] ss:$8 sps:$4 sm:$0xff]  }
 0x744   :  { %5139 = vmatpush1.bf16.msra.mxu1 %v4897_v21  ;;  %5303 = vmatpush1.bf16.msra.mxu0 %v4899_v49  ;;  %v4937_v21 = vld [vmem:[#allocation2 + $0x200] sm:$0xff]  ;;  %v4939_v49 = vld [vmem:[#allocation2 + $0x210] sm:$0xff] }
 0x745   :  { %5140 = vmatprep.subr.bf16.mxu1 %v4902_v25  ;;  %5304 = vmatprep.subr.bf16.mxu0 %v4904_v52  ;;  %v4942_v25 = vld [vmem:[#allocation2 + $0x228] sm:$0xff]  ;;  %v4944_v52 = vld [vmem:[#allocation2 + $0x238] sm:$0xff] }
 0x748   :  { %5141 = vmatpush1.bf16.msra.mxu1 %v4901_v6  ;;  %5305 = vmatpush1.bf16.msra.mxu0 %v4903_v28  ;;  %v5100_v6 = vpack.c.bf16 %v4865_v27, %v4865_v27  ;;  %v4941_v28 = vld [vmem:[#allocation2 + $0x220] sm:$0xff]  ;;  %v4952_v27 = vld [vmem:[#allocation2 + $0x278] sm:$0xff] }
 0x749   :  { %5142 = vmatprep.subr.bf16.mxu1 %v4906_v31  ;;  %5306 = vmatprep.subr.bf16.mxu0 %v4908_v33  ;;  %v4948_v31 = vld [vmem:[#allocation2 + $0x258] sm:$0xff]  ;;  %v4945_v33 = vld [vmem:[#allocation2 + $0x240] sm:$0xff] }
 0x74c   :  { %5143 = vmatpush1.bf16.msra.mxu1 %v4905_v34  ;;  %5307 = vmatpush1.bf16.msra.mxu0 %v4907_v36  ;;  %v4947_v34 = vld [vmem:[#allocation2 + $0x250] sm:$0xff]  ;;  %v4949_v36 = vld [vmem:[#allocation2 + $0x260] sm:$0xff] }
 0x74d   :  { %5144 = vmatprep.subr.bf16.mxu1 %v4910_v37  ;;  %5308 = vmatprep.subr.bf16.mxu0 %v4912_v40  ;;  %v4951_v37 = vld [vmem:[#allocation2 + $0x270] sm:$0xff]  ;;  %v4954_v40 = vld [vmem:[#allocation2 + $0x288] sm:$0xff] }
 0x750   :  { %5145 = vmatpush1.bf16.msra.mxu1 %v4909_v41  ;;  %5309 = vmatpush1.bf16.msra.mxu0 %v4911_v44  ;;  %v4956_v41 = vld [vmem:[#allocation2 + $0x298] sm:$0xff]  ;;  %v4953_v44 = vld [vmem:[#allocation2 + $0x280] sm:$0xff] }
 0x751   :  { %5146 = vmatprep.subr.bf16.mxu1 %v4914_v45  ;;  %5310 = vmatprep.subr.bf16.mxu0 %v4916_v22  ;;  %v4955_v45 = vld [vmem:[#allocation2 + $0x290] sm:$0xff]  ;;  %v4958_v22 = vld [vmem:[#allocation2 + $0x2a8] sm:$0xff] }
 0x754   :  { %5147 = vmatpush1.bf16.msra.mxu1 %v4913_v47  ;;  %5311 = vmatpush1.bf16.msra.mxu0 %v4915_v48  ;;  %v4960_v47 = vld [vmem:[#allocation2 + $0x2b8] sm:$0xff]  ;;  %v4957_v48 = vld [vmem:[#allocation2 + $0x2a0] sm:$0xff] }
 0x755   :  { %5148 = vmatprep.subr.bf16.mxu1 %v4918_v50  ;;  %5312 = vmatprep.subr.bf16.mxu0 %v4920_v62  ;;  %v4959_v50 = vld [vmem:[#allocation2 + $0x2b0] sm:$0xff]  ;;  %v4962_v62 = vld [vmem:[#allocation2 + $0x2c8] sm:$0xff] }
 0x758   :  { %5149 = vmatpush1.bf16.msra.mxu1 %v4917_v51  ;;  %5313 = vmatpush1.bf16.msra.mxu0 %v4919_v53  ;;  %v4964_v51 = vld [vmem:[#allocation2 + $0x2d8] sm:$0xff]  ;;  %v4961_v53 = vld [vmem:[#allocation2 + $0x2c0] sm:$0xff] }
 0x759   :  { %5150 = vmatprep.subr.bf16.mxu1 %v4922_v54  ;;  %5314 = vmatprep.subr.bf16.mxu0 %v4924_v55  ;;  %v4963_v54 = vld [vmem:[#allocation2 + $0x2d0] sm:$0xff]  ;;  %v4966_v55 = vld [vmem:[#allocation2 + $0x2e8] sm:$0xff] }
 0x75c   :  { %5151 = vmatpush1.bf16.msra.mxu1 %v4921_v56  ;;  %5315 = vmatpush1.bf16.msra.mxu0 %v4923_v57  ;;  %v4968_v56 = vld [vmem:[#allocation2 + $0x2f8] sm:$0xff]  ;;  %v4965_v57 = vld [vmem:[#allocation2 + $0x2e0] sm:$0xff] }
 0x75d   :  { %5152 = vmatprep.subr.bf16.mxu1 %v4926_v58  ;;  %5316 = vmatprep.subr.bf16.mxu0 %v4928_v60  ;;  %v4967_v58 = vld [vmem:[#allocation2 + $0x2f0] sm:$0xff]  ;;  %v4970_v60 = vld [vmem:[#allocation2 + $0x308] sm:$0xff] }
 0x760   :  { %5153 = vmatpush1.bf16.msra.mxu1 %v4925_v63  ;;  %5317 = vmatpush1.bf16.msra.mxu0 %v4927_v0  ;;  %v4972_v63 = vld [vmem:[#allocation2 + $0x318] sm:$0xff]  ;;  %v4969_v0 = vld [vmem:[#allocation2 + $0x300] sm:$0xff] }
 0x761   :  { %5154 = vmatprep.subr.bf16.mxu1 %v4930_v1  ;;  %5318 = vmatprep.subr.bf16.mxu0 %v4932_v38  ;;  %v4971_v1 = vld [vmem:[#allocation2 + $0x310] sm:$0xff]  ;;  %v4974_v38 = vld [vmem:[#allocation2 + $0x328] sm:$0xff] }
 0x764   :  { %5155 = vmatpush1.bf16.msra.mxu1 %v4929_v5  ;;  %5319 = vmatpush1.bf16.msra.mxu0 %v4931_v8  ;;  %v4976_v5 = vld [vmem:[#allocation2 + $0x338] sm:$0xff]  ;;  %v4973_v8 = vld [vmem:[#allocation2 + $0x320] sm:$0xff] }
 0x765   :  { %5156 = vmatprep.subr.bf16.mxu1 %v4934_v10  ;;  %5320 = vmatprep.subr.bf16.mxu0 %v4936_v11  ;;  %v4975_v10 = vld [vmem:[#allocation2 + $0x330] sm:$0xff]  ;;  %v4978_v11 = vld [vmem:[#allocation2 + $0x348] sm:$0xff] }
 0x768   :  { %5157 = vmatpush1.bf16.msra.mxu1 %v4933_v14  ;;  %5321 = vmatpush1.bf16.msra.mxu0 %v4935_v17  ;;  %v4980_v14 = vld [vmem:[#allocation2 + $0x358] sm:$0xff]  ;;  %v4977_v17 = vld [vmem:[#allocation2 + $0x340] sm:$0xff] }
 0x769   :  { %5167 = vmatprep.subr.bf16.mxu1 %v4938_v18  ;;  %5331 = vmatprep.subr.bf16.mxu0 %v4940_v19  ;;  %v4979_v18 = vld [vmem:[#allocation2 + $0x350] sm:$0xff]  ;;  %v4982_v19 = vld [vmem:[#allocation2 + $0x368] sm:$0xff] }
 0x76b   :  { %5159 = vmatmul.mubr.bf16.vlgmr.msra.gmra.mrb[36].mxu1 %v5097_v4  ;;  %5323 = vmatmul.mubr.bf16.vlgmr.msra.gmra.mrb[16].mxu0 %v5097_v4  ;;  %v4984_v4 = vld [vmem:[#allocation2 + $0x378] sm:$0xff] }
 0x76c   :  { %5168 = vmatpush1.bf16.msra.mxu1 %v4937_v21  ;;  %5332 = vmatpush1.bf16.msra.mxu0 %v4939_v49  ;;  %v4981_v21 = vld [vmem:[#allocation2 + $0x360] sm:$0xff]  ;;  %v4983_v49 = vld [vmem:[#allocation2 + $0x370] sm:$0xff] }
 0x76d   :  { %5169 = vmatprep.subr.bf16.mxu1 %v4942_v25  ;;  %5333 = vmatprep.subr.bf16.mxu0 %v4944_v52  ;;  %v4986_v25 = vld [vmem:[#allocation2 + $0x388] sm:$0xff]  ;;  %v4988_v52 = vld [vmem:[#allocation2 + $0x398] sm:$0xff] }
 0x76e   :  { %5199 = vmatprep.mubr.bf16.mxu1 %v5100_v6  ;;  %5363 = vmatprep.mubr.bf16.mxu0 %v5100_v6  ;;  %v4985_v6 = vld [vmem:[#allocation2 + $0x380] sm:$0xff] }
 0x770   :  { %5170 = vmatpush1.bf16.msra.mxu1 %v4941_v28  ;;  %5334 = vmatpush1.bf16.msra.mxu0 %v4943_v7  ;;  %v4987_v28 = vld [vmem:[#allocation2 + $0x390] sm:$0xff]  ;;  %v4990_v7 = vld [vmem:[#allocation2 + $0x3a8] sm:$0xff] }
 0x771   :  { %5171 = vmatprep.subr.bf16.mxu1 %v4946_v13  ;;  %5335 = vmatprep.subr.bf16.mxu0 %v4948_v31  ;;  %v4992_v13 = vld [vmem:[#allocation2 + $0x3b8] sm:$0xff]  ;;  %v4989_v31 = vld [vmem:[#allocation2 + $0x3a0] sm:$0xff] }
 0x774   :  { %5172 = vmatpush1.bf16.msra.mxu1 %v4945_v33  ;;  %5336 = vmatpush1.bf16.msra.mxu0 %v4947_v34  ;;  %v4991_v33 = vld [vmem:[#allocation2 + $0x3b0] sm:$0xff]  ;;  %v4994_v34 = vld [vmem:[#allocation2 + $0x3c8] sm:$0xff] }
 0x775   :  { %5173 = vmatprep.subr.bf16.mxu1 %v4950_v23  ;;  %5337 = vmatprep.subr.bf16.mxu0 %v4952_v27  ;;  %v4996_v23 = vld [vmem:[#allocation2 + $0x3d8] sm:$0xff]  ;;  %v4993_v27 = vld [vmem:[#allocation2 + $0x3c0] sm:$0xff] }
 0x778   :  { %5174 = vmatpush1.bf16.msra.mxu1 %v4949_v36  ;;  %5338 = vmatpush1.bf16.msra.mxu0 %v4951_v37  ;;  %v4995_v36 = vld [vmem:[#allocation2 + $0x3d0] sm:$0xff]  ;;  %v4998_v37 = vld [vmem:[#allocation2 + $0x3e8] sm:$0xff] }
 0x779   :  { %5175 = vmatprep.subr.bf16.mxu1 %v4954_v40  ;;  %5339 = vmatprep.subr.bf16.mxu0 %v4956_v41  ;;  %v5000_v40 = vld [vmem:[#allocation2 + $0x3f8] sm:$0xff]  ;;  %v4997_v41 = vld [vmem:[#allocation2 + $0x3e0] sm:$0xff] }
 0x77c   :  { %5176 = vmatpush1.bf16.msra.mxu1 %v4953_v44  ;;  %5340 = vmatpush1.bf16.msra.mxu0 %v4955_v45  ;;  %v4999_v44 = vld [vmem:[#allocation2 + $0x3f0] sm:$0xff]  ;;  %v5002_v45 = vld [vmem:[#allocation2 + $0x408] sm:$0xff] }
 0x77d   :  { %5177 = vmatprep.subr.bf16.mxu1 %v4958_v22  ;;  %5341 = vmatprep.subr.bf16.mxu0 %v4960_v47  ;;  %v5004_v22 = vld [vmem:[#allocation2 + $0x418] sm:$0xff]  ;;  %v5099_v47 = vpack.c.bf16 %v4864_v24, %v4864_v24  ;;  %v5007_v24 = vld [vmem:[#allocation2 + $0x430] sm:$0xff] }
 0x780   :  { %5178 = vmatpush1.bf16.msra.mxu1 %v4957_v48  ;;  %5342 = vmatpush1.bf16.msra.mxu0 %v4959_v50  ;;  %v5001_v48 = vld [vmem:[#allocation2 + $0x400] sm:$0xff]  ;;  %v5003_v50 = vld [vmem:[#allocation2 + $0x410] sm:$0xff] }
 0x781   :  { %5179 = vmatprep.subr.bf16.mxu1 %v4962_v62  ;;  %5343 = vmatprep.subr.bf16.mxu0 %v4964_v51  ;;  %v5006_v62 = vld [vmem:[#allocation2 + $0x428] sm:$0xff]  ;;  %v5008_v51 = vld [vmem:[#allocation2 + $0x438] sm:$0xff] }
 0x784   :  { %5180 = vmatpush1.bf16.msra.mxu1 %v4961_v53  ;;  %5344 = vmatpush1.bf16.msra.mxu0 %v4963_v54  ;;  %v5102_v53 = vpack.c.bf16 %v4867_v35, %v4867_v35  ;;  %v5010_v54 = vld [vmem:[#allocation2 + $0x448] sm:$0xff]  ;;  %v5016_v35 = vld [vmem:[#allocation2 + $0x478] sm:$0xff] }
 0x785   :  { %5181 = vmatprep.subr.bf16.mxu1 %v4966_v55  ;;  %5345 = vmatprep.subr.bf16.mxu0 %v4968_v56  ;;  %v5012_v55 = vld [vmem:[#allocation2 + $0x458] sm:$0xff]  ;;  %v5009_v56 = vld [vmem:[#allocation2 + $0x440] sm:$0xff] }
 0x788   :  { %5182 = vmatpush1.bf16.msra.mxu1 %v4965_v57  ;;  %5346 = vmatpush1.bf16.msra.mxu0 %v4967_v58  ;;  %v5014_v57 = vld [vmem:[#allocation2 + $0x468] sm:$0xff]  ;;  %v5013_v58 = vld [vmem:[#allocation2 + $0x460] sm:$0xff] }
 0x789   :  { %5183 = vmatprep.subr.bf16.mxu1 %v4970_v60  ;;  %5347 = vmatprep.subr.bf16.mxu0 %v4972_v63  ;;  %v5015_v60 = vld [vmem:[#allocation2 + $0x470] sm:$0xff]  ;;  %v5018_v63 = vld [vmem:[#allocation2 + $0x488] sm:$0xff] }
 0x78c   :  { %5184 = vmatpush1.bf16.msra.mxu1 %v4969_v0  ;;  %5348 = vmatpush1.bf16.msra.mxu0 %v4971_v1  ;;  %v5020_v0 = vld [vmem:[#allocation2 + $0x498] sm:$0xff]  ;;  %v5017_v1 = vld [vmem:[#allocation2 + $0x480] sm:$0xff] }
 0x78d   :  { %5185 = vmatprep.subr.bf16.mxu1 %v4974_v38  ;;  %5349 = vmatprep.subr.bf16.mxu0 %v4976_v5  ;;  %v5019_v38 = vld [vmem:[#allocation2 + $0x490] sm:$0xff]  ;;  %v5022_v5 = vld [vmem:[#allocation2 + $0x4a8] sm:$0xff] }
 0x790   :  { %5186 = vmatpush1.bf16.msra.mxu1 %v4973_v8  ;;  %5350 = vmatpush1.bf16.msra.mxu0 %v4975_v10  ;;  %v5024_v8 = vld [vmem:[#allocation2 + $0x4b8] sm:$0xff]  ;;  %v5021_v10 = vld [vmem:[#allocation2 + $0x4a0] sm:$0xff] }
 0x791   :  { %5187 = vmatprep.subr.bf16.mxu1 %v4978_v11  ;;  %5351 = vmatprep.subr.bf16.mxu0 %v4980_v14  ;;  %v5023_v11 = vld [vmem:[#allocation2 + $0x4b0] sm:$0xff]  ;;  %v5026_v14 = vld [vmem:[#allocation2 + $0x4c8] sm:$0xff] }
 0x794   :  { %5188 = vmatpush1.bf16.msra.mxu1 %v4977_v17  ;;  %5352 = vmatpush1.bf16.msra.mxu0 %v4979_v18  ;;  %v5028_v17 = vld [vmem:[#allocation2 + $0x4d8] sm:$0xff]  ;;  %v5025_v18 = vld [vmem:[#allocation2 + $0x4c0] sm:$0xff] }
 0x795   :  { %5189 = vmatprep.subr.bf16.mxu1 %v4982_v19  ;;  %5353 = vmatprep.subr.bf16.mxu0 %v4984_v4  ;;  %v5027_v19 = vld [vmem:[#allocation2 + $0x4d0] sm:$0xff]  ;;  %v5030_v4 = vld [vmem:[#allocation2 + $0x4e8] sm:$0xff] }
 0x798   :  { %5190 = vmatpush1.bf16.msra.mxu1 %v4981_v21  ;;  %5354 = vmatpush1.bf16.msra.mxu0 %v4983_v49  ;;  %v5032_v21 = vld [vmem:[#allocation2 + $0x4f8] sm:$0xff]  ;;  %v5029_v49 = vld [vmem:[#allocation2 + $0x4e0] sm:$0xff] }
 0x799   :  { %5191 = vmatprep.subr.bf16.mxu1 %v4986_v25  ;;  %5355 = vmatprep.subr.bf16.mxu0 %v4988_v52  ;;  %v5031_v25 = vld [vmem:[#allocation2 + $0x4f0] sm:$0xff]  ;;  %v5034_v52 = vld [vmem:[#allocation2 + $0x508] sm:$0xff] }
 0x79c   :  { %5192 = vmatpush1.bf16.msra.mxu1 %v4985_v6  ;;  %5356 = vmatpush1.bf16.msra.mxu0 %v4987_v28  ;;  %v5036_v6 = vld [vmem:[#allocation2 + $0x518] sm:$0xff]  ;;  %v5033_v28 = vld [vmem:[#allocation2 + $0x500] sm:$0xff] }
 0x79d   :  { %5193 = vmatprep.subr.bf16.mxu1 %v4990_v7  ;;  %5357 = vmatprep.subr.bf16.mxu0 %v4992_v13  ;;  %v5035_v7 = vld [vmem:[#allocation2 + $0x510] sm:$0xff]  ;;  %v5038_v13 = vld [vmem:[#allocation2 + $0x528] sm:$0xff] }
 0x7a0   :  { %5194 = vmatpush1.bf16.msra.mxu1 %v4989_v31  ;;  %5358 = vmatpush1.bf16.msra.mxu0 %v4991_v33  ;;  %v5040_v31 = vld [vmem:[#allocation2 + $0x538] sm:$0xff]  ;;  %v5037_v33 = vld [vmem:[#allocation2 + $0x520] sm:$0xff] }
 0x7a1   :  { %5195 = vmatprep.subr.bf16.mxu1 %v4994_v34  ;;  %5359 = vmatprep.subr.bf16.mxu0 %v4996_v23  ;;  %v5039_v34 = vld [vmem:[#allocation2 + $0x530] sm:$0xff]  ;;  %v5042_v23 = vld [vmem:[#allocation2 + $0x548] sm:$0xff] }
 0x7a4   :  { %5196 = vmatpush1.bf16.msra.mxu1 %v4993_v27  ;;  %5360 = vmatpush1.bf16.msra.mxu0 %v4995_v36  ;;  %v5044_v27 = vld [vmem:[#allocation2 + $0x558] sm:$0xff]  ;;  %v5041_v36 = vld [vmem:[#allocation2 + $0x540] sm:$0xff] }
 0x7a5   :  { %5197 = vmatprep.subr.bf16.mxu1 %v4998_v37  ;;  %5361 = vmatprep.subr.bf16.mxu0 %v5000_v40  ;;  %v5043_v37 = vld [vmem:[#allocation2 + $0x550] sm:$0xff]  ;;  %v5046_v40 = vld [vmem:[#allocation2 + $0x568] sm:$0xff] }
 0x7a8   :  { %5198 = vmatpush1.bf16.msra.mxu1 %v4997_v41  ;;  %5362 = vmatpush1.bf16.msra.mxu0 %v4999_v44  ;;  %v5048_v41 = vld [vmem:[#allocation2 + $0x578] sm:$0xff]  ;;  %v5045_v44 = vld [vmem:[#allocation2 + $0x560] sm:$0xff] }
 0x7a9   :  { %5208 = vmatprep.subr.bf16.mxu1 %v5002_v45  ;;  %5372 = vmatprep.subr.bf16.mxu0 %v5004_v22  ;;  %v5047_v45 = vld [vmem:[#allocation2 + $0x570] sm:$0xff]  ;;  %v5050_v22 = vld [vmem:[#allocation2 + $0x588] sm:$0xff] }
 0x7ab   :  { %5200 = vmatmul.mubr.bf16.vlgmr.msra.gmra.mrb[36].mxu1 %v5099_v47  ;;  %5364 = vmatmul.mubr.bf16.vlgmr.msra.gmra.mrb[16].mxu0 %v5099_v47  ;;  %v5052_v47 = vld [vmem:[#allocation2 + $0x598] sm:$0xff] }
 0x7ac   :  { %5209 = vmatpush1.bf16.msra.mxu1 %v5001_v48  ;;  %5373 = vmatpush1.bf16.msra.mxu0 %v5003_v50  ;;  %v5049_v48 = vld [vmem:[#allocation2 + $0x580] sm:$0xff]  ;;  %v5051_v50 = vld [vmem:[#allocation2 + $0x590] sm:$0xff] }
 0x7ad   :  { %5210 = vmatprep.subr.bf16.mxu1 %v5006_v62  ;;  %5374 = vmatprep.subr.bf16.mxu0 %v5008_v51  ;;  %v5054_v62 = vld [vmem:[#allocation2 + $0x5a8] sm:$0xff]  ;;  %v5056_v51 = vld [vmem:[#allocation2 + $0x5b8] sm:$0xff] }
 0x7ae   :  { %5240 = vmatprep.mubr.bf16.mxu1 %v5102_v53  ;;  %5404 = vmatprep.mubr.bf16.mxu0 %v5102_v53  ;;  %v5053_v53 = vld [vmem:[#allocation2 + $0x5a0] sm:$0xff] }
 0x7b0   :  { %5211 = vmatpush1.bf16.msra.mxu1 %v5005_v20  ;;  %5375 = vmatpush1.bf16.msra.mxu0 %v5007_v24  ;;  %v5055_v20 = vld [vmem:[#allocation2 + $0x5b0] sm:$0xff]  ;;  %v5058_v24 = vld [vmem:[#allocation2 + $0x5c8] sm:$0xff] }
 0x7b1   :  { %5212 = vmatprep.subr.bf16.mxu1 %v5010_v54  ;;  %5376 = vmatprep.subr.bf16.mxu0 %v5012_v55  ;;  %v5060_v54 = vld [vmem:[#allocation2 + $0x5d8] sm:$0xff]  ;;  %v5057_v55 = vld [vmem:[#allocation2 + $0x5c0] sm:$0xff] }
 0x7b4   :  { %5213 = vmatpush1.bf16.msra.mxu1 %v5009_v56  ;;  %5377 = vmatpush1.bf16.msra.mxu0 %v5011_v32  ;;  %v5059_v56 = vld [vmem:[#allocation2 + $0x5d0] sm:$0xff]  ;;  %v5062_v32 = vld [vmem:[#allocation2 + $0x5e8] sm:$0xff] }
 0x7b5   :  { %5214 = vmatprep.subr.bf16.mxu1 %v5014_v57  ;;  %5378 = vmatprep.subr.bf16.mxu0 %v5016_v35  ;;  %v5064_v57 = vld [vmem:[#allocation2 + $0x5f8] sm:$0xff]  ;;  %v5061_v35 = vld [vmem:[#allocation2 + $0x5e0] sm:$0xff] }
 0x7b8   :  { %5215 = vmatpush1.bf16.msra.mxu1 %v5013_v58  ;;  %5379 = vmatpush1.bf16.msra.mxu0 %v5015_v60  ;;  %v5063_v58 = vld [vmem:[#allocation2 + $0x5f0] sm:$0xff]  ;;  %v5066_v60 = vld [vmem:[#allocation2 + $0x608] sm:$0xff] }
 0x7b9   :  { %5216 = vmatprep.subr.bf16.mxu1 %v5018_v63  ;;  %5380 = vmatprep.subr.bf16.mxu0 %v5020_v0  ;;  %v5068_v63 = vld [vmem:[#allocation2 + $0x618] sm:$0xff]  ;;  %v5101_v0 = vpack.c.bf16 %v4866_v26, %v4866_v26  ;;  %v5073_v26 = vld [vmem:[#allocation2 + $0x640] sm:$0xff] }
 0x7bc   :  { %5217 = vmatpush1.bf16.msra.mxu1 %v5017_v1  ;;  %5381 = vmatpush1.bf16.msra.mxu0 %v5019_v38  ;;  %v5065_v1 = vld [vmem:[#allocation2 + $0x600] sm:$0xff]  ;;  %v5067_v38 = vld [vmem:[#allocation2 + $0x610] sm:$0xff] }
 0x7bd   :  { %5218 = vmatprep.subr.bf16.mxu1 %v5022_v5  ;;  %5382 = vmatprep.subr.bf16.mxu0 %v5024_v8  ;;  %v5070_v5 = vld [vmem:[#allocation2 + $0x628] sm:$0xff]  ;;  %v5072_v8 = vld [vmem:[#allocation2 + $0x638] sm:$0xff] }
 0x7c0   :  { %5219 = vmatpush1.bf16.msra.mxu1 %v5021_v10  ;;  %5383 = vmatpush1.bf16.msra.mxu0 %v5023_v11  ;;  %v5069_v10 = vld [vmem:[#allocation2 + $0x620] sm:$0xff]  ;;  %v5071_v11 = vld [vmem:[#allocation2 + $0x630] sm:$0xff] }
 0x7c1   :  { %5220 = vmatprep.subr.bf16.mxu1 %v5026_v14  ;;  %5384 = vmatprep.subr.bf16.mxu0 %v5028_v17  ;;  %v5074_v14 = vld [vmem:[#allocation2 + $0x648] sm:$0xff]  ;;  %v5075_v17 = vld [vmem:[#allocation2 + $0x650] sm:$0xff] }
 0x7c4   :  { %5221 = vmatpush1.bf16.msra.mxu1 %v5025_v18  ;;  %5385 = vmatpush1.bf16.msra.mxu0 %v5027_v19  ;;  %v5078_v18 = vld [vmem:[#allocation2 + $0x668] sm:$0xff]  ;;  %v5080_v19 = vld [vmem:[#allocation2 + $0x678] sm:$0xff] }
 0x7c5   :  { %5222 = vmatprep.subr.bf16.mxu1 %v5030_v4  ;;  %5386 = vmatprep.subr.bf16.mxu0 %v5032_v21  ;;  %v5077_v4 = vld [vmem:[#allocation2 + $0x660] sm:$0xff]  ;;  %v5079_v21 = vld [vmem:[#allocation2 + $0x670] sm:$0xff] }
 0x7c8   :  { %5223 = vmatpush1.bf16.msra.mxu1 %v5029_v49  ;;  %5387 = vmatpush1.bf16.msra.mxu0 %v5031_v25  ;;  %v5082_v49 = vld [vmem:[#allocation2 + $0x688] sm:$0xff]  ;;  %v5084_v25 = vld [vmem:[#allocation2 + $0x698] sm:$0xff] }
 0x7c9   :  { %5224 = vmatprep.subr.bf16.mxu1 %v5034_v52  ;;  %5388 = vmatprep.subr.bf16.mxu0 %v5036_v6  ;;  %v5083_v52 = vld [vmem:[#allocation2 + $0x690] sm:$0xff]  ;;  %v5086_v6 = vld [vmem:[#allocation2 + $0x6a8] sm:$0xff] }
 0x7cc   :  { %5225 = vmatpush1.bf16.msra.mxu1 %v5033_v28  ;;  %5389 = vmatpush1.bf16.msra.mxu0 %v5035_v7  ;;  %v5088_v28 = vld [vmem:[#allocation2 + $0x6b8] sm:$0xff]  ;;  %v5085_v7 = vld [vmem:[#allocation2 + $0x6a0] sm:$0xff] }
 0x7cd   :  { %5226 = vmatprep.subr.bf16.mxu1 %v5038_v13  ;;  %5390 = vmatprep.subr.bf16.mxu0 %v5040_v31  ;;  %v5087_v13 = vld [vmem:[#allocation2 + $0x6b0] sm:$0xff]  ;;  %v5090_v31 = vld [vmem:[#allocation2 + $0x6c8] sm:$0xff] }
 0x7d0   :  { %5227 = vmatpush1.bf16.msra.mxu1 %v5037_v33  ;;  %5391 = vmatpush1.bf16.msra.mxu0 %v5039_v34  ;;  %v5092_v33 = vld [vmem:[#allocation2 + $0x6d8] sm:$0xff]  ;;  %v5089_v34 = vld [vmem:[#allocation2 + $0x6c0] sm:$0xff] }
 0x7d1   :  { %5228 = vmatprep.subr.bf16.mxu1 %v5042_v23  ;;  %5392 = vmatprep.subr.bf16.mxu0 %v5044_v27  ;;  %v5091_v23 = vld [vmem:[#allocation2 + $0x6d0] sm:$0xff]  ;;  %v5094_v27 = vld [vmem:[#allocation2 + $0x6e8] sm:$0xff] }
 0x7d4   :  { %5229 = vmatpush1.bf16.msra.mxu1 %v5041_v36  ;;  %5393 = vmatpush1.bf16.msra.mxu0 %v5043_v37  ;;  %v5096_v36 = vld [vmem:[#allocation2 + $0x6f8] sm:$0xff]  ;;  %v5093_v37 = vld [vmem:[#allocation2 + $0x6e0] sm:$0xff] }
 0x7d5   :  { %5230 = vmatprep.subr.bf16.mxu1 %v5046_v40  ;;  %5394 = vmatprep.subr.bf16.mxu0 %v5048_v41  ;;  %v5095_v40 = vld [vmem:[#allocation2 + $0x6f0] sm:$0xff]  ;;  %v8010_v41 = vld [vmem:[#allocation13 + $0x4] ss:$8 sps:$4 sm:$0xff]  }
 0x7d8   :  { %5231 = vmatpush1.bf16.msra.mxu1 %v5045_v44  ;;  %5395 = vmatpush1.bf16.msra.mxu0 %v5047_v45  ;;  %v5103_v44 = vpack.c.bf16 %v4868_v42, %v4868_v42  ;;  %v8008_v45 = vld [vmem:[#allocation13] ss:$8 sps:$4 sm:$0xff]  }
 0x7d9   :  { %5232 = vmatprep.subr.bf16.mxu1 %v5050_v22  ;;  %5396 = vmatprep.subr.bf16.mxu0 %v5052_v47  ;;  %v8013_v22 = vld [vmem:[#allocation13 + $0x14] ss:$8 sps:$4 sm:$0xff]   ;;  %v8011_v47 = vld [vmem:[#allocation13 + $0x10] ss:$8 sps:$4 sm:$0xff]   ;;  %v8020_v42 = vld [vmem:[#allocation13 + $0x40] ss:$8 sps:$4 sm:$0xff]  }
 0x7dc   :  { %5233 = vmatpush1.bf16.msra.mxu1 %v5049_v48  ;;  %5397 = vmatpush1.bf16.msra.mxu0 %v5051_v50  ;;  %v8016_v48 = vld [vmem:[#allocation13 + $0x24] ss:$8 sps:$4 sm:$0xff]   ;;  %v8014_v50 = vld [vmem:[#allocation13 + $0x20] ss:$8 sps:$4 sm:$0xff]  }
 0x7dd   :  { %5234 = vmatprep.subr.bf16.mxu1 %v5054_v62  ;;  %5398 = vmatprep.subr.bf16.mxu0 %v5056_v51  ;;  %v8019_v62 = vld [vmem:[#allocation13 + $0x34] ss:$8 sps:$4 sm:$0xff]   ;;  %v8017_v51 = vld [vmem:[#allocation13 + $0x30] ss:$8 sps:$4 sm:$0xff]  }
 0x7e0   :  { %5235 = vmatpush1.bf16.msra.mxu1 %v5053_v53  ;;  %5399 = vmatpush1.bf16.msra.mxu0 %v5055_v20  ;;  %v8025_v53 = vld [vmem:[#allocation13 + $0x54] ss:$8 sps:$4 sm:$0xff]   ;;  %v8023_v20 = vld [vmem:[#allocation13 + $0x50] ss:$8 sps:$4 sm:$0xff]  }
 0x7e1   :  { %5236 = vmatprep.subr.bf16.mxu1 %v5058_v24  ;;  %5400 = vmatprep.subr.bf16.mxu0 %v5060_v54  ;;  %v8028_v24 = vld [vmem:[#allocation13 + $0x64] ss:$8 sps:$4 sm:$0xff]   ;;  %v8026_v54 = vld [vmem:[#allocation13 + $0x60] ss:$8 sps:$4 sm:$0xff]  }
 0x7e4   :  { %5237 = vmatpush1.bf16.msra.mxu1 %v5057_v55  ;;  %5401 = vmatpush1.bf16.msra.mxu0 %v5059_v56  ;;  %v8031_v55 = vld [vmem:[#allocation13 + $0x74] ss:$8 sps:$4 sm:$0xff]   ;;  %v8029_v56 = vld [vmem:[#allocation13 + $0x70] ss:$8 sps:$4 sm:$0xff]  }
 0x7e5   :  { %5238 = vmatprep.subr.bf16.mxu1 %v5062_v32  ;;  %5402 = vmatprep.subr.bf16.mxu0 %v5064_v57  ;;  %v8034_v32 = vld [vmem:[#allocation13 + $0x84] ss:$8 sps:$4 sm:$0xff]   ;;  %v8032_v57 = vld [vmem:[#allocation13 + $0x80] ss:$8 sps:$4 sm:$0xff]  }
 0x7e8   :  { %5239 = vmatpush1.bf16.msra.mxu1 %v5061_v35  ;;  %5403 = vmatpush1.bf16.msra.mxu0 %v5063_v58  ;;  %v8037_v35 = vld [vmem:[#allocation13 + $0x94] ss:$8 sps:$4 sm:$0xff]   ;;  %v8035_v58 = vld [vmem:[#allocation13 + $0x90] ss:$8 sps:$4 sm:$0xff]  }
 0x7e9   :  { %5249 = vmatprep.subr.bf16.mxu1 %v5066_v60  ;;  %5413 = vmatprep.subr.bf16.mxu0 %v5068_v63  ;;  %v8040_v60 = vld [vmem:[#allocation13 + $0xa4] ss:$8 sps:$4 sm:$0xff]   ;;  %v8038_v63 = vld [vmem:[#allocation13 + $0xa0] ss:$8 sps:$4 sm:$0xff]  }
 0x7eb   :  { %5241 = vmatmul.mubr.bf16.vlgmr.msra.gmra.mrb[36].mxu1 %v5101_v0  ;;  %5405 = vmatmul.mubr.bf16.vlgmr.msra.gmra.mrb[16].mxu0 %v5101_v0  ;;  %v8043_v0 = vld [vmem:[#allocation13 + $0xb4] ss:$8 sps:$4 sm:$0xff]  }
 0x7ec   :  { %5250 = vmatpush1.bf16.msra.mxu1 %v5065_v1  ;;  %5414 = vmatpush1.bf16.msra.mxu0 %v5067_v38  ;;  %v8041_v1 = vld [vmem:[#allocation13 + $0xb0] ss:$8 sps:$4 sm:$0xff]   ;;  %v8046_v38 = vld [vmem:[#allocation13 + $0xc4] ss:$8 sps:$4 sm:$0xff]  }
 0x7ed   :  { %5251 = vmatprep.subr.bf16.mxu1 %v5070_v5  ;;  %5415 = vmatprep.subr.bf16.mxu0 %v5072_v8  ;;  %v8044_v5 = vld [vmem:[#allocation13 + $0xc0] ss:$8 sps:$4 sm:$0xff]   ;;  %v8049_v8 = vld [vmem:[#allocation13 + $0xd4] ss:$8 sps:$4 sm:$0xff]  }
 0x7ee   :  { %5281 = vmatprep.mubr.bf16.mxu1 %v8271_v3  ;;  %5445 = vmatprep.mubr.bf16.mxu0 %v8271_v3  ;;  %v5081_v3 = vld [vmem:[#allocation2 + $0x680] sm:$0xff] }
 0x7f0   :  { %5252 = vmatpush1.bf16.msra.mxu1 %v5069_v10  ;;  %5416 = vmatpush1.bf16.msra.mxu0 %v5071_v11  ;;  %v8047_v10 = vld [vmem:[#allocation13 + $0xd0] ss:$8 sps:$4 sm:$0xff]   ;;  %v8052_v11 = vld [vmem:[#allocation13 + $0xe4] ss:$8 sps:$4 sm:$0xff]  }
 0x7f1   :  { %5253 = vmatprep.subr.bf16.mxu1 %v5074_v14  ;;  %5417 = vmatprep.subr.bf16.mxu0 %v5076_v30  ;;  %v8050_v14 = vld [vmem:[#allocation13 + $0xe0] ss:$8 sps:$4 sm:$0xff]   ;;  %v8055_v30 = vld [vmem:[#allocation13 + $0xf4] ss:$8 sps:$4 sm:$0xff]  }
 0x7f4   :  { %5254 = vmatpush1.bf16.msra.mxu1 %v5073_v26  ;;  %5418 = vmatpush1.bf16.msra.mxu0 %v5075_v17  ;;  %v8053_v26 = vld [vmem:[#allocation13 + $0xf0] ss:$8 sps:$4 sm:$0xff]   ;;  %v8058_v17 = vld [vmem:[#allocation13 + $0x104] ss:$8 sps:$4 sm:$0xff]  }
 0x7f5   :  { %5255 = vmatprep.subr.bf16.mxu1 %v5078_v18  ;;  %5419 = vmatprep.subr.bf16.mxu0 %v5080_v19  ;;  %v8667_v18 = vld [vmem:[%s8759_s13] sm:$0xf] }
 0x7f6   :  { %v5109_v19 = vrot.slane %v8667_v18, %v8501_v12 }
 0x7f8   :  { %5256 = vmatpush1.bf16.msra.mxu1 %v5077_v4  ;;  %5420 = vmatpush1.bf16.msra.mxu0 %v5079_v21  ;;  %v5113_v4 = vrot.slane %v8667_v18, %v8507_v15  ;;  %v5121_v21 = vrot.slane %v8667_v18, %v8536_v46 }
 0x7f9   :  { %5257 = vmatprep.subr.bf16.mxu1 %v5082_v49  ;;  %5421 = vmatprep.subr.bf16.mxu0 %v5084_v25 }
 0x7fc   :  { %5258 = vmatpush1.bf16.msra.mxu1 %v5081_v3  ;;  %5422 = vmatpush1.bf16.msra.mxu0 %v5083_v52 }
 0x7fd   :  { %5259 = vmatprep.subr.bf16.mxu1 %v5086_v6  ;;  %5423 = vmatprep.subr.bf16.mxu0 %v5088_v28 }
 0x800   :  { %5260 = vmatpush1.bf16.msra.mxu1 %v5085_v7  ;;  %5424 = vmatpush1.bf16.msra.mxu0 %v5087_v13 }
 0x801   :  { %5261 = vmatprep.subr.bf16.mxu1 %v5090_v31  ;;  %5425 = vmatprep.subr.bf16.mxu0 %v5092_v33 }
 0x804   :  { %5262 = vmatpush1.bf16.msra.mxu1 %v5089_v34  ;;  %5426 = vmatpush1.bf16.msra.mxu0 %v5091_v23 }
 0x805   :  { %5263 = vmatprep.subr.bf16.mxu1 %v5094_v27  ;;  %5427 = vmatprep.subr.bf16.mxu0 %v5096_v36 }
 0x808   :  { %5264 = vmatpush1.bf16.msra.mxu1 %v5093_v37  ;;  %5428 = vmatpush1.bf16.msra.mxu0 %v5095_v40  ;;  %v8056_v40 = vld [vmem:[#allocation13 + $0x100] ss:$8 sps:$4 sm:$0xff]  }
 0x809   :  { %5858 = vmatprep.subr.bf16.mxu1 %v8010_v41 }
 0x80b   :  { %5282 = vmatmul.mubr.bf16.vlgmr.msra.gmra.mrb[36].mxu1 %v5103_v44  ;;  %5446 = vmatmul.mubr.bf16.vlgmr.msra.gmra.mrb[16].mxu0 %v5103_v44  ;;  %v8061_v44 = vld [vmem:[#allocation13 + $0x114] ss:$8 sps:$4 sm:$0xff]  }
 0x80c   :  { %5859 = vmatpush1.bf16.msra.mxu1 %v8008_v45 }
 0x80d   :  { %5860 = vmatprep.subr.bf16.mxu1 %v8013_v22  ;;  %v8059_v22 = vld [vmem:[#allocation13 + $0x110] ss:$8 sps:$4 sm:$0xff]  }
 0x810   :  { %5861 = vmatpush1.bf16.msra.mxu1 %v8011_v47  ;;  %v8064_v47 = vld [vmem:[#allocation13 + $0x124] ss:$8 sps:$4 sm:$0xff]  }
 0x811   :  { %5862 = vmatprep.subr.bf16.mxu1 %v8016_v48  ;;  %v8062_v48 = vld [vmem:[#allocation13 + $0x120] ss:$8 sps:$4 sm:$0xff]  }
 0x814   :  { %5863 = vmatpush1.bf16.msra.mxu1 %v8014_v50  ;;  %v8067_v50 = vld [vmem:[#allocation13 + $0x134] ss:$8 sps:$4 sm:$0xff]  }
 0x815   :  { %5864 = vmatprep.subr.bf16.mxu1 %v8019_v62  ;;  %v8065_v62 = vld [vmem:[#allocation13 + $0x130] ss:$8 sps:$4 sm:$0xff]  }
 0x818   :  { %5865 = vmatpush1.bf16.msra.mxu1 %v8017_v51  ;;  %v8070_v51 = vld [vmem:[#allocation13 + $0x144] ss:$8 sps:$4 sm:$0xff]  }
 0x819   :  { %5866 = vmatprep.subr.bf16.mxu1 %v8022_v39  ;;  %v8068_v39 = vld [vmem:[#allocation13 + $0x140] ss:$8 sps:$4 sm:$0xff]  }
 0x81c   :  { %5867 = vmatpush1.bf16.msra.mxu1 %v8020_v42  ;;  %v8073_v42 = vld [vmem:[#allocation13 + $0x154] ss:$8 sps:$4 sm:$0xff]  }
 0x81d   :  { %5868 = vmatprep.subr.bf16.mxu1 %v8025_v53  ;;  %v8071_v53 = vld [vmem:[#allocation13 + $0x150] ss:$8 sps:$4 sm:$0xff]  }
 0x820   :  { %5869 = vmatpush1.bf16.msra.mxu1 %v8023_v20  ;;  %v8076_v20 = vld [vmem:[#allocation13 + $0x164] ss:$8 sps:$4 sm:$0xff]  }
 0x821   :  { %5870 = vmatprep.subr.bf16.mxu1 %v8028_v24  ;;  %v8074_v24 = vld [vmem:[#allocation13 + $0x160] ss:$8 sps:$4 sm:$0xff]  }
 0x824   :  { %5871 = vmatpush1.bf16.msra.mxu1 %v8026_v54  ;;  %v8079_v54 = vld [vmem:[#allocation13 + $0x174] ss:$8 sps:$4 sm:$0xff]  }
 0x825   :  { %5872 = vmatprep.subr.bf16.mxu1 %v8031_v55  ;;  %v8077_v55 = vld [vmem:[#allocation13 + $0x170] ss:$8 sps:$4 sm:$0xff]  }
 0x828   :  { %5873 = vmatpush1.bf16.msra.mxu1 %v8029_v56  ;;  %v8082_v56 = vld [vmem:[#allocation13 + $0x184] ss:$8 sps:$4 sm:$0xff]  }
 0x829   :  { %5874 = vmatprep.subr.bf16.mxu1 %v8034_v32  ;;  %v8080_v32 = vld [vmem:[#allocation13 + $0x180] ss:$8 sps:$4 sm:$0xff]  }
 0x82c   :  { %5875 = vmatpush1.bf16.msra.mxu1 %v8032_v57  ;;  %v8085_v57 = vld [vmem:[#allocation13 + $0x194] ss:$8 sps:$4 sm:$0xff]  }
 0x82d   :  { %5876 = vmatprep.subr.bf16.mxu1 %v8037_v35  ;;  %v8083_v35 = vld [vmem:[#allocation13 + $0x190] ss:$8 sps:$4 sm:$0xff]  }
 0x830   :  { %5877 = vmatpush1.bf16.msra.mxu1 %v8035_v58  ;;  %v8088_v58 = vld [vmem:[#allocation13 + $0x1a4] ss:$8 sps:$4 sm:$0xff]  }
 0x831   :  { %5878 = vmatprep.subr.bf16.mxu1 %v8040_v60  ;;  %v8086_v60 = vld [vmem:[#allocation13 + $0x1a0] ss:$8 sps:$4 sm:$0xff]  }
 0x834   :  { %5879 = vmatpush1.bf16.msra.mxu1 %v8038_v63  ;;  %v8091_v63 = vld [vmem:[#allocation13 + $0x1b4] ss:$8 sps:$4 sm:$0xff]  }
 0x835   :  { %5880 = vmatprep.subr.bf16.mxu1 %v8043_v0  ;;  %v8089_v0 = vld [vmem:[#allocation13 + $0x1b0] ss:$8 sps:$4 sm:$0xff]  }
 0x838   :  { %5881 = vmatpush1.bf16.msra.mxu1 %v8041_v1  ;;  %v8094_v1 = vld [vmem:[#allocation13 + $0x1c4] ss:$8 sps:$4 sm:$0xff]  }
 0x839   :  { %5882 = vmatprep.subr.bf16.mxu1 %v8046_v38  ;;  %v8092_v38 = vld [vmem:[#allocation13 + $0x1c0] ss:$8 sps:$4 sm:$0xff]  }
 0x83c   :  { %5883 = vmatpush1.bf16.msra.mxu1 %v8044_v5  ;;  %v8097_v5 = vld [vmem:[#allocation13 + $0x1d4] ss:$8 sps:$4 sm:$0xff]  }
 0x83d   :  { %5884 = vmatprep.subr.bf16.mxu1 %v8049_v8  ;;  %v8095_v8 = vld [vmem:[#allocation13 + $0x1d0] ss:$8 sps:$4 sm:$0xff]  }
 0x840   :  { %5885 = vmatpush1.bf16.msra.mxu1 %v8047_v10  ;;  %v5117_v10 = vrot.slane %v8667_v18, %v8533_v43 }
 0x841   :  { %5886 = vmatprep.subr.bf16.mxu1 %v8052_v11  ;;  %v8100_v11 = vld [vmem:[#allocation13 + $0x1e4] ss:$8 sps:$4 sm:$0xff]  }
 0x844   :  { %5887 = vmatpush1.bf16.msra.mxu1 %v8050_v14  ;;  %v8098_v14 = vld [vmem:[#allocation13 + $0x1e0] ss:$8 sps:$4 sm:$0xff]  }
 0x845   :  { %5888 = vmatprep.subr.bf16.mxu1 %v8055_v30 }
 0x848   :  { %5889 = vmatpush1.bf16.msra.mxu1 %v8053_v26  ;;  %v8103_v26 = vld [vmem:[#allocation13 + $0x1f4] ss:$8 sps:$4 sm:$0xff]  }
 0x849   :  { %5899 = vmatprep.subr.bf16.mxu1 %v8058_v17  ;;  %v8101_v17 = vld [vmem:[#allocation13 + $0x1f0] ss:$8 sps:$4 sm:$0xff]  }
 0x8de   :  { %v5283_v49 = vpop.f32.mrb[36].mxu1  ;;  %v8675_v25 = vpop.f32.mrb[16].mxu0 }
 0x8df   :  { %v7054_v3 = vadd.f32 %v5283_v49, %v5109_v19  ;;  %v5285_v52 = vpop.f32.mrb[37].mxu1  ;;  %v5449_v6 = vpop.f32.mrb[17].mxu0  ;;  %v7056_v30 = vadd.f32 %v8675_v25, %v5117_v10 }
 0x8e0   :  { %v7055_v28 = vadd.f32 %v5285_v52, %v5113_v4  ;;  %v7057_v7 = vadd.f32 %v5449_v6, %v5121_v21  ;;  %v5287_v13 = vpop.f32.mrb[38].mxu1  ;;  %v5451_v31 = vpop.f32.mrb[18].mxu0  ;;  %v5526_v21 = vld [vmem:[%s8761_s15] sm:$0x3] }
 0x8e1   :  { %v5454_v33 = vmax.f32 %v7054_v3, 0.0  ;;  %v5288_v34 = vpop.f32.mrb[39].mxu1  ;;  %v5452_v23 = vpop.f32.mrb[19].mxu0  ;;  %v5456_v19 = vmax.f32 %v7056_v30, 0.0  ;;  %v5531_v18 = vrot.slane %v5526_v21, %v8501_v12  ;;  %v5535_v49 = vrot.slane %v5526_v21, %v8507_v15 }
 0x8e2   :  { %v5455_v27 = vmax.f32 %v7055_v28, 0.0  ;;  %v5457_v36 = vmax.f32 %v7057_v7, 0.0 }
 0x8e3   :  { %v5522_v41 = vpack.c.bf16 %v5454_v33, %v5454_v33  ;;  %v5524_v4 = vpack.c.bf16 %v5456_v19, %v5456_v19 }
 0x8e4   :  { %v5523_v37 = vpack.c.bf16 %v5455_v27, %v5455_v27  ;;  %v5525_v45 = vpack.c.bf16 %v5457_v36, %v5457_v36 }
 0x8e6   :  { %5890 = vmatprep.mubr.bf16.mxu1 %v5523_v37 }
 0x8e7   :  { %5891 = vmatmul.mubr.bf16.vlgmr.msra.gmra.mrb[40].mxu1 %v5522_v41 }
 0x8e8   :  { %5900 = vmatpush1.bf16.msra.mxu1 %v8056_v40  ;;  %5931 = vmatprep.mubr.bf16.mxu1 %v5525_v45 }
 0x8e9   :  { %5901 = vmatprep.subr.bf16.mxu1 %v8061_v44 }
 0x8ec   :  { %5902 = vmatpush1.bf16.msra.mxu1 %v8059_v22 }
 0x8ed   :  { %5903 = vmatprep.subr.bf16.mxu1 %v8064_v47 }
 0x8f0   :  { %5904 = vmatpush1.bf16.msra.mxu1 %v8062_v48 }
 0x8f1   :  { %5905 = vmatprep.subr.bf16.mxu1 %v8067_v50 }
 0x8f4   :  { %5906 = vmatpush1.bf16.msra.mxu1 %v8065_v62 }
 0x8f5   :  { %5907 = vmatprep.subr.bf16.mxu1 %v8070_v51 }
 0x8f8   :  { %5908 = vmatpush1.bf16.msra.mxu1 %v8068_v39 }
 0x8f9   :  { %5909 = vmatprep.subr.bf16.mxu1 %v8073_v42 }
 0x8fc   :  { %5910 = vmatpush1.bf16.msra.mxu1 %v8071_v53 }
 0x8fd   :  { %5911 = vmatprep.subr.bf16.mxu1 %v8076_v20 }
 0x900   :  { %5912 = vmatpush1.bf16.msra.mxu1 %v8074_v24 }
 0x901   :  { %5913 = vmatprep.subr.bf16.mxu1 %v8079_v54 }
 0x904   :  { %5914 = vmatpush1.bf16.msra.mxu1 %v8077_v55 }
 0x905   :  { %5915 = vmatprep.subr.bf16.mxu1 %v8082_v56 }
 0x908   :  { %5916 = vmatpush1.bf16.msra.mxu1 %v8080_v32 }
 0x909   :  { %5917 = vmatprep.subr.bf16.mxu1 %v8085_v57 }
 0x90c   :  { %5918 = vmatpush1.bf16.msra.mxu1 %v8083_v35 }
 0x90d   :  { %5919 = vmatprep.subr.bf16.mxu1 %v8088_v58 }
 0x910   :  { %5920 = vmatpush1.bf16.msra.mxu1 %v8086_v60 }
 0x911   :  { %5921 = vmatprep.subr.bf16.mxu1 %v8091_v63 }
 0x914   :  { %5922 = vmatpush1.bf16.msra.mxu1 %v8089_v0 }
 0x915   :  { %5923 = vmatprep.subr.bf16.mxu1 %v8094_v1 }
 0x918   :  { %5924 = vmatpush1.bf16.msra.mxu1 %v8092_v38 }
 0x919   :  { %5925 = vmatprep.subr.bf16.mxu1 %v8097_v5 }
 0x91c   :  { %5926 = vmatpush1.bf16.msra.mxu1 %v8095_v8 }
 0x91d   :  { %5927 = vmatprep.subr.bf16.mxu1 %v8100_v11 }
 0x920   :  { %5928 = vmatpush1.bf16.msra.mxu1 %v8098_v14 }
 0x921   :  { %5929 = vmatprep.subr.bf16.mxu1 %v8103_v26 }
 0x924   :  { %5930 = vmatpush1.bf16.msra.mxu1 %v8101_v17 }
 0x927   :  { %5932 = vmatmul.mubr.bf16.vlgmr.msra.gmra.mrb[40].mxu1 %v5524_v4 }
 0x9fa   :  { %v5933_v3 = vpop.f32.mrb[40].mxu1 }
 0x9fb   :  { %v8685_v52 = vadd.f32 %v5933_v3, %v5531_v18  ;;  %v5935_v25 = vpop.f32.mrb[41].mxu1 }
 0x9fc   :  { %v7059_v6 = vadd.f32 %v5935_v25, %v5535_v49  ;;  %v5937_v28 = vpop.f32.mrb[42].mxu1 }
 0x9fd   :  { %v5940_v7 = vmax.f32 %v8685_v52, 0.0  ;;  %v5938_v13 = vpop.f32.mrb[43].mxu1 }
 0x9fe   :  { %v5941_v31 = vmax.f32 %v7059_v6, 0.0 }
 0x9ff   :  { %8246 = dma.done.wait [#allocation4 + $0x1], 16384 }
 0xa00   :  { %8247 = vsyncadd [#allocation4 + $0x1], 4294950912  ;;  %v8688_v33 = vpack.c.bf16 %v5941_v31, %v5941_v31  ;;  %6290 = vst [vmem:[%s8765_s19] sm:$0xff] %v8605_v16  ;;  %v5947_v34 = vld [vmem:[#allocation3 + $0x8] sm:$0xff]  ;;  %v5949_v23 = vld [vmem:[#allocation3 + $0x18] sm:$0xff]  ;;  %s8780_s0 = sld [smem:[#allocation29_spill]] }
 0xa01   :  { %6291 = vst [vmem:[%s8765_s19 + $0x8] sm:$0xff] %v8598_v2  ;;  %v5946_v27 = vld [vmem:[#allocation3] sm:$0xff]  ;;  %6118 = vmatprep.subr.bf16.mxu0 %v5947_v34  ;;  %6159 = vmatprep.subr.bf16.mxu1 %v5949_v23  ;;  %v5948_v36 = vld [vmem:[#allocation3 + $0x10] sm:$0xff]  ;;  %v5955_v37 = vld [vmem:[#allocation3 + $0x48] sm:$0xff] }
 0xa02   :  { %6150 = vmatprep.mubr.bf16.mxu0 %v8688_v33  ;;  %6191 = vmatprep.mubr.bf16.mxu1 %v8688_v33  ;;  %v5957_v40 = vld [vmem:[#allocation3 + $0x58] sm:$0xff]  ;;  %v5954_v16 = vld [vmem:[#allocation3 + $0x40] sm:$0xff]  ;;  %v5956_v41 = vld [vmem:[#allocation3 + $0x50] sm:$0xff] }
 0xa03   :  { %6119 = vmatpush1.bf16.msra.mxu0 %v5946_v27  ;;  %6160 = vmatpush1.bf16.msra.mxu1 %v5948_v36  ;;  %v5963_v44 = vld [vmem:[#allocation3 + $0x88] sm:$0xff]  ;;  %v5965_v2 = vld [vmem:[#allocation3 + $0x98] sm:$0xff]  ;;  %v5962_v45 = vld [vmem:[#allocation3 + $0x80] sm:$0xff] }
 0xa04   :  { %6120 = vmatprep.subr.bf16.mxu0 %v5955_v37  ;;  %6161 = vmatprep.subr.bf16.mxu1 %v5957_v40  ;;  %v5964_v22 = vld [vmem:[#allocation3 + $0x90] sm:$0xff]  ;;  %v5971_v47 = vld [vmem:[#allocation3 + $0xc8] sm:$0xff]  ;;  %v5973_v48 = vld [vmem:[#allocation3 + $0xd8] sm:$0xff] }
 0xa05   :  { %v5970_v50 = vld [vmem:[#allocation3 + $0xc0] sm:$0xff]  ;;  %v5972_v62 = vld [vmem:[#allocation3 + $0xd0] sm:$0xff]  ;;  %v5979_v51 = vld [vmem:[#allocation3 + $0x108] sm:$0xff] }
 0xa06   :  { %v5981_v39 = vld [vmem:[#allocation3 + $0x118] sm:$0xff]  ;;  %v5978_v42 = vld [vmem:[#allocation3 + $0x100] sm:$0xff]  ;;  %v5980_v53 = vld [vmem:[#allocation3 + $0x110] sm:$0xff] }
 0xa07   :  { %6121 = vmatpush1.bf16.msra.mxu0 %v5954_v16  ;;  %6162 = vmatpush1.bf16.msra.mxu1 %v5956_v41  ;;  %v5987_v20 = vld [vmem:[#allocation3 + $0x148] sm:$0xff]  ;;  %v5989_v24 = vld [vmem:[#allocation3 + $0x158] sm:$0xff]  ;;  %v5986_v54 = vld [vmem:[#allocation3 + $0x140] sm:$0xff] }
 0xa08   :  { %6122 = vmatprep.subr.bf16.mxu0 %v5963_v44  ;;  %6163 = vmatprep.subr.bf16.mxu1 %v5965_v2  ;;  %v5988_v55 = vld [vmem:[#allocation3 + $0x150] sm:$0xff]  ;;  %v5995_v56 = vld [vmem:[#allocation3 + $0x188] sm:$0xff]  ;;  %v5997_v32 = vld [vmem:[#allocation3 + $0x198] sm:$0xff] }
 0xa09   :  { %v5994_v57 = vld [vmem:[#allocation3 + $0x180] sm:$0xff]  ;;  %v5996_v35 = vld [vmem:[#allocation3 + $0x190] sm:$0xff]  ;;  %v6003_v58 = vld [vmem:[#allocation3 + $0x1c8] sm:$0xff] }
 0xa0a   :  { %v6005_v60 = vld [vmem:[#allocation3 + $0x1d8] sm:$0xff]  ;;  %v6002_v63 = vld [vmem:[#allocation3 + $0x1c0] sm:$0xff]  ;;  %v6004_v0 = vld [vmem:[#allocation3 + $0x1d0] sm:$0xff] }
 0xa0b   :  { %6123 = vmatpush1.bf16.msra.mxu0 %v5962_v45  ;;  %6164 = vmatpush1.bf16.msra.mxu1 %v5964_v22  ;;  %v6011_v1 = vld [vmem:[#allocation3 + $0x208] sm:$0xff]  ;;  %v6013_v38 = vld [vmem:[#allocation3 + $0x218] sm:$0xff]  ;;  %v6010_v5 = vld [vmem:[#allocation3 + $0x200] sm:$0xff] }
 0xa0c   :  { %6124 = vmatprep.subr.bf16.mxu0 %v5971_v47  ;;  %6165 = vmatprep.subr.bf16.mxu1 %v5973_v48  ;;  %v6012_v8 = vld [vmem:[#allocation3 + $0x210] sm:$0xff]  ;;  %v6019_v10 = vld [vmem:[#allocation3 + $0x248] sm:$0xff]  ;;  %v6021_v11 = vld [vmem:[#allocation3 + $0x258] sm:$0xff]  ;;  %v8703_v48 = vpack.c.bf16 %v5940_v7, %v5940_v7 }
 0xa0d   :  { %v6018_v14 = vld [vmem:[#allocation3 + $0x240] sm:$0xff]  ;;  %v6020_v30 = vld [vmem:[#allocation3 + $0x250] sm:$0xff]  ;;  %v6027_v26 = vld [vmem:[#allocation3 + $0x288] sm:$0xff] }
 0xa0e   :  { %v6029_v17 = vld [vmem:[#allocation3 + $0x298] sm:$0xff]  ;;  %v6026_v19 = vld [vmem:[#allocation3 + $0x280] sm:$0xff]  ;;  %v6028_v4 = vld [vmem:[#allocation3 + $0x290] sm:$0xff] }
 0xa0f   :  { %6125 = vmatpush1.bf16.msra.mxu0 %v5970_v50  ;;  %6166 = vmatpush1.bf16.msra.mxu1 %v5972_v62  ;;  %v6035_v21 = vld [vmem:[#allocation3 + $0x2c8] sm:$0xff]  ;;  %v6037_v18 = vld [vmem:[#allocation3 + $0x2d8] sm:$0xff]  ;;  %v6034_v49 = vld [vmem:[#allocation3 + $0x2c0] sm:$0xff] }
 0xa10   :  { %6126 = vmatprep.subr.bf16.mxu0 %v5979_v51  ;;  %6167 = vmatprep.subr.bf16.mxu1 %v5981_v39  ;;  %v6036_v3 = vld [vmem:[#allocation3 + $0x2d0] sm:$0xff]  ;;  %v6043_v25 = vld [vmem:[#allocation3 + $0x308] sm:$0xff]  ;;  %v6045_v6 = vld [vmem:[#allocation3 + $0x318] sm:$0xff] }
 0xa11   :  { %v6042_v28 = vld [vmem:[#allocation3 + $0x300] sm:$0xff]  ;;  %v6044_v13 = vld [vmem:[#allocation3 + $0x310] sm:$0xff]  ;;  %v6051_v31 = vld [vmem:[#allocation3 + $0x348] sm:$0xff] }
 0xa12   :  { %v6053_v34 = vld [vmem:[#allocation3 + $0x358] sm:$0xff]  ;;  %v6050_v23 = vld [vmem:[#allocation3 + $0x340] sm:$0xff]  ;;  %v6052_v27 = vld [vmem:[#allocation3 + $0x350] sm:$0xff] }
 0xa13   :  { %6127 = vmatpush1.bf16.msra.mxu0 %v5978_v42  ;;  %6168 = vmatpush1.bf16.msra.mxu1 %v5980_v53  ;;  %v6059_v36 = vld [vmem:[#allocation3 + $0x388] sm:$0xff]  ;;  %v6061_v37 = vld [vmem:[#allocation3 + $0x398] sm:$0xff]  ;;  %v6058_v40 = vld [vmem:[#allocation3 + $0x380] sm:$0xff] }
 0xa14   :  { %6128 = vmatprep.subr.bf16.mxu0 %v5987_v20  ;;  %6169 = vmatprep.subr.bf16.mxu1 %v5989_v24  ;;  %v6060_v16 = vld [vmem:[#allocation3 + $0x390] sm:$0xff]  ;;  %v6067_v41 = vld [vmem:[#allocation3 + $0x3c8] sm:$0xff]  ;;  %v6069_v44 = vld [vmem:[#allocation3 + $0x3d8] sm:$0xff] }
 0xa15   :  { %v6066_v2 = vld [vmem:[#allocation3 + $0x3c0] sm:$0xff]  ;;  %v6068_v45 = vld [vmem:[#allocation3 + $0x3d0] sm:$0xff]  ;;  %v5951_v22 = vld [vmem:[#allocation3 + $0x28] sm:$0xff] }
 0xa16   :  { %v5953_v47 = vld [vmem:[#allocation3 + $0x38] sm:$0xff]  ;;  %v5950_v50 = vld [vmem:[#allocation3 + $0x20] sm:$0xff]  ;;  %v5952_v62 = vld [vmem:[#allocation3 + $0x30] sm:$0xff] }
 0xa17   :  { %6129 = vmatpush1.bf16.msra.mxu0 %v5986_v54  ;;  %6170 = vmatpush1.bf16.msra.mxu1 %v5988_v55  ;;  %v5959_v51 = vld [vmem:[#allocation3 + $0x68] sm:$0xff]  ;;  %v5961_v39 = vld [vmem:[#allocation3 + $0x78] sm:$0xff]  ;;  %v5958_v52 = vld [vmem:[#allocation3 + $0x60] sm:$0xff] }
 0xa18   :  { %6130 = vmatprep.subr.bf16.mxu0 %v5995_v56  ;;  %6171 = vmatprep.subr.bf16.mxu1 %v5997_v32  ;;  %v5960_v42 = vld [vmem:[#allocation3 + $0x70] sm:$0xff]  ;;  %v5967_v7 = vld [vmem:[#allocation3 + $0xa8] sm:$0xff]  ;;  %v5969_v53 = vld [vmem:[#allocation3 + $0xb8] sm:$0xff] }
 0xa19   :  { %v5966_v20 = vld [vmem:[#allocation3 + $0xa0] sm:$0xff]  ;;  %v5968_v24 = vld [vmem:[#allocation3 + $0xb0] sm:$0xff]  ;;  %v5975_v54 = vld [vmem:[#allocation3 + $0xe8] sm:$0xff] }
 0xa1a   :  { %v5977_v55 = vld [vmem:[#allocation3 + $0xf8] sm:$0xff]  ;;  %v5974_v56 = vld [vmem:[#allocation3 + $0xe0] sm:$0xff]  ;;  %v5976_v32 = vld [vmem:[#allocation3 + $0xf0] sm:$0xff] }
 0xa1b   :  { %6131 = vmatpush1.bf16.msra.mxu0 %v5994_v57  ;;  %6172 = vmatpush1.bf16.msra.mxu1 %v5996_v35  ;;  %v5983_v57 = vld [vmem:[#allocation3 + $0x128] sm:$0xff]  ;;  %v5985_v35 = vld [vmem:[#allocation3 + $0x138] sm:$0xff] }
 0xa1c   :  { %6132 = vmatprep.subr.bf16.mxu0 %v6003_v58  ;;  %6173 = vmatprep.subr.bf16.mxu1 %v6005_v60  ;;  %v5984_v58 = vld [vmem:[#allocation3 + $0x130] sm:$0xff]  ;;  %v5991_v60 = vld [vmem:[#allocation3 + $0x168] sm:$0xff] }
 0xa1f   :  { %6133 = vmatpush1.bf16.msra.mxu0 %v6002_v63  ;;  %6174 = vmatpush1.bf16.msra.mxu1 %v6004_v0  ;;  %v5993_v63 = vld [vmem:[#allocation3 + $0x178] sm:$0xff]  ;;  %v5990_v0 = vld [vmem:[#allocation3 + $0x160] sm:$0xff] }
 0xa20   :  { %6134 = vmatprep.subr.bf16.mxu0 %v6011_v1  ;;  %6175 = vmatprep.subr.bf16.mxu1 %v6013_v38  ;;  %v5992_v1 = vld [vmem:[#allocation3 + $0x170] sm:$0xff]  ;;  %v5999_v38 = vld [vmem:[#allocation3 + $0x1a8] sm:$0xff] }
 0xa23   :  { %6135 = vmatpush1.bf16.msra.mxu0 %v6010_v5  ;;  %6176 = vmatpush1.bf16.msra.mxu1 %v6012_v8  ;;  %v6001_v5 = vld [vmem:[#allocation3 + $0x1b8] sm:$0xff]  ;;  %v5998_v8 = vld [vmem:[#allocation3 + $0x1a0] sm:$0xff] }
 0xa24   :  { %6136 = vmatprep.subr.bf16.mxu0 %v6019_v10  ;;  %6177 = vmatprep.subr.bf16.mxu1 %v6021_v11  ;;  %v6000_v10 = vld [vmem:[#allocation3 + $0x1b0] sm:$0xff]  ;;  %v6007_v11 = vld [vmem:[#allocation3 + $0x1e8] sm:$0xff] }
 0xa27   :  { %6137 = vmatpush1.bf16.msra.mxu0 %v6018_v14  ;;  %6178 = vmatpush1.bf16.msra.mxu1 %v6020_v30  ;;  %v6009_v14 = vld [vmem:[#allocation3 + $0x1f8] sm:$0xff]  ;;  %v6006_v30 = vld [vmem:[#allocation3 + $0x1e0] sm:$0xff] }
 0xa28   :  { %6138 = vmatprep.subr.bf16.mxu0 %v6027_v26  ;;  %6179 = vmatprep.subr.bf16.mxu1 %v6029_v17  ;;  %v6008_v26 = vld [vmem:[#allocation3 + $0x1f0] sm:$0xff]  ;;  %v6015_v17 = vld [vmem:[#allocation3 + $0x228] sm:$0xff] }
 0xa2b   :  { %6139 = vmatpush1.bf16.msra.mxu0 %v6026_v19  ;;  %6180 = vmatpush1.bf16.msra.mxu1 %v6028_v4  ;;  %v6017_v19 = vld [vmem:[#allocation3 + $0x238] sm:$0xff]  ;;  %v6014_v4 = vld [vmem:[#allocation3 + $0x220] sm:$0xff] }
 0xa2c   :  { %6140 = vmatprep.subr.bf16.mxu0 %v6035_v21  ;;  %6181 = vmatprep.subr.bf16.mxu1 %v6037_v18  ;;  %v6016_v21 = vld [vmem:[#allocation3 + $0x230] sm:$0xff]  ;;  %v6023_v18 = vld [vmem:[#allocation3 + $0x268] sm:$0xff] }
 0xa2f   :  { %6141 = vmatpush1.bf16.msra.mxu0 %v6034_v49  ;;  %6182 = vmatpush1.bf16.msra.mxu1 %v6036_v3  ;;  %v6025_v49 = vld [vmem:[#allocation3 + $0x278] sm:$0xff]  ;;  %v6022_v3 = vld [vmem:[#allocation3 + $0x260] sm:$0xff] }
 0xa30   :  { %6142 = vmatprep.subr.bf16.mxu0 %v6043_v25  ;;  %6183 = vmatprep.subr.bf16.mxu1 %v6045_v6  ;;  %v6024_v25 = vld [vmem:[#allocation3 + $0x270] sm:$0xff]  ;;  %v6031_v6 = vld [vmem:[#allocation3 + $0x2a8] sm:$0xff] }
 0xa33   :  { %6143 = vmatpush1.bf16.msra.mxu0 %v6042_v28  ;;  %6184 = vmatpush1.bf16.msra.mxu1 %v6044_v13  ;;  %v6033_v28 = vld [vmem:[#allocation3 + $0x2b8] sm:$0xff]  ;;  %v6030_v13 = vld [vmem:[#allocation3 + $0x2a0] sm:$0xff] }
 0xa34   :  { %6144 = vmatprep.subr.bf16.mxu0 %v6051_v31  ;;  %6185 = vmatprep.subr.bf16.mxu1 %v6053_v34  ;;  %v6032_v31 = vld [vmem:[#allocation3 + $0x2b0] sm:$0xff]  ;;  %v6039_v34 = vld [vmem:[#allocation3 + $0x2e8] sm:$0xff] }
 0xa37   :  { %6145 = vmatpush1.bf16.msra.mxu0 %v6050_v23  ;;  %6186 = vmatpush1.bf16.msra.mxu1 %v6052_v27  ;;  %v6041_v23 = vld [vmem:[#allocation3 + $0x2f8] sm:$0xff]  ;;  %v6038_v27 = vld [vmem:[#allocation3 + $0x2e0] sm:$0xff] }
 0xa38   :  { %6146 = vmatprep.subr.bf16.mxu0 %v6059_v36  ;;  %6187 = vmatprep.subr.bf16.mxu1 %v6061_v37  ;;  %v6040_v36 = vld [vmem:[#allocation3 + $0x2f0] sm:$0xff]  ;;  %v6047_v37 = vld [vmem:[#allocation3 + $0x328] sm:$0xff] }
 0xa3b   :  { %6147 = vmatpush1.bf16.msra.mxu0 %v6058_v40  ;;  %6188 = vmatpush1.bf16.msra.mxu1 %v6060_v16  ;;  %v6049_v40 = vld [vmem:[#allocation3 + $0x338] sm:$0xff]  ;;  %v6046_v16 = vld [vmem:[#allocation3 + $0x320] sm:$0xff] }
 0xa3c   :  { %6148 = vmatprep.subr.bf16.mxu0 %v6067_v41  ;;  %6189 = vmatprep.subr.bf16.mxu1 %v6069_v44  ;;  %v6048_v41 = vld [vmem:[#allocation3 + $0x330] sm:$0xff]  ;;  %v6055_v44 = vld [vmem:[#allocation3 + $0x368] sm:$0xff] }
 0xa3f   :  { %6149 = vmatpush1.bf16.msra.mxu0 %v6066_v2  ;;  %6190 = vmatpush1.bf16.msra.mxu1 %v6068_v45  ;;  %v6057_v2 = vld [vmem:[#allocation3 + $0x378] sm:$0xff]  ;;  %v6054_v45 = vld [vmem:[#allocation3 + $0x360] sm:$0xff] }
 0xa40   :  { %6200 = vmatprep.subr.bf16.mxu0 %v5951_v22  ;;  %6241 = vmatprep.subr.bf16.mxu1 %v5953_v47  ;;  %v6056_v22 = vld [vmem:[#allocation3 + $0x370] sm:$0xff]  ;;  %v6063_v47 = vld [vmem:[#allocation3 + $0x3a8] sm:$0xff] }
 0xa42   :  { %6151 = vmatmul.mubr.bf16.vlgmr.msra.gmra.mrb[20].mxu0 %v8703_v48  ;;  %6192 = vmatmul.mubr.bf16.vlgmr.msra.gmra.mrb[44].mxu1 %v8703_v48 }
 0xa43   :  { %6201 = vmatpush1.bf16.msra.mxu0 %v5950_v50  ;;  %6242 = vmatpush1.bf16.msra.mxu1 %v5952_v62  ;;  %v6065_v50 = vld [vmem:[#allocation3 + $0x3b8] sm:$0xff]  ;;  %v6062_v62 = vld [vmem:[#allocation3 + $0x3a0] sm:$0xff] }
 0xa44   :  { %6202 = vmatprep.subr.bf16.mxu0 %v5959_v51  ;;  %6243 = vmatprep.subr.bf16.mxu1 %v5961_v39  ;;  %v6064_v51 = vld [vmem:[#allocation3 + $0x3b0] sm:$0xff]  ;;  %v6071_v39 = vld [vmem:[#allocation3 + $0x3e8] sm:$0xff] }
 0xa45   :  { %6232 = vmatprep.mubr.bf16.mxu0 %v8688_v33  ;;  %6273 = vmatprep.mubr.bf16.mxu1 %v8688_v33  ;;  %v5982_v33 = vld [vmem:[#allocation3 + $0x120] sm:$0xff] }
 0xa47   :  { %6203 = vmatpush1.bf16.msra.mxu0 %v5958_v52  ;;  %6244 = vmatpush1.bf16.msra.mxu1 %v5960_v42  ;;  %v6073_v52 = vld [vmem:[#allocation3 + $0x3f8] sm:$0xff]  ;;  %v6070_v42 = vld [vmem:[#allocation3 + $0x3e0] sm:$0xff] }
 0xa48   :  { %6204 = vmatprep.subr.bf16.mxu0 %v5967_v7  ;;  %6245 = vmatprep.subr.bf16.mxu1 %v5969_v53  ;;  %v6072_v7 = vld [vmem:[#allocation3 + $0x3f0] sm:$0xff]  ;;  %v6076_v53 = vld [vmem:[%s8763_s17] sm:$0xff] }
 0xa4b   :  { %6205 = vmatpush1.bf16.msra.mxu0 %v5966_v20  ;;  %6246 = vmatpush1.bf16.msra.mxu1 %v5968_v24  ;;  %v6081_v20 = vrot.slane %v6076_v53, %v8501_v12  ;;  %v6089_v24 = vrot.slane %v6076_v53, %v8533_v43  ;;  %v6108_v43 = vsub.s32 7, %v8498_v9 }
 0xa4c   :  { %6206 = vmatprep.subr.bf16.mxu0 %v5975_v54  ;;  %6247 = vmatprep.subr.bf16.mxu1 %v5977_v55  ;;  %v6085_v54 = vrot.slane %v6076_v53, %v8507_v15  ;;  %v6093_v55 = vrot.slane %v6076_v53, %v8536_v46  ;;  %v6097_v46 = vrot.slane %v6076_v53, %v8578_v59 }
 0xa4f   :  { %6207 = vmatpush1.bf16.msra.mxu0 %v5974_v56  ;;  %6248 = vmatpush1.bf16.msra.mxu1 %v5976_v32 }
 0xa50   :  { %6208 = vmatprep.subr.bf16.mxu0 %v5983_v57  ;;  %6249 = vmatprep.subr.bf16.mxu1 %v5985_v35 }
 0xa53   :  { %6209 = vmatpush1.bf16.msra.mxu0 %v5982_v33  ;;  %6250 = vmatpush1.bf16.msra.mxu1 %v5984_v58 }
 0xa54   :  { %6210 = vmatprep.subr.bf16.mxu0 %v5991_v60  ;;  %6251 = vmatprep.subr.bf16.mxu1 %v5993_v63 }
 0xa57   :  { %6211 = vmatpush1.bf16.msra.mxu0 %v5990_v0  ;;  %6252 = vmatpush1.bf16.msra.mxu1 %v5992_v1  ;;  %v6105_v1 = vrot.slane %v6076_v53, %v8589_v29 }
 0xa58   :  { %6212 = vmatprep.subr.bf16.mxu0 %v5999_v38  ;;  %6253 = vmatprep.subr.bf16.mxu1 %v6001_v5  ;;  %v6101_v38 = vrot.slane %v6076_v53, %v8581_v61  ;;  %v6109_v5 = vrot.slane %v6076_v53, %v6108_v43 }
 0xa5b   :  { %6213 = vmatpush1.bf16.msra.mxu0 %v5998_v8  ;;  %6254 = vmatpush1.bf16.msra.mxu1 %v6000_v10 }
 0xa5c   :  { %6214 = vmatprep.subr.bf16.mxu0 %v6007_v11  ;;  %6255 = vmatprep.subr.bf16.mxu1 %v6009_v14 }
 0xa5f   :  { %6215 = vmatpush1.bf16.msra.mxu0 %v6006_v30  ;;  %6256 = vmatpush1.bf16.msra.mxu1 %v6008_v26 }
 0xa60   :  { %6216 = vmatprep.subr.bf16.mxu0 %v6015_v17  ;;  %6257 = vmatprep.subr.bf16.mxu1 %v6017_v19 }
 0xa63   :  { %6217 = vmatpush1.bf16.msra.mxu0 %v6014_v4  ;;  %6258 = vmatpush1.bf16.msra.mxu1 %v6016_v21 }
 0xa64   :  { %6218 = vmatprep.subr.bf16.mxu0 %v6023_v18  ;;  %6259 = vmatprep.subr.bf16.mxu1 %v6025_v49 }
 0xa67   :  { %6219 = vmatpush1.bf16.msra.mxu0 %v6022_v3  ;;  %6260 = vmatpush1.bf16.msra.mxu1 %v6024_v25 }
 0xa68   :  { %6220 = vmatprep.subr.bf16.mxu0 %v6031_v6  ;;  %6261 = vmatprep.subr.bf16.mxu1 %v6033_v28 }
 0xa6b   :  { %6221 = vmatpush1.bf16.msra.mxu0 %v6030_v13  ;;  %6262 = vmatpush1.bf16.msra.mxu1 %v6032_v31 }
 0xa6c   :  { %6222 = vmatprep.subr.bf16.mxu0 %v6039_v34  ;;  %6263 = vmatprep.subr.bf16.mxu1 %v6041_v23 }
 0xa6f   :  { %6223 = vmatpush1.bf16.msra.mxu0 %v6038_v27  ;;  %6264 = vmatpush1.bf16.msra.mxu1 %v6040_v36 }
 0xa70   :  { %6224 = vmatprep.subr.bf16.mxu0 %v6047_v37  ;;  %6265 = vmatprep.subr.bf16.mxu1 %v6049_v40 }
 0xa73   :  { %6225 = vmatpush1.bf16.msra.mxu0 %v6046_v16  ;;  %6266 = vmatpush1.bf16.msra.mxu1 %v6048_v41 }
 0xa74   :  { %6226 = vmatprep.subr.bf16.mxu0 %v6055_v44  ;;  %6267 = vmatprep.subr.bf16.mxu1 %v6057_v2 }
 0xa77   :  { %6227 = vmatpush1.bf16.msra.mxu0 %v6054_v45  ;;  %6268 = vmatpush1.bf16.msra.mxu1 %v6056_v22 }
 0xa78   :  { %6228 = vmatprep.subr.bf16.mxu0 %v6063_v47  ;;  %6269 = vmatprep.subr.bf16.mxu1 %v6065_v50 }
 0xa7b   :  { %6229 = vmatpush1.bf16.msra.mxu0 %v6062_v62  ;;  %6270 = vmatpush1.bf16.msra.mxu1 %v6064_v51 }
 0xa7c   :  { %6230 = vmatprep.subr.bf16.mxu0 %v6071_v39  ;;  %6271 = vmatprep.subr.bf16.mxu1 %v6073_v52 }
 0xa7f   :  { %6231 = vmatpush1.bf16.msra.mxu0 %v6070_v42  ;;  %6272 = vmatpush1.bf16.msra.mxu1 %v6072_v7 }
 0xa82   :  { %6233 = vmatmul.mubr.bf16.vlgmr.msra.gmra.mrb[24].mxu0 %v8703_v48  ;;  %6274 = vmatmul.mubr.bf16.vlgmr.msra.gmra.mrb[48].mxu1 %v8703_v48 }
 0xb15   :  { %v6152_v56 = vpop.f32.mrb[20].mxu0  ;;  %v6193_v32 = vpop.f32.mrb[44].mxu1 }
 0xb16   :  { %v6153_v57 = vadd.f32 %v6152_v56, %v6081_v20  ;;  %v6194_v35 = vadd.f32 %v6193_v32, %v6089_v24  ;;  %v6154_v33 = vpop.f32.mrb[21].mxu0  ;;  %v6195_v58 = vpop.f32.mrb[45].mxu1 }
 0xb17   :  { %v6155_v60 = vadd.f32 %v6154_v33, %v6085_v54  ;;  %v6196_v48 = vadd.f32 %v6195_v58, %v6093_v55  ;;  %v6156_v63 = vpop.f32.mrb[22].mxu0  ;;  %v6197_v0 = vpop.f32.mrb[46].mxu1 }
 0xb18   :  { %6282 = vst [vmem:[%s8780_s0] sm:$0xff] %v6153_v57  ;;  %6284 = vst [vmem:[%s8780_s0 + $0x10] sm:$0xff] %v6194_v35  ;;  %v6157_v12 = vpop.f32.mrb[23].mxu0  ;;  %v6198_v15 = vpop.f32.mrb[47].mxu1 }
 0xb19   :  { %6283 = vst [vmem:[%s8780_s0 + $0x8] sm:$0xff] %v6155_v60  ;;  %6285 = vst [vmem:[%s8780_s0 + $0x18] sm:$0xff] %v6196_v48 }
 0xb55   :  { %v6234_v8 = vpop.f32.mrb[24].mxu0  ;;  %v6275_v10 = vpop.f32.mrb[48].mxu1 }
 0xb56   :  { %v6235_v11 = vadd.f32 %v6234_v8, %v6097_v46  ;;  %v6276_v14 = vadd.f32 %v6275_v10, %v6105_v1  ;;  %v6236_v30 = vpop.f32.mrb[25].mxu0  ;;  %v6277_v26 = vpop.f32.mrb[49].mxu1 }
 0xb57   :  { %v6237_v17 = vadd.f32 %v6236_v30, %v6101_v38  ;;  %v6278_v19 = vadd.f32 %v6277_v26, %v6109_v5  ;;  %v6238_v4 = vpop.f32.mrb[26].mxu0  ;;  %v6279_v21 = vpop.f32.mrb[50].mxu1 }
 0xb58   :  { %6286 = vst [vmem:[%s8780_s0 + $0x20] sm:$0xff] %v6235_v11  ;;  %6288 = vst [vmem:[%s8780_s0 + $0x30] sm:$0xff] %v6276_v14  ;;  %v6239_v9 = vpop.f32.mrb[27].mxu0  ;;  %v6280_v59 = vpop.f32.mrb[51].mxu1 }
 0xb59   :  { %6287 = vst [vmem:[%s8780_s0 + $0x28] sm:$0xff] %v6237_v17  ;;  %6289 = vst [vmem:[%s8780_s0 + $0x38] sm:$0xff] %v6278_v19 }
 0xb5a   :  { %6300 = vsyncpa [#allocation6], 1 }
 0xb5b   :  { %6301 = vsyncpa [#allocation8], 1 }
 0xb5c   :  { %6302 = vsyncpa [#allocation11], 1 }
 0xb5d   :  { %6303 = vsyncpa [#allocation14], 1 }
 0xb5e   :  { %6304 = vsyncmov [#allocation4] }
 0xb61   :  { %s6305_s30 = vpop.sfrf %6304 }
 0xb62   :  { %p6969_p6 = scmp.ne.s32.totalorder %s6305_s30, 0 }
 0xb64   :  { %6309 = shalt.err (%p6969_p6)  }
 0xb65   :  { %6311 = vsyncmov [#allocation4 + $0x1] }
 0xb68   :  { %s6312_s26 = vpop.sfrf %6311 }
 0xb69   :  { %p6970_p7 = scmp.ne.s32.totalorder %s6312_s26, 0 }
 0xb6b   :  { %6316 = shalt.err (%p6970_p7)  }

</bundles_post_ra>
